<compile_context>
chip_gen: v7x
topology: tpu7x:2x2x1
jax: 0.10.0
libtpu: 0.0.40
codegen_flags: <defaults>
</compile_context>

<pallas_src>
import math
import jax
import jax.numpy as jnp
from jax import lax
from jax.experimental import pallas as pl
from jax.experimental.pallas import tpu as pltpu

# ---------------- tiny synthetic config ----------------
VOCAB = 100
HIDDEN = 32
N_HEADS = 4
HEAD_DIM = HIDDEN // N_HEADS
INTERMEDIATE = 64
N_LAYERS = 2
MAX_POS = 16
TYPE_VOCAB = 2
LSTM_HIDDEN = 16
NUM_CLASSES = 2
LN_EPS = 1e-12
BATCH = 2
SEQ = 8


# ---------------- the single fused Pallas kernel ----------------
def _fused_forward_kernel(x_ref, mask_ref, embg_ref, embb_ref,
                          wqkv_ref, bqkv_ref, wo_ref, bo_ref,
                          ln1g_ref, ln1b_ref,
                          w1_ref, b1_ref, w2_ref, b2_ref,
                          ln2g_ref, ln2b_ref,
                          wih_ref, ball_ref, whhf_ref, whhb_ref,
                          clsw_ref, clsb_ref,
                          o_ref, ctx_ref, xp_ref):
    # x: [B*T, H] f32 (embedding sum, pre-LN), lane-dense row order (b*T + t).
    # All matmul weights are bf16, pre-transposed to [in, out]; biases/LN f32.
    B, T = mask_ref.shape
    H = x_ref.shape[-1]
    dh = H // N_HEADS
    Hh = LSTM_HIDDEN

    def ln(v, g, b):
        mu = jnp.mean(v, axis=-1, keepdims=True)
        var = jnp.mean((v - mu) ** 2, axis=-1, keepdims=True)
        return (v - mu) * lax.rsqrt(var + LN_EPS) * g + b

    def bdot(a, w):  # bf16 MXU matmul, f32 accumulation
        return jnp.dot(a.astype(jnp.bfloat16), w,
                       preferred_element_type=jnp.float32)

    # ---- embedding LayerNorm ----
    x = ln(x_ref[...], embg_ref[...], embb_ref[...])

    # additive attention bias computed ONCE, reused by every layer
    neg_bias = (1.0 - mask_ref[...]) * (-1e9)                    # [B, T]
    scale = 1.0 / math.sqrt(dh)

    # ---- BERT encoder layers (Python loop -> fully unrolled; stacked weight
    #      refs indexed with static layer ids, so x stays VMEM/vreg resident) ----
    for l in range(N_LAYERS):
        # fused Q|K|V projection: one matmul, 96-lane output
        qkv = bdot(x, wqkv_ref[l]) + bqkv_ref[l]                 # [B*T, 3H]
        q, k, v = qkv[:, :H], qkv[:, H:2 * H], qkv[:, 2 * H:]

        # scores for all (batch, head) pairs, stacked along sublanes
        s_parts = []
        for b in range(B):
            bias_b = neg_bias[b:b + 1, :]                        # [1, T]
            for h in range(N_HEADS):
                sl = slice(h * dh, (h + 1) * dh)
                qh = q[b * T:(b + 1) * T, sl].astype(jnp.bfloat16)
                kh = k[b * T:(b + 1) * T, sl].astype(jnp.bfloat16)
                s = lax.dot_general(qh, kh, (((1,), (1,)), ((), ())),
                                    preferred_element_type=jnp.float32)
                s_parts.append(s * scale + bias_b)
        S = jnp.concatenate(s_parts, axis=0)                     # [B*nH*T, T]

        # one batched softmax: single max / exp / sum / reciprocal
        m = jnp.max(S, axis=-1, keepdims=True)
        E = jnp.exp(S - m)
        P = E * pl.reciprocal(jnp.sum(E, axis=-1, keepdims=True), approx=True)

        # per-head context written straight into a resident VMEM scratch
        # (no lane-axis concat chains)
        for b in range(B):
            for h in range(N_HEADS):
                sl = slice(h * dh, (h + 1) * dh)
                idx = b * N_HEADS + h
                p = P[idx * T:(idx + 1) * T, :].astype(jnp.bfloat16)
                vh = v[b * T:(b + 1) * T, sl].astype(jnp.bfloat16)
                ctx_ref[b * T:(b + 1) * T, sl] = jnp.dot(
                    p, vh, preferred_element_type=jnp.float32)

        ao = bdot(ctx_ref[...], wo_ref[l]) + bo_ref[l]
        x1 = ln(x + ao, ln1g_ref[l], ln1b_ref[l])

        # TODO(synk): HF BERT uses exact erf GELU; tanh approximation used here.
        hmid = jax.nn.gelu(bdot(x1, w1_ref[l]) + b1_ref[l], approximate=True)
        ffo = bdot(hmid, w2_ref[l]) + b2_ref[l]
        x = ln(x1 + ffo, ln2g_ref[l], ln2b_ref[l])

    # ---- bidirectional LSTM (recurrence unrolled over static T) + classifier ----
    # Fused fwd|bwd input projection for every time step: one matmul with an
    # exactly lane-dense 128-wide output, written once to VMEM scratch.
    # TODO(synk): like a naive unpacked PyTorch BertLSTM, the LSTM ignores
    # attention_mask — padded positions are consumed by the recurrence.
    xp_ref[...] = bdot(x, wih_ref[...]) + ball_ref[...]          # [B*T, 8*Hh]
    whhf = whhf_ref[...]
    whhb = whhb_ref[...]

    def cell(pre, h, c, whh):
        # gate columns pre-packed as (i, f, o | g)
        gates = pre + jnp.dot(h.astype(jnp.bfloat16), whh,
                              preferred_element_type=jnp.float32)  # [B, 4*Hh]
        sig = jax.nn.sigmoid(gates[:, :3 * Hh])
        g = jnp.tanh(gates[:, 3 * Hh:])
        i = sig[:, :Hh]
        f = sig[:, Hh:2 * Hh]
        o = sig[:, 2 * Hh:3 * Hh]
        c_new = f * c + i * g
        return o * jnp.tanh(c_new), c_new

    zeros = jnp.zeros((B, Hh), jnp.float32)
    h_f, c_f, h_b, c_b = zeros, zeros, zeros, zeros
    for t in range(T):
        # batch rows of time step t live at rows {t, t+T}: one strided
        # 2-sublane load per direction (no per-step slice+concat gathers)
        rows_f = xp_ref[pl.ds(t, B, stride=T), :]
        rows_b = xp_ref[pl.ds(T - 1 - t, B, stride=T), :]
        h_f, c_f = cell(rows_f[:, :4 * Hh], h_f, c_f, whhf)
        h_b, c_b = cell(rows_b[:, 4 * Hh:], h_b, c_b, whhb)

    # lstm_output[:, -1, :Hh] == h_f ; lstm_output[:, 0, Hh:] == h_b
    combined = jnp.concatenate([h_f, h_b], axis=1)               # [B, 2*Hh]
    # nn.Dropout(0.3) is identity in eval mode; classifier Linear fused here.
    o_ref[...] = (jnp.dot(combined.astype(jnp.bfloat16), clsw_ref[...],
                          preferred_element_type=jnp.float32) + clsb_ref[...])


# ---------------- parameters ----------------
def init_params(key):
    keys = iter(jax.random.split(key, 256))

    def nrm(shape):
        return jax.random.normal(next(keys), shape, jnp.float32) * 0.02

    params = {
        "word_emb": nrm((VOCAB, HIDDEN)),
        "pos_emb": nrm((MAX_POS, HIDDEN)),
        "type_emb": nrm((TYPE_VOCAB, HIDDEN)),
        "emb_ln_g": jnp.ones((HIDDEN,), jnp.float32),
        "emb_ln_b": jnp.zeros((HIDDEN,), jnp.float32),
        "layers": [],
    }
    for _ in range(N_LAYERS):
        params["layers"].append(
            {
                "wq": nrm((HIDDEN, HIDDEN)), "bq": jnp.zeros((HIDDEN,), jnp.float32),
                "wk": nrm((HIDDEN, HIDDEN)), "bk": jnp.zeros((HIDDEN,), jnp.float32),
                "wv": nrm((HIDDEN, HIDDEN)), "bv": jnp.zeros((HIDDEN,), jnp.float32),
                "wo": nrm((HIDDEN, HIDDEN)), "bo": jnp.zeros((HIDDEN,), jnp.float32),
                "ln1_g": jnp.ones((HIDDEN,), jnp.float32),
                "ln1_b": jnp.zeros((HIDDEN,), jnp.float32),
                "w1": nrm((INTERMEDIATE, HIDDEN)),
                "b1": jnp.zeros((INTERMEDIATE,), jnp.float32),
                "w2": nrm((HIDDEN, INTERMEDIATE)),
                "b2": jnp.zeros((HIDDEN,), jnp.float32),
                "ln2_g": jnp.ones((HIDDEN,), jnp.float32),
                "ln2_b": jnp.zeros((HIDDEN,), jnp.float32),
            }
        )
    params["lstm"] = {
        "wih_f": nrm((4 * LSTM_HIDDEN, HIDDEN)),
        "whh_f": nrm((4 * LSTM_HIDDEN, LSTM_HIDDEN)),
        "bih_f": jnp.zeros((4 * LSTM_HIDDEN,), jnp.float32),
        "bhh_f": jnp.zeros((4 * LSTM_HIDDEN,), jnp.float32),
        "wih_b": nrm((4 * LSTM_HIDDEN, HIDDEN)),
        "whh_b": nrm((4 * LSTM_HIDDEN, LSTM_HIDDEN)),
        "bih_b": jnp.zeros((4 * LSTM_HIDDEN,), jnp.float32),
        "bhh_b": jnp.zeros((4 * LSTM_HIDDEN,), jnp.float32),
    }
    params["cls_w"] = nrm((NUM_CLASSES, 2 * LSTM_HIDDEN))
    params["cls_b"] = jnp.zeros((NUM_CLASSES,), jnp.float32)
    return params


def prepare_params(params):
    """One-time repack (outside the forward pass): transpose all Linear / LSTM
    weights from PyTorch [out, in] to [in, out] and cast to bf16, fuse Q|K|V and
    fwd|bwd-LSTM input projections, pre-add the LSTM bias pairs, reorder LSTM
    gate columns to (i, f, o | g), stack per-layer weights along a leading
    N_LAYERS axis, and reshape biases / LN params to [1, N]."""
    def bf16(a):
        return a.astype(jnp.bfloat16)

    Hh = LSTM_HIDDEN

    def reorder_gates(a):
        # PyTorch gate blocks (i, f, g, o) -> (i, f, o, g)
        return jnp.concatenate(
            [a[:2 * Hh], a[3 * Hh:4 * Hh], a[2 * Hh:3 * Hh]], axis=0)

    layers = params["layers"]
    prepped = {
        "word_emb": params["word_emb"],
        "pos_emb": params["pos_emb"],
        "type_emb": params["type_emb"],
        "emb_ln_g": params["emb_ln_g"].reshape(1, -1),
        "emb_ln_b": params["emb_ln_b"].reshape(1, -1),
        "wqkvT": bf16(jnp.stack(
            [jnp.concatenate([p["wq"].T, p["wk"].T, p["wv"].T], axis=1)
             for p in layers])),                                   # [L, H, 3H]
        "bqkv": jnp.stack(
            [jnp.concatenate([p["bq"], p["bk"], p["bv"]]).reshape(1, -1)
             for p in layers]),                                    # [L, 1, 3H]
        "woT": bf16(jnp.stack([p["wo"].T for p in layers])),       # [L, H, H]
        "bo": jnp.stack([p["bo"].reshape(1, -1) for p in layers]),
        "ln1_g": jnp.stack([p["ln1_g"].reshape(1, -1) for p in layers]),
        "ln1_b": jnp.stack([p["ln1_b"].reshape(1, -1) for p in layers]),
        "w1T": bf16(jnp.stack([p["w1"].T for p in layers])),       # [L, H, I]
        "b1": jnp.stack([p["b1"].reshape(1, -1) for p in layers]),
        "w2T": bf16(jnp.stack([p["w2"].T for p in layers])),       # [L, I, H]
        "b2": jnp.stack([p["b2"].reshape(1, -1) for p in layers]),
        "ln2_g": jnp.stack([p["ln2_g"].reshape(1, -1) for p in layers]),
        "ln2_b": jnp.stack([p["ln2_b"].reshape(1, -1) for p in layers]),
    }

    lp = params["lstm"]
    wih_f = reorder_gates(lp["wih_f"])
    whh_f = reorder_gates(lp["whh_f"])
    b_f = reorder_gates(lp["bih_f"] + lp["bhh_f"])
    wih_b = reorder_gates(lp["wih_b"])
    whh_b = reorder_gates(lp["whh_b"])
    b_b = reorder_gates(lp["bih_b"] + lp["bhh_b"])
    prepped["wih_all"] = bf16(jnp.concatenate([wih_f.T, wih_b.T], axis=1))  # [H, 8Hh]
    prepped["b_all"] = jnp.concatenate([b_f, b_b]).reshape(1, -1)           # [1, 8Hh]
    prepped["whhT_f"] = bf16(whh_f.T)                                       # [Hh, 4Hh]
    prepped["whhT_b"] = bf16(whh_b.T)
    prepped["clsT"] = bf16(params["cls_w"].T)                               # [2Hh, C]
    prepped["cls_b"] = params["cls_b"].reshape(1, -1)
    return prepped


# ---------------- forward ----------------
def bert_lstm_forward(prepped, input_ids, attention_mask):
    B, T = input_ids.shape
    mask = attention_mask.astype(jnp.float32)

    # Embedding gathers stay in XLA (glue); everything else runs inside ONE
    # fused gridless pallas_call.
    x = (prepped["word_emb"][input_ids]
         + prepped["pos_emb"][:T][None, :, :]
         + prepped["type_emb"][0][None, None, :])
    x2 = x.reshape(B * T, HIDDEN)

    args = (x2, mask,
            prepped["emb_ln_g"], prepped["emb_ln_b"],
            prepped["wqkvT"], prepped["bqkv"], prepped["woT"], prepped["bo"],
            prepped["ln1_g"], prepped["ln1_b"],
            prepped["w1T"], prepped["b1"], prepped["w2T"], prepped["b2"],
            prepped["ln2_g"], prepped["ln2_b"],
            prepped["wih_all"], prepped["b_all"],
            prepped["whhT_f"], prepped["whhT_b"],
            prepped["clsT"], prepped["cls_b"])

    BT = B * T
    flops_layer = (2 * BT * HIDDEN * 3 * HIDDEN                    # fused QKV
                   + 2 * 2 * B * N_HEADS * T * T * HEAD_DIM        # scores + ctx
                   + 2 * BT * HIDDEN * HIDDEN                      # output proj
                   + 2 * 2 * BT * HIDDEN * INTERMEDIATE)           # FFN
    flops = (N_LAYERS * flops_layer
             + 2 * BT * HIDDEN * 8 * LSTM_HIDDEN                   # bidir in-proj
             + 2 * T * 2 * B * LSTM_HIDDEN * 4 * LSTM_HIDDEN       # recurrence
             + 2 * B * 2 * LSTM_HIDDEN * NUM_CLASSES)              # classifier
    transcendentals = (N_LAYERS * (B * N_HEADS * T * T + BT * INTERMEDIATE + 2 * BT)
                       + 2 * T * B * 5 * LSTM_HIDDEN)
    bytes_accessed = int(sum(math.prod(a.shape) * jnp.dtype(a.dtype).itemsize
                             for a in args) + B * NUM_CLASSES * 4)

    return pl.pallas_call(
        _fused_forward_kernel,
        out_shape=jax.ShapeDtypeStruct((B, NUM_CLASSES), jnp.float32),
        scratch_shapes=[
            pltpu.VMEM((B * T, HIDDEN), jnp.float32),              # attention ctx
            pltpu.VMEM((B * T, 8 * LSTM_HIDDEN), jnp.float32),     # LSTM in-proj
        ],
        cost_estimate=pl.CostEstimate(flops=flops,
                                      transcendentals=transcendentals,
                                      bytes_accessed=bytes_accessed),
    )(*args)


if __name__ == "__main__":
    key = jax.random.PRNGKey(0)
    pkey, ikey = jax.random.split(key)
    params = init_params(pkey)
    prepped = prepare_params(params)

    input_ids = jax.random.randint(ikey, (BATCH, SEQ), 0, VOCAB, dtype=jnp.int32)
    attention_mask = jnp.array(
        [[1] * SEQ, [1] * (SEQ - 2) + [0] * 2], dtype=jnp.int32
    )

    forward = jax.jit(bert_lstm_forward)
    logits = jax.block_until_ready(forward(prepped, input_ids, attention_mask))
    assert logits.shape == (BATCH, NUM_CLASSES)
    assert bool(jnp.all(jnp.isfinite(logits)))
    print("KERNEL_OK")
</pallas_src>

<mosaic_0001>
module attributes {stable_mosaic.version = 11 : i64} {
  func.func @_fused_forward_kernel(%arg0: memref<16x32xf32, #tpu.memory_space<vmem>>, %arg1: memref<2x8xf32, #tpu.memory_space<vmem>>, %arg2: memref<1x32xf32, #tpu.memory_space<vmem>>, %arg3: memref<1x32xf32, #tpu.memory_space<vmem>>, %arg4: memref<2x32x96xbf16, #tpu.memory_space<vmem>>, %arg5: memref<2x1x96xf32, #tpu.memory_space<vmem>>, %arg6: memref<2x32x32xbf16, #tpu.memory_space<vmem>>, %arg7: memref<2x1x32xf32, #tpu.memory_space<vmem>>, %arg8: memref<2x1x32xf32, #tpu.memory_space<vmem>>, %arg9: memref<2x1x32xf32, #tpu.memory_space<vmem>>, %arg10: memref<2x32x64xbf16, #tpu.memory_space<vmem>>, %arg11: memref<2x1x64xf32, #tpu.memory_space<vmem>>, %arg12: memref<2x64x32xbf16, #tpu.memory_space<vmem>>, %arg13: memref<2x1x32xf32, #tpu.memory_space<vmem>>, %arg14: memref<2x1x32xf32, #tpu.memory_space<vmem>>, %arg15: memref<2x1x32xf32, #tpu.memory_space<vmem>>, %arg16: memref<32x128xbf16, #tpu.memory_space<vmem>>, %arg17: memref<1x128xf32, #tpu.memory_space<vmem>>, %arg18: memref<16x64xbf16, #tpu.memory_space<vmem>>, %arg19: memref<16x64xbf16, #tpu.memory_space<vmem>>, %arg20: memref<32x2xbf16, #tpu.memory_space<vmem>>, %arg21: memref<1x2xf32, #tpu.memory_space<vmem>>, %arg22: memref<2x2xf32, #tpu.memory_space<vmem>>, %arg23: memref<16x32xf32, #tpu.memory_space<vmem>>, %arg24: memref<16x128xf32, #tpu.memory_space<vmem>>) attributes {dimension_semantics = [], scalar_prefetch = 0 : i64, scratch_operands = 2 : i64, tpu.core_type = #tpu.core_type<tc>} {
    %c0 = arith.constant 0 : index
    %c0_0 = arith.constant 0 : index
    %0 = vector.load %arg0[%c0, %c0_0] : memref<16x32xf32, #tpu.memory_space<vmem>>, vector<16x32xf32>
    %c0_1 = arith.constant 0 : index
    %c0_2 = arith.constant 0 : index
    %1 = vector.load %arg2[%c0_1, %c0_2] : memref<1x32xf32, #tpu.memory_space<vmem>>, vector<1x32xf32>
    %c0_3 = arith.constant 0 : index
    %c0_4 = arith.constant 0 : index
    %2 = vector.load %arg3[%c0_3, %c0_4] : memref<1x32xf32, #tpu.memory_space<vmem>>, vector<1x32xf32>
    %cst = arith.constant dense<0.000000e+00> : vector<16xf32>
    %3 = vector.multi_reduction <add>, %0, %cst [1] : vector<16x32xf32> to vector<16xf32>
    %4 = vector.shape_cast %3 : vector<16xf32> to vector<16x1xf32>
    %cst_5 = arith.constant 3.200000e+01 : f32
    %5 = vector.broadcast %cst_5 : f32 to vector<16x1xf32>
    %6 = arith.divf %4, %5 : vector<16x1xf32>
    %7 = vector.broadcast %6 : vector<16x1xf32> to vector<16x32xf32>
    %8 = arith.subf %0, %7 : vector<16x32xf32>
    %9 = arith.mulf %8, %8 : vector<16x32xf32>
    %cst_6 = arith.constant dense<0.000000e+00> : vector<16xf32>
    %10 = vector.multi_reduction <add>, %9, %cst_6 [1] : vector<16x32xf32> to vector<16xf32>
    %11 = vector.shape_cast %10 : vector<16xf32> to vector<16x1xf32>
    %cst_7 = arith.constant 3.200000e+01 : f32
    %12 = vector.broadcast %cst_7 : f32 to vector<16x1xf32>
    %13 = arith.divf %11, %12 : vector<16x1xf32>
    %14 = vector.broadcast %6 : vector<16x1xf32> to vector<16x32xf32>
    %15 = arith.subf %0, %14 : vector<16x32xf32>
    %cst_8 = arith.constant 9.99999996E-13 : f32
    %16 = vector.broadcast %cst_8 : f32 to vector<16x1xf32>
    %17 = arith.addf %13, %16 : vector<16x1xf32>
    %18 = math.rsqrt %17 : vector<16x1xf32>
    %19 = vector.broadcast %18 : vector<16x1xf32> to vector<16x32xf32>
    %20 = arith.mulf %15, %19 : vector<16x32xf32>
    %21 = vector.broadcast %1 : vector<1x32xf32> to vector<16x32xf32>
    %22 = arith.mulf %20, %21 : vector<16x32xf32>
    %23 = vector.broadcast %2 : vector<1x32xf32> to vector<16x32xf32>
    %24 = arith.addf %22, %23 : vector<16x32xf32>
    %c0_9 = arith.constant 0 : index
    %c0_10 = arith.constant 0 : index
    %25 = vector.load %arg1[%c0_9, %c0_10] : memref<2x8xf32, #tpu.memory_space<vmem>>, vector<2x8xf32>
    %cst_11 = arith.constant 1.000000e+00 : f32
    %26 = vector.broadcast %cst_11 : f32 to vector<2x8xf32>
    %27 = arith.subf %26, %25 : vector<2x8xf32>
    %cst_12 = arith.constant -1.000000e+09 : f32
    %28 = vector.broadcast %cst_12 : f32 to vector<2x8xf32>
    %29 = arith.mulf %27, %28 : vector<2x8xf32>
    %c0_13 = arith.constant 0 : index
    %c0_14 = arith.constant 0 : index
    %c0_15 = arith.constant 0 : index
    %30 = vector.load %arg4[%c0_13, %c0_14, %c0_15] : memref<2x32x96xbf16, #tpu.memory_space<vmem>>, vector<1x32x96xbf16>
    %31 = vector.shape_cast %30 : vector<1x32x96xbf16> to vector<32x96xbf16>
    %32 = arith.truncf %24 : vector<16x32xf32> to vector<16x32xbf16>
    %cst_16 = arith.constant dense<0.000000e+00> : vector<16x96xf32>
    %33 = tpu.matmul %32, %31, %cst_16 {dimension_numbers = #tpu.dot_dimension_numbers<[1], [0], [0], [1], [0, 0, 1, 1], [], []>} : vector<16x32xbf16>, vector<32x96xbf16>, vector<16x96xf32> -> vector<16x96xf32>
    %c0_17 = arith.constant 0 : index
    %c0_18 = arith.constant 0 : index
    %c0_19 = arith.constant 0 : index
    %34 = vector.load %arg5[%c0_17, %c0_18, %c0_19] : memref<2x1x96xf32, #tpu.memory_space<vmem>>, vector<1x1x96xf32>
    %35 = vector.shape_cast %34 : vector<1x1x96xf32> to vector<1x96xf32>
    %36 = vector.broadcast %35 : vector<1x96xf32> to vector<16x96xf32>
    %37 = arith.addf %33, %36 : vector<16x96xf32>
    %38 = vector.extract_strided_slice %37 {offsets = [0, 0], sizes = [16, 32], strides = [1, 1]} : vector<16x96xf32> to vector<16x32xf32>
    %39 = vector.extract_strided_slice %37 {offsets = [0, 32], sizes = [16, 32], strides = [1, 1]} : vector<16x96xf32> to vector<16x32xf32>
    %40 = vector.extract_strided_slice %37 {offsets = [0, 64], sizes = [16, 32], strides = [1, 1]} : vector<16x96xf32> to vector<16x32xf32>
    %41 = vector.extract_strided_slice %29 {offsets = [0, 0], sizes = [1, 8], strides = [1, 1]} : vector<2x8xf32> to vector<1x8xf32>
    %42 = vector.extract_strided_slice %38 {offsets = [0, 0], sizes = [8, 8], strides = [1, 1]} : vector<16x32xf32> to vector<8x8xf32>
    %43 = arith.truncf %42 : vector<8x8xf32> to vector<8x8xbf16>
    %44 = vector.extract_strided_slice %39 {offsets = [0, 0], sizes = [8, 8], strides = [1, 1]} : vector<16x32xf32> to vector<8x8xf32>
    %45 = arith.truncf %44 : vector<8x8xf32> to vector<8x8xbf16>
    %cst_20 = arith.constant dense<0.000000e+00> : vector<8x8xf32>
    %46 = tpu.matmul %43, %45, %cst_20 {dimension_numbers = #tpu.dot_dimension_numbers<[1], [1], [0], [0], [0, 0, 1, 0], [], []>} : vector<8x8xbf16>, vector<8x8xbf16>, vector<8x8xf32> -> vector<8x8xf32>
    %cst_21 = arith.constant 0.353553385 : f32
    %47 = vector.broadcast %cst_21 : f32 to vector<8x8xf32>
    %48 = arith.mulf %46, %47 : vector<8x8xf32>
    %49 = vector.broadcast %41 : vector<1x8xf32> to vector<8x8xf32>
    %50 = arith.addf %48, %49 : vector<8x8xf32>
    %51 = vector.extract_strided_slice %38 {offsets = [0, 8], sizes = [8, 8], strides = [1, 1]} : vector<16x32xf32> to vector<8x8xf32>
    %52 = arith.truncf %51 : vector<8x8xf32> to vector<8x8xbf16>
    %53 = vector.extract_strided_slice %39 {offsets = [0, 8], sizes = [8, 8], strides = [1, 1]} : vector<16x32xf32> to vector<8x8xf32>
    %54 = arith.truncf %53 : vector<8x8xf32> to vector<8x8xbf16>
    %cst_22 = arith.constant dense<0.000000e+00> : vector<8x8xf32>
    %55 = tpu.matmul %52, %54, %cst_22 {dimension_numbers = #tpu.dot_dimension_numbers<[1], [1], [0], [0], [0, 0, 1, 0], [], []>} : vector<8x8xbf16>, vector<8x8xbf16>, vector<8x8xf32> -> vector<8x8xf32>
    %cst_23 = arith.constant 0.353553385 : f32
    %56 = vector.broadcast %cst_23 : f32 to vector<8x8xf32>
    %57 = arith.mulf %55, %56 : vector<8x8xf32>
    %58 = vector.broadcast %41 : vector<1x8xf32> to vector<8x8xf32>
    %59 = arith.addf %57, %58 : vector<8x8xf32>
    %60 = vector.extract_strided_slice %38 {offsets = [0, 16], sizes = [8, 8], strides = [1, 1]} : vector<16x32xf32> to vector<8x8xf32>
    %61 = arith.truncf %60 : vector<8x8xf32> to vector<8x8xbf16>
    %62 = vector.extract_strided_slice %39 {offsets = [0, 16], sizes = [8, 8], strides = [1, 1]} : vector<16x32xf32> to vector<8x8xf32>
    %63 = arith.truncf %62 : vector<8x8xf32> to vector<8x8xbf16>
    %cst_24 = arith.constant dense<0.000000e+00> : vector<8x8xf32>
    %64 = tpu.matmul %61, %63, %cst_24 {dimension_numbers = #tpu.dot_dimension_numbers<[1], [1], [0], [0], [0, 0, 1, 0], [], []>} : vector<8x8xbf16>, vector<8x8xbf16>, vector<8x8xf32> -> vector<8x8xf32>
    %cst_25 = arith.constant 0.353553385 : f32
    %65 = vector.broadcast %cst_25 : f32 to vector<8x8xf32>
    %66 = arith.mulf %64, %65 : vector<8x8xf32>
    %67 = vector.broadcast %41 : vector<1x8xf32> to vector<8x8xf32>
    %68 = arith.addf %66, %67 : vector<8x8xf32>
    %69 = vector.extract_strided_slice %38 {offsets = [0, 24], sizes = [8, 8], strides = [1, 1]} : vector<16x32xf32> to vector<8x8xf32>
    %70 = arith.truncf %69 : vector<8x8xf32> to vector<8x8xbf16>
    %71 = vector.extract_strided_slice %39 {offsets = [0, 24], sizes = [8, 8], strides = [1, 1]} : vector<16x32xf32> to vector<8x8xf32>
    %72 = arith.truncf %71 : vector<8x8xf32> to vector<8x8xbf16>
    %cst_26 = arith.constant dense<0.000000e+00> : vector<8x8xf32>
    %73 = tpu.matmul %70, %72, %cst_26 {dimension_numbers = #tpu.dot_dimension_numbers<[1], [1], [0], [0], [0, 0, 1, 0], [], []>} : vector<8x8xbf16>, vector<8x8xbf16>, vector<8x8xf32> -> vector<8x8xf32>
    %cst_27 = arith.constant 0.353553385 : f32
    %74 = vector.broadcast %cst_27 : f32 to vector<8x8xf32>
    %75 = arith.mulf %73, %74 : vector<8x8xf32>
    %76 = vector.broadcast %41 : vector<1x8xf32> to vector<8x8xf32>
    %77 = arith.addf %75, %76 : vector<8x8xf32>
    %78 = vector.extract_strided_slice %29 {offsets = [1, 0], sizes = [1, 8], strides = [1, 1]} : vector<2x8xf32> to vector<1x8xf32>
    %79 = vector.extract_strided_slice %38 {offsets = [8, 0], sizes = [8, 8], strides = [1, 1]} : vector<16x32xf32> to vector<8x8xf32>
    %80 = arith.truncf %79 : vector<8x8xf32> to vector<8x8xbf16>
    %81 = vector.extract_strided_slice %39 {offsets = [8, 0], sizes = [8, 8], strides = [1, 1]} : vector<16x32xf32> to vector<8x8xf32>
    %82 = arith.truncf %81 : vector<8x8xf32> to vector<8x8xbf16>
    %cst_28 = arith.constant dense<0.000000e+00> : vector<8x8xf32>
    %83 = tpu.matmul %80, %82, %cst_28 {dimension_numbers = #tpu.dot_dimension_numbers<[1], [1], [0], [0], [0, 0, 1, 0], [], []>} : vector<8x8xbf16>, vector<8x8xbf16>, vector<8x8xf32> -> vector<8x8xf32>
    %cst_29 = arith.constant 0.353553385 : f32
    %84 = vector.broadcast %cst_29 : f32 to vector<8x8xf32>
    %85 = arith.mulf %83, %84 : vector<8x8xf32>
    %86 = vector.broadcast %78 : vector<1x8xf32> to vector<8x8xf32>
    %87 = arith.addf %85, %86 : vector<8x8xf32>
    %88 = vector.extract_strided_slice %38 {offsets = [8, 8], sizes = [8, 8], strides = [1, 1]} : vector<16x32xf32> to vector<8x8xf32>
    %89 = arith.truncf %88 : vector<8x8xf32> to vector<8x8xbf16>
    %90 = vector.extract_strided_slice %39 {offsets = [8, 8], sizes = [8, 8], strides = [1, 1]} : vector<16x32xf32> to vector<8x8xf32>
    %91 = arith.truncf %90 : vector<8x8xf32> to vector<8x8xbf16>
    %cst_30 = arith.constant dense<0.000000e+00> : vector<8x8xf32>
    %92 = tpu.matmul %89, %91, %cst_30 {dimension_numbers = #tpu.dot_dimension_numbers<[1], [1], [0], [0], [0, 0, 1, 0], [], []>} : vector<8x8xbf16>, vector<8x8xbf16>, vector<8x8xf32> -> vector<8x8xf32>
    %cst_31 = arith.constant 0.353553385 : f32
    %93 = vector.broadcast %cst_31 : f32 to vector<8x8xf32>
    %94 = arith.mulf %92, %93 : vector<8x8xf32>
    %95 = vector.broadcast %78 : vector<1x8xf32> to vector<8x8xf32>
    %96 = arith.addf %94, %95 : vector<8x8xf32>
    %97 = vector.extract_strided_slice %38 {offsets = [8, 16], sizes = [8, 8], strides = [1, 1]} : vector<16x32xf32> to vector<8x8xf32>
    %98 = arith.truncf %97 : vector<8x8xf32> to vector<8x8xbf16>
    %99 = vector.extract_strided_slice %39 {offsets = [8, 16], sizes = [8, 8], strides = [1, 1]} : vector<16x32xf32> to vector<8x8xf32>
    %100 = arith.truncf %99 : vector<8x8xf32> to vector<8x8xbf16>
    %cst_32 = arith.constant dense<0.000000e+00> : vector<8x8xf32>
    %101 = tpu.matmul %98, %100, %cst_32 {dimension_numbers = #tpu.dot_dimension_numbers<[1], [1], [0], [0], [0, 0, 1, 0], [], []>} : vector<8x8xbf16>, vector<8x8xbf16>, vector<8x8xf32> -> vector<8x8xf32>
    %cst_33 = arith.constant 0.353553385 : f32
    %102 = vector.broadcast %cst_33 : f32 to vector<8x8xf32>
    %103 = arith.mulf %101, %102 : vector<8x8xf32>
    %104 = vector.broadcast %78 : vector<1x8xf32> to vector<8x8xf32>
    %105 = arith.addf %103, %104 : vector<8x8xf32>
    %106 = vector.extract_strided_slice %38 {offsets = [8, 24], sizes = [8, 8], strides = [1, 1]} : vector<16x32xf32> to vector<8x8xf32>
    %107 = arith.truncf %106 : vector<8x8xf32> to vector<8x8xbf16>
    %108 = vector.extract_strided_slice %39 {offsets = [8, 24], sizes = [8, 8], strides = [1, 1]} : vector<16x32xf32> to vector<8x8xf32>
    %109 = arith.truncf %108 : vector<8x8xf32> to vector<8x8xbf16>
    %cst_34 = arith.constant dense<0.000000e+00> : vector<8x8xf32>
    %110 = tpu.matmul %107, %109, %cst_34 {dimension_numbers = #tpu.dot_dimension_numbers<[1], [1], [0], [0], [0, 0, 1, 0], [], []>} : vector<8x8xbf16>, vector<8x8xbf16>, vector<8x8xf32> -> vector<8x8xf32>
    %cst_35 = arith.constant 0.353553385 : f32
    %111 = vector.broadcast %cst_35 : f32 to vector<8x8xf32>
    %112 = arith.mulf %110, %111 : vector<8x8xf32>
    %113 = vector.broadcast %78 : vector<1x8xf32> to vector<8x8xf32>
    %114 = arith.addf %112, %113 : vector<8x8xf32>
    %115 = tpu.concatenate %50, %59, %68, %77, %87, %96, %105, %114 in 0 : vector<8x8xf32>, vector<8x8xf32>, vector<8x8xf32>, vector<8x8xf32>, vector<8x8xf32>, vector<8x8xf32>, vector<8x8xf32>, vector<8x8xf32> -> vector<64x8xf32>
    %cst_36 = arith.constant dense<0xFF800000> : vector<64xf32>
    %116 = vector.multi_reduction <maximumf>, %115, %cst_36 [1] : vector<64x8xf32> to vector<64xf32>
    %117 = vector.shape_cast %116 : vector<64xf32> to vector<64x1xf32>
    %118 = vector.broadcast %117 : vector<64x1xf32> to vector<64x8xf32>
    %119 = arith.subf %115, %118 : vector<64x8xf32>
    %120 = math.exp %119 : vector<64x8xf32>
    %cst_37 = arith.constant dense<0.000000e+00> : vector<64xf32>
    %121 = vector.multi_reduction <add>, %120, %cst_37 [1] : vector<64x8xf32> to vector<64xf32>
    %122 = vector.shape_cast %121 : vector<64xf32> to vector<64x1xf32>
    %123 = tpu.reciprocal %122 {approx = true} : vector<64x1xf32> -> vector<64x1xf32>
    %124 = vector.broadcast %123 : vector<64x1xf32> to vector<64x8xf32>
    %125 = arith.mulf %120, %124 : vector<64x8xf32>
    %126 = vector.extract_strided_slice %125 {offsets = [0, 0], sizes = [8, 8], strides = [1, 1]} : vector<64x8xf32> to vector<8x8xf32>
    %127 = arith.truncf %126 : vector<8x8xf32> to vector<8x8xbf16>
    %128 = vector.extract_strided_slice %40 {offsets = [0, 0], sizes = [8, 8], strides = [1, 1]} : vector<16x32xf32> to vector<8x8xf32>
    %129 = arith.truncf %128 : vector<8x8xf32> to vector<8x8xbf16>
    %cst_38 = arith.constant dense<0.000000e+00> : vector<8x8xf32>
    %130 = tpu.matmul %127, %129, %cst_38 {dimension_numbers = #tpu.dot_dimension_numbers<[1], [0], [0], [1], [0, 0, 1, 1], [], []>} : vector<8x8xbf16>, vector<8x8xbf16>, vector<8x8xf32> -> vector<8x8xf32>
    %c0_39 = arith.constant 0 : index
    %c0_40 = arith.constant 0 : index
    %131 = vector.load %arg23[%c0_39, %c0_40] : memref<16x32xf32, #tpu.memory_space<vmem>>, vector<8x8xf32>
    tpu.vector_store %arg23[%c0_39, %c0_40], %130 {strides = array<i32>} : memref<16x32xf32, #tpu.memory_space<vmem>>, vector<8x8xf32>,
    %132 = vector.extract_strided_slice %125 {offsets = [8, 0], sizes = [8, 8], strides = [1, 1]} : vector<64x8xf32> to vector<8x8xf32>
    %133 = arith.truncf %132 : vector<8x8xf32> to vector<8x8xbf16>
    %134 = vector.extract_strided_slice %40 {offsets = [0, 8], sizes = [8, 8], strides = [1, 1]} : vector<16x32xf32> to vector<8x8xf32>
    %135 = arith.truncf %134 : vector<8x8xf32> to vector<8x8xbf16>
    %cst_41 = arith.constant dense<0.000000e+00> : vector<8x8xf32>
    %136 = tpu.matmul %133, %135, %cst_41 {dimension_numbers = #tpu.dot_dimension_numbers<[1], [0], [0], [1], [0, 0, 1, 1], [], []>} : vector<8x8xbf16>, vector<8x8xbf16>, vector<8x8xf32> -> vector<8x8xf32>
    %c0_42 = arith.constant 0 : index
    %c8 = arith.constant 8 : index
    %137 = vector.load %arg23[%c0_42, %c8] : memref<16x32xf32, #tpu.memory_space<vmem>>, vector<8x8xf32>
    tpu.vector_store %arg23[%c0_42, %c8], %136 {strides = array<i32>} : memref<16x32xf32, #tpu.memory_space<vmem>>, vector<8x8xf32>,
    %138 = vector.extract_strided_slice %125 {offsets = [16, 0], sizes = [8, 8], strides = [1, 1]} : vector<64x8xf32> to vector<8x8xf32>
    %139 = arith.truncf %138 : vector<8x8xf32> to vector<8x8xbf16>
    %140 = vector.extract_strided_slice %40 {offsets = [0, 16], sizes = [8, 8], strides = [1, 1]} : vector<16x32xf32> to vector<8x8xf32>
    %141 = arith.truncf %140 : vector<8x8xf32> to vector<8x8xbf16>
    %cst_43 = arith.constant dense<0.000000e+00> : vector<8x8xf32>
    %142 = tpu.matmul %139, %141, %cst_43 {dimension_numbers = #tpu.dot_dimension_numbers<[1], [0], [0], [1], [0, 0, 1, 1], [], []>} : vector<8x8xbf16>, vector<8x8xbf16>, vector<8x8xf32> -> vector<8x8xf32>
    %c0_44 = arith.constant 0 : index
    %c16 = arith.constant 16 : index
    %143 = vector.load %arg23[%c0_44, %c16] : memref<16x32xf32, #tpu.memory_space<vmem>>, vector<8x8xf32>
    tpu.vector_store %arg23[%c0_44, %c16], %142 {strides = array<i32>} : memref<16x32xf32, #tpu.memory_space<vmem>>, vector<8x8xf32>,
    %144 = vector.extract_strided_slice %125 {offsets = [24, 0], sizes = [8, 8], strides = [1, 1]} : vector<64x8xf32> to vector<8x8xf32>
    %145 = arith.truncf %144 : vector<8x8xf32> to vector<8x8xbf16>
    %146 = vector.extract_strided_slice %40 {offsets = [0, 24], sizes = [8, 8], strides = [1, 1]} : vector<16x32xf32> to vector<8x8xf32>
    %147 = arith.truncf %146 : vector<8x8xf32> to vector<8x8xbf16>
    %cst_45 = arith.constant dense<0.000000e+00> : vector<8x8xf32>
    %148 = tpu.matmul %145, %147, %cst_45 {dimension_numbers = #tpu.dot_dimension_numbers<[1], [0], [0], [1], [0, 0, 1, 1], [], []>} : vector<8x8xbf16>, vector<8x8xbf16>, vector<8x8xf32> -> vector<8x8xf32>
    %c0_46 = arith.constant 0 : index
    %c24 = arith.constant 24 : index
    %149 = vector.load %arg23[%c0_46, %c24] : memref<16x32xf32, #tpu.memory_space<vmem>>, vector<8x8xf32>
    tpu.vector_store %arg23[%c0_46, %c24], %148 {strides = array<i32>} : memref<16x32xf32, #tpu.memory_space<vmem>>, vector<8x8xf32>,
    %150 = vector.extract_strided_slice %125 {offsets = [32, 0], sizes = [8, 8], strides = [1, 1]} : vector<64x8xf32> to vector<8x8xf32>
    %151 = arith.truncf %150 : vector<8x8xf32> to vector<8x8xbf16>
    %152 = vector.extract_strided_slice %40 {offsets = [8, 0], sizes = [8, 8], strides = [1, 1]} : vector<16x32xf32> to vector<8x8xf32>
    %153 = arith.truncf %152 : vector<8x8xf32> to vector<8x8xbf16>
    %cst_47 = arith.constant dense<0.000000e+00> : vector<8x8xf32>
    %154 = tpu.matmul %151, %153, %cst_47 {dimension_numbers = #tpu.dot_dimension_numbers<[1], [0], [0], [1], [0, 0, 1, 1], [], []>} : vector<8x8xbf16>, vector<8x8xbf16>, vector<8x8xf32> -> vector<8x8xf32>
    %c8_48 = arith.constant 8 : index
    %c0_49 = arith.constant 0 : index
    %155 = vector.load %arg23[%c8_48, %c0_49] : memref<16x32xf32, #tpu.memory_space<vmem>>, vector<8x8xf32>
    tpu.vector_store %arg23[%c8_48, %c0_49], %154 {strides = array<i32>} : memref<16x32xf32, #tpu.memory_space<vmem>>, vector<8x8xf32>,
    %156 = vector.extract_strided_slice %125 {offsets = [40, 0], sizes = [8, 8], strides = [1, 1]} : vector<64x8xf32> to vector<8x8xf32>
    %157 = arith.truncf %156 : vector<8x8xf32> to vector<8x8xbf16>
    %158 = vector.extract_strided_slice %40 {offsets = [8, 8], sizes = [8, 8], strides = [1, 1]} : vector<16x32xf32> to vector<8x8xf32>
    %159 = arith.truncf %158 : vector<8x8xf32> to vector<8x8xbf16>
    %cst_50 = arith.constant dense<0.000000e+00> : vector<8x8xf32>
    %160 = tpu.matmul %157, %159, %cst_50 {dimension_numbers = #tpu.dot_dimension_numbers<[1], [0], [0], [1], [0, 0, 1, 1], [], []>} : vector<8x8xbf16>, vector<8x8xbf16>, vector<8x8xf32> -> vector<8x8xf32>
    %c8_51 = arith.constant 8 : index
    %c8_52 = arith.constant 8 : index
    %161 = vector.load %arg23[%c8_51, %c8_52] : memref<16x32xf32, #tpu.memory_space<vmem>>, vector<8x8xf32>
    tpu.vector_store %arg23[%c8_51, %c8_52], %160 {strides = array<i32>} : memref<16x32xf32, #tpu.memory_space<vmem>>, vector<8x8xf32>,
    %162 = vector.extract_strided_slice %125 {offsets = [48, 0], sizes = [8, 8], strides = [1, 1]} : vector<64x8xf32> to vector<8x8xf32>
    %163 = arith.truncf %162 : vector<8x8xf32> to vector<8x8xbf16>
    %164 = vector.extract_strided_slice %40 {offsets = [8, 16], sizes = [8, 8], strides = [1, 1]} : vector<16x32xf32> to vector<8x8xf32>
    %165 = arith.truncf %164 : vector<8x8xf32> to vector<8x8xbf16>
    %cst_53 = arith.constant dense<0.000000e+00> : vector<8x8xf32>
    %166 = tpu.matmul %163, %165, %cst_53 {dimension_numbers = #tpu.dot_dimension_numbers<[1], [0], [0], [1], [0, 0, 1, 1], [], []>} : vector<8x8xbf16>, vector<8x8xbf16>, vector<8x8xf32> -> vector<8x8xf32>
    %c8_54 = arith.constant 8 : index
    %c16_55 = arith.constant 16 : index
    %167 = vector.load %arg23[%c8_54, %c16_55] : memref<16x32xf32, #tpu.memory_space<vmem>>, vector<8x8xf32>
    tpu.vector_store %arg23[%c8_54, %c16_55], %166 {strides = array<i32>} : memref<16x32xf32, #tpu.memory_space<vmem>>, vector<8x8xf32>,
    %168 = vector.extract_strided_slice %125 {offsets = [56, 0], sizes = [8, 8], strides = [1, 1]} : vector<64x8xf32> to vector<8x8xf32>
    %169 = arith.truncf %168 : vector<8x8xf32> to vector<8x8xbf16>
    %170 = vector.extract_strided_slice %40 {offsets = [8, 24], sizes = [8, 8], strides = [1, 1]} : vector<16x32xf32> to vector<8x8xf32>
    %171 = arith.truncf %170 : vector<8x8xf32> to vector<8x8xbf16>
    %cst_56 = arith.constant dense<0.000000e+00> : vector<8x8xf32>
    %172 = tpu.matmul %169, %171, %cst_56 {dimension_numbers = #tpu.dot_dimension_numbers<[1], [0], [0], [1], [0, 0, 1, 1], [], []>} : vector<8x8xbf16>, vector<8x8xbf16>, vector<8x8xf32> -> vector<8x8xf32>
    %c8_57 = arith.constant 8 : index
    %c24_58 = arith.constant 24 : index
    %173 = vector.load %arg23[%c8_57, %c24_58] : memref<16x32xf32, #tpu.memory_space<vmem>>, vector<8x8xf32>
    tpu.vector_store %arg23[%c8_57, %c24_58], %172 {strides = array<i32>} : memref<16x32xf32, #tpu.memory_space<vmem>>, vector<8x8xf32>,
    %c0_59 = arith.constant 0 : index
    %c0_60 = arith.constant 0 : index
    %174 = vector.load %arg23[%c0_59, %c0_60] : memref<16x32xf32, #tpu.memory_space<vmem>>, vector<16x32xf32>
    %c0_61 = arith.constant 0 : index
    %c0_62 = arith.constant 0 : index
    %c0_63 = arith.constant 0 : index
    %175 = vector.load %arg6[%c0_61, %c0_62, %c0_63] : memref<2x32x32xbf16, #tpu.memory_space<vmem>>, vector<1x32x32xbf16>
    %176 = vector.shape_cast %175 : vector<1x32x32xbf16> to vector<32x32xbf16>
    %177 = arith.truncf %174 : vector<16x32xf32> to vector<16x32xbf16>
    %cst_64 = arith.constant dense<0.000000e+00> : vector<16x32xf32>
    %178 = tpu.matmul %177, %176, %cst_64 {dimension_numbers = #tpu.dot_dimension_numbers<[1], [0], [0], [1], [0, 0, 1, 1], [], []>} : vector<16x32xbf16>, vector<32x32xbf16>, vector<16x32xf32> -> vector<16x32xf32>
    %c0_65 = arith.constant 0 : index
    %c0_66 = arith.constant 0 : index
    %c0_67 = arith.constant 0 : index
    %179 = vector.load %arg7[%c0_65, %c0_66, %c0_67] : memref<2x1x32xf32, #tpu.memory_space<vmem>>, vector<1x1x32xf32>
    %180 = vector.shape_cast %179 : vector<1x1x32xf32> to vector<1x32xf32>
    %181 = vector.broadcast %180 : vector<1x32xf32> to vector<16x32xf32>
    %182 = arith.addf %178, %181 : vector<16x32xf32>
    %183 = arith.addf %24, %182 : vector<16x32xf32>
    %c0_68 = arith.constant 0 : index
    %c0_69 = arith.constant 0 : index
    %c0_70 = arith.constant 0 : index
    %184 = vector.load %arg8[%c0_68, %c0_69, %c0_70] : memref<2x1x32xf32, #tpu.memory_space<vmem>>, vector<1x1x32xf32>
    %185 = vector.shape_cast %184 : vector<1x1x32xf32> to vector<1x32xf32>
    %c0_71 = arith.constant 0 : index
    %c0_72 = arith.constant 0 : index
    %c0_73 = arith.constant 0 : index
    %186 = vector.load %arg9[%c0_71, %c0_72, %c0_73] : memref<2x1x32xf32, #tpu.memory_space<vmem>>, vector<1x1x32xf32>
    %187 = vector.shape_cast %186 : vector<1x1x32xf32> to vector<1x32xf32>
    %cst_74 = arith.constant dense<0.000000e+00> : vector<16xf32>
    %188 = vector.multi_reduction <add>, %183, %cst_74 [1] : vector<16x32xf32> to vector<16xf32>
    %189 = vector.shape_cast %188 : vector<16xf32> to vector<16x1xf32>
    %cst_75 = arith.constant 3.200000e+01 : f32
    %190 = vector.broadcast %cst_75 : f32 to vector<16x1xf32>
    %191 = arith.divf %189, %190 : vector<16x1xf32>
    %192 = vector.broadcast %191 : vector<16x1xf32> to vector<16x32xf32>
    %193 = arith.subf %183, %192 : vector<16x32xf32>
    %194 = arith.mulf %193, %193 : vector<16x32xf32>
    %cst_76 = arith.constant dense<0.000000e+00> : vector<16xf32>
    %195 = vector.multi_reduction <add>, %194, %cst_76 [1] : vector<16x32xf32> to vector<16xf32>
    %196 = vector.shape_cast %195 : vector<16xf32> to vector<16x1xf32>
    %cst_77 = arith.constant 3.200000e+01 : f32
    %197 = vector.broadcast %cst_77 : f32 to vector<16x1xf32>
    %198 = arith.divf %196, %197 : vector<16x1xf32>
    %199 = vector.broadcast %191 : vector<16x1xf32> to vector<16x32xf32>
    %200 = arith.subf %183, %199 : vector<16x32xf32>
    %cst_78 = arith.constant 9.99999996E-13 : f32
    %201 = vector.broadcast %cst_78 : f32 to vector<16x1xf32>
    %202 = arith.addf %198, %201 : vector<16x1xf32>
    %203 = math.rsqrt %202 : vector<16x1xf32>
    %204 = vector.broadcast %203 : vector<16x1xf32> to vector<16x32xf32>
    %205 = arith.mulf %200, %204 : vector<16x32xf32>
    %206 = vector.broadcast %185 : vector<1x32xf32> to vector<16x32xf32>
    %207 = arith.mulf %205, %206 : vector<16x32xf32>
    %208 = vector.broadcast %187 : vector<1x32xf32> to vector<16x32xf32>
    %209 = arith.addf %207, %208 : vector<16x32xf32>
    %c0_79 = arith.constant 0 : index
    %c0_80 = arith.constant 0 : index
    %c0_81 = arith.constant 0 : index
    %210 = vector.load %arg10[%c0_79, %c0_80, %c0_81] : memref<2x32x64xbf16, #tpu.memory_space<vmem>>, vector<1x32x64xbf16>
    %211 = vector.shape_cast %210 : vector<1x32x64xbf16> to vector<32x64xbf16>
    %212 = arith.truncf %209 : vector<16x32xf32> to vector<16x32xbf16>
    %cst_82 = arith.constant dense<0.000000e+00> : vector<16x64xf32>
    %213 = tpu.matmul %212, %211, %cst_82 {dimension_numbers = #tpu.dot_dimension_numbers<[1], [0], [0], [1], [0, 0, 1, 1], [], []>} : vector<16x32xbf16>, vector<32x64xbf16>, vector<16x64xf32> -> vector<16x64xf32>
    %c0_83 = arith.constant 0 : index
    %c0_84 = arith.constant 0 : index
    %c0_85 = arith.constant 0 : index
    %214 = vector.load %arg11[%c0_83, %c0_84, %c0_85] : memref<2x1x64xf32, #tpu.memory_space<vmem>>, vector<1x1x64xf32>
    %215 = vector.shape_cast %214 : vector<1x1x64xf32> to vector<1x64xf32>
    %216 = vector.broadcast %215 : vector<1x64xf32> to vector<16x64xf32>
    %217 = arith.addf %213, %216 : vector<16x64xf32>
    %218 = arith.mulf %217, %217 : vector<16x64xf32>
    %219 = arith.mulf %217, %218 : vector<16x64xf32>
    %cst_86 = arith.constant 4.471500e-02 : f32
    %220 = vector.broadcast %cst_86 : f32 to vector<16x64xf32>
    %221 = arith.mulf %220, %219 : vector<16x64xf32>
    %222 = arith.addf %217, %221 : vector<16x64xf32>
    %cst_87 = arith.constant 0.797884583 : f32
    %223 = vector.broadcast %cst_87 : f32 to vector<16x64xf32>
    %224 = arith.mulf %223, %222 : vector<16x64xf32>
    %225 = math.tanh %224 : vector<16x64xf32>
    %cst_88 = arith.constant 1.000000e+00 : f32
    %226 = vector.broadcast %cst_88 : f32 to vector<16x64xf32>
    %227 = arith.addf %226, %225 : vector<16x64xf32>
    %cst_89 = arith.constant 5.000000e-01 : f32
    %228 = vector.broadcast %cst_89 : f32 to vector<16x64xf32>
    %229 = arith.mulf %228, %227 : vector<16x64xf32>
    %230 = arith.mulf %217, %229 : vector<16x64xf32>
    %c0_90 = arith.constant 0 : index
    %c0_91 = arith.constant 0 : index
    %c0_92 = arith.constant 0 : index
    %231 = vector.load %arg12[%c0_90, %c0_91, %c0_92] : memref<2x64x32xbf16, #tpu.memory_space<vmem>>, vector<1x64x32xbf16>
    %232 = vector.shape_cast %231 : vector<1x64x32xbf16> to vector<64x32xbf16>
    %233 = arith.truncf %230 : vector<16x64xf32> to vector<16x64xbf16>
    %cst_93 = arith.constant dense<0.000000e+00> : vector<16x32xf32>
    %234 = tpu.matmul %233, %232, %cst_93 {dimension_numbers = #tpu.dot_dimension_numbers<[1], [0], [0], [1], [0, 0, 1, 1], [], []>} : vector<16x64xbf16>, vector<64x32xbf16>, vector<16x32xf32> -> vector<16x32xf32>
    %c0_94 = arith.constant 0 : index
    %c0_95 = arith.constant 0 : index
    %c0_96 = arith.constant 0 : index
    %235 = vector.load %arg13[%c0_94, %c0_95, %c0_96] : memref<2x1x32xf32, #tpu.memory_space<vmem>>, vector<1x1x32xf32>
    %236 = vector.shape_cast %235 : vector<1x1x32xf32> to vector<1x32xf32>
    %237 = vector.broadcast %236 : vector<1x32xf32> to vector<16x32xf32>
    %238 = arith.addf %234, %237 : vector<16x32xf32>
    %239 = arith.addf %209, %238 : vector<16x32xf32>
    %c0_97 = arith.constant 0 : index
    %c0_98 = arith.constant 0 : index
    %c0_99 = arith.constant 0 : index
    %240 = vector.load %arg14[%c0_97, %c0_98, %c0_99] : memref<2x1x32xf32, #tpu.memory_space<vmem>>, vector<1x1x32xf32>
    %241 = vector.shape_cast %240 : vector<1x1x32xf32> to vector<1x32xf32>
    %c0_100 = arith.constant 0 : index
    %c0_101 = arith.constant 0 : index
    %c0_102 = arith.constant 0 : index
    %242 = vector.load %arg15[%c0_100, %c0_101, %c0_102] : memref<2x1x32xf32, #tpu.memory_space<vmem>>, vector<1x1x32xf32>
    %243 = vector.shape_cast %242 : vector<1x1x32xf32> to vector<1x32xf32>
    %cst_103 = arith.constant dense<0.000000e+00> : vector<16xf32>
    %244 = vector.multi_reduction <add>, %239, %cst_103 [1] : vector<16x32xf32> to vector<16xf32>
    %245 = vector.shape_cast %244 : vector<16xf32> to vector<16x1xf32>
    %cst_104 = arith.constant 3.200000e+01 : f32
    %246 = vector.broadcast %cst_104 : f32 to vector<16x1xf32>
    %247 = arith.divf %245, %246 : vector<16x1xf32>
    %248 = vector.broadcast %247 : vector<16x1xf32> to vector<16x32xf32>
    %249 = arith.subf %239, %248 : vector<16x32xf32>
    %250 = arith.mulf %249, %249 : vector<16x32xf32>
    %cst_105 = arith.constant dense<0.000000e+00> : vector<16xf32>
    %251 = vector.multi_reduction <add>, %250, %cst_105 [1] : vector<16x32xf32> to vector<16xf32>
    %252 = vector.shape_cast %251 : vector<16xf32> to vector<16x1xf32>
    %cst_106 = arith.constant 3.200000e+01 : f32
    %253 = vector.broadcast %cst_106 : f32 to vector<16x1xf32>
    %254 = arith.divf %252, %253 : vector<16x1xf32>
    %255 = vector.broadcast %247 : vector<16x1xf32> to vector<16x32xf32>
    %256 = arith.subf %239, %255 : vector<16x32xf32>
    %cst_107 = arith.constant 9.99999996E-13 : f32
    %257 = vector.broadcast %cst_107 : f32 to vector<16x1xf32>
    %258 = arith.addf %254, %257 : vector<16x1xf32>
    %259 = math.rsqrt %258 : vector<16x1xf32>
    %260 = vector.broadcast %259 : vector<16x1xf32> to vector<16x32xf32>
    %261 = arith.mulf %256, %260 : vector<16x32xf32>
    %262 = vector.broadcast %241 : vector<1x32xf32> to vector<16x32xf32>
    %263 = arith.mulf %261, %262 : vector<16x32xf32>
    %264 = vector.broadcast %243 : vector<1x32xf32> to vector<16x32xf32>
    %265 = arith.addf %263, %264 : vector<16x32xf32>
    %c1 = arith.constant 1 : index
    %c0_108 = arith.constant 0 : index
    %c0_109 = arith.constant 0 : index
    %266 = vector.load %arg4[%c1, %c0_108, %c0_109] : memref<2x32x96xbf16, #tpu.memory_space<vmem>>, vector<1x32x96xbf16>
    %267 = vector.shape_cast %266 : vector<1x32x96xbf16> to vector<32x96xbf16>
    %268 = arith.truncf %265 : vector<16x32xf32> to vector<16x32xbf16>
    %cst_110 = arith.constant dense<0.000000e+00> : vector<16x96xf32>
    %269 = tpu.matmul %268, %267, %cst_110 {dimension_numbers = #tpu.dot_dimension_numbers<[1], [0], [0], [1], [0, 0, 1, 1], [], []>} : vector<16x32xbf16>, vector<32x96xbf16>, vector<16x96xf32> -> vector<16x96xf32>
    %c1_111 = arith.constant 1 : index
    %c0_112 = arith.constant 0 : index
    %c0_113 = arith.constant 0 : index
    %270 = vector.load %arg5[%c1_111, %c0_112, %c0_113] : memref<2x1x96xf32, #tpu.memory_space<vmem>>, vector<1x1x96xf32>
    %271 = vector.shape_cast %270 : vector<1x1x96xf32> to vector<1x96xf32>
    %272 = vector.broadcast %271 : vector<1x96xf32> to vector<16x96xf32>
    %273 = arith.addf %269, %272 : vector<16x96xf32>
    %274 = vector.extract_strided_slice %273 {offsets = [0, 0], sizes = [16, 32], strides = [1, 1]} : vector<16x96xf32> to vector<16x32xf32>
    %275 = vector.extract_strided_slice %273 {offsets = [0, 32], sizes = [16, 32], strides = [1, 1]} : vector<16x96xf32> to vector<16x32xf32>
    %276 = vector.extract_strided_slice %273 {offsets = [0, 64], sizes = [16, 32], strides = [1, 1]} : vector<16x96xf32> to vector<16x32xf32>
    %277 = vector.extract_strided_slice %29 {offsets = [0, 0], sizes = [1, 8], strides = [1, 1]} : vector<2x8xf32> to vector<1x8xf32>
    %278 = vector.extract_strided_slice %274 {offsets = [0, 0], sizes = [8, 8], strides = [1, 1]} : vector<16x32xf32> to vector<8x8xf32>
    %279 = arith.truncf %278 : vector<8x8xf32> to vector<8x8xbf16>
    %280 = vector.extract_strided_slice %275 {offsets = [0, 0], sizes = [8, 8], strides = [1, 1]} : vector<16x32xf32> to vector<8x8xf32>
    %281 = arith.truncf %280 : vector<8x8xf32> to vector<8x8xbf16>
    %cst_114 = arith.constant dense<0.000000e+00> : vector<8x8xf32>
    %282 = tpu.matmul %279, %281, %cst_114 {dimension_numbers = #tpu.dot_dimension_numbers<[1], [1], [0], [0], [0, 0, 1, 0], [], []>} : vector<8x8xbf16>, vector<8x8xbf16>, vector<8x8xf32> -> vector<8x8xf32>
    %cst_115 = arith.constant 0.353553385 : f32
    %283 = vector.broadcast %cst_115 : f32 to vector<8x8xf32>
    %284 = arith.mulf %282, %283 : vector<8x8xf32>
    %285 = vector.broadcast %277 : vector<1x8xf32> to vector<8x8xf32>
    %286 = arith.addf %284, %285 : vector<8x8xf32>
    %287 = vector.extract_strided_slice %274 {offsets = [0, 8], sizes = [8, 8], strides = [1, 1]} : vector<16x32xf32> to vector<8x8xf32>
    %288 = arith.truncf %287 : vector<8x8xf32> to vector<8x8xbf16>
    %289 = vector.extract_strided_slice %275 {offsets = [0, 8], sizes = [8, 8], strides = [1, 1]} : vector<16x32xf32> to vector<8x8xf32>
    %290 = arith.truncf %289 : vector<8x8xf32> to vector<8x8xbf16>
    %cst_116 = arith.constant dense<0.000000e+00> : vector<8x8xf32>
    %291 = tpu.matmul %288, %290, %cst_116 {dimension_numbers = #tpu.dot_dimension_numbers<[1], [1], [0], [0], [0, 0, 1, 0], [], []>} : vector<8x8xbf16>, vector<8x8xbf16>, vector<8x8xf32> -> vector<8x8xf32>
    %cst_117 = arith.constant 0.353553385 : f32
    %292 = vector.broadcast %cst_117 : f32 to vector<8x8xf32>
    %293 = arith.mulf %291, %292 : vector<8x8xf32>
    %294 = vector.broadcast %277 : vector<1x8xf32> to vector<8x8xf32>
    %295 = arith.addf %293, %294 : vector<8x8xf32>
    %296 = vector.extract_strided_slice %274 {offsets = [0, 16], sizes = [8, 8], strides = [1, 1]} : vector<16x32xf32> to vector<8x8xf32>
    %297 = arith.truncf %296 : vector<8x8xf32> to vector<8x8xbf16>
    %298 = vector.extract_strided_slice %275 {offsets = [0, 16], sizes = [8, 8], strides = [1, 1]} : vector<16x32xf32> to vector<8x8xf32>
    %299 = arith.truncf %298 : vector<8x8xf32> to vector<8x8xbf16>
    %cst_118 = arith.constant dense<0.000000e+00> : vector<8x8xf32>
    %300 = tpu.matmul %297, %299, %cst_118 {dimension_numbers = #tpu.dot_dimension_numbers<[1], [1], [0], [0], [0, 0, 1, 0], [], []>} : vector<8x8xbf16>, vector<8x8xbf16>, vector<8x8xf32> -> vector<8x8xf32>
    %cst_119 = arith.constant 0.353553385 : f32
    %301 = vector.broadcast %cst_119 : f32 to vector<8x8xf32>
    %302 = arith.mulf %300, %301 : vector<8x8xf32>
    %303 = vector.broadcast %277 : vector<1x8xf32> to vector<8x8xf32>
    %304 = arith.addf %302, %303 : vector<8x8xf32>
    %305 = vector.extract_strided_slice %274 {offsets = [0, 24], sizes = [8, 8], strides = [1, 1]} : vector<16x32xf32> to vector<8x8xf32>
    %306 = arith.truncf %305 : vector<8x8xf32> to vector<8x8xbf16>
    %307 = vector.extract_strided_slice %275 {offsets = [0, 24], sizes = [8, 8], strides = [1, 1]} : vector<16x32xf32> to vector<8x8xf32>
    %308 = arith.truncf %307 : vector<8x8xf32> to vector<8x8xbf16>
    %cst_120 = arith.constant dense<0.000000e+00> : vector<8x8xf32>
    %309 = tpu.matmul %306, %308, %cst_120 {dimension_numbers = #tpu.dot_dimension_numbers<[1], [1], [0], [0], [0, 0, 1, 0], [], []>} : vector<8x8xbf16>, vector<8x8xbf16>, vector<8x8xf32> -> vector<8x8xf32>
    %cst_121 = arith.constant 0.353553385 : f32
    %310 = vector.broadcast %cst_121 : f32 to vector<8x8xf32>
    %311 = arith.mulf %309, %310 : vector<8x8xf32>
    %312 = vector.broadcast %277 : vector<1x8xf32> to vector<8x8xf32>
    %313 = arith.addf %311, %312 : vector<8x8xf32>
    %314 = vector.extract_strided_slice %29 {offsets = [1, 0], sizes = [1, 8], strides = [1, 1]} : vector<2x8xf32> to vector<1x8xf32>
    %315 = vector.extract_strided_slice %274 {offsets = [8, 0], sizes = [8, 8], strides = [1, 1]} : vector<16x32xf32> to vector<8x8xf32>
    %316 = arith.truncf %315 : vector<8x8xf32> to vector<8x8xbf16>
    %317 = vector.extract_strided_slice %275 {offsets = [8, 0], sizes = [8, 8], strides = [1, 1]} : vector<16x32xf32> to vector<8x8xf32>
    %318 = arith.truncf %317 : vector<8x8xf32> to vector<8x8xbf16>
    %cst_122 = arith.constant dense<0.000000e+00> : vector<8x8xf32>
    %319 = tpu.matmul %316, %318, %cst_122 {dimension_numbers = #tpu.dot_dimension_numbers<[1], [1], [0], [0], [0, 0, 1, 0], [], []>} : vector<8x8xbf16>, vector<8x8xbf16>, vector<8x8xf32> -> vector<8x8xf32>
    %cst_123 = arith.constant 0.353553385 : f32
    %320 = vector.broadcast %cst_123 : f32 to vector<8x8xf32>
    %321 = arith.mulf %319, %320 : vector<8x8xf32>
    %322 = vector.broadcast %314 : vector<1x8xf32> to vector<8x8xf32>
    %323 = arith.addf %321, %322 : vector<8x8xf32>
    %324 = vector.extract_strided_slice %274 {offsets = [8, 8], sizes = [8, 8], strides = [1, 1]} : vector<16x32xf32> to vector<8x8xf32>
    %325 = arith.truncf %324 : vector<8x8xf32> to vector<8x8xbf16>
    %326 = vector.extract_strided_slice %275 {offsets = [8, 8], sizes = [8, 8], strides = [1, 1]} : vector<16x32xf32> to vector<8x8xf32>
    %327 = arith.truncf %326 : vector<8x8xf32> to vector<8x8xbf16>
    %cst_124 = arith.constant dense<0.000000e+00> : vector<8x8xf32>
    %328 = tpu.matmul %325, %327, %cst_124 {dimension_numbers = #tpu.dot_dimension_numbers<[1], [1], [0], [0], [0, 0, 1, 0], [], []>} : vector<8x8xbf16>, vector<8x8xbf16>, vector<8x8xf32> -> vector<8x8xf32>
    %cst_125 = arith.constant 0.353553385 : f32
    %329 = vector.broadcast %cst_125 : f32 to vector<8x8xf32>
    %330 = arith.mulf %328, %329 : vector<8x8xf32>
    %331 = vector.broadcast %314 : vector<1x8xf32> to vector<8x8xf32>
    %332 = arith.addf %330, %331 : vector<8x8xf32>
    %333 = vector.extract_strided_slice %274 {offsets = [8, 16], sizes = [8, 8], strides = [1, 1]} : vector<16x32xf32> to vector<8x8xf32>
    %334 = arith.truncf %333 : vector<8x8xf32> to vector<8x8xbf16>
    %335 = vector.extract_strided_slice %275 {offsets = [8, 16], sizes = [8, 8], strides = [1, 1]} : vector<16x32xf32> to vector<8x8xf32>
    %336 = arith.truncf %335 : vector<8x8xf32> to vector<8x8xbf16>
    %cst_126 = arith.constant dense<0.000000e+00> : vector<8x8xf32>
    %337 = tpu.matmul %334, %336, %cst_126 {dimension_numbers = #tpu.dot_dimension_numbers<[1], [1], [0], [0], [0, 0, 1, 0], [], []>} : vector<8x8xbf16>, vector<8x8xbf16>, vector<8x8xf32> -> vector<8x8xf32>
    %cst_127 = arith.constant 0.353553385 : f32
    %338 = vector.broadcast %cst_127 : f32 to vector<8x8xf32>
    %339 = arith.mulf %337, %338 : vector<8x8xf32>
    %340 = vector.broadcast %314 : vector<1x8xf32> to vector<8x8xf32>
    %341 = arith.addf %339, %340 : vector<8x8xf32>
    %342 = vector.extract_strided_slice %274 {offsets = [8, 24], sizes = [8, 8], strides = [1, 1]} : vector<16x32xf32> to vector<8x8xf32>
    %343 = arith.truncf %342 : vector<8x8xf32> to vector<8x8xbf16>
    %344 = vector.extract_strided_slice %275 {offsets = [8, 24], sizes = [8, 8], strides = [1, 1]} : vector<16x32xf32> to vector<8x8xf32>
    %345 = arith.truncf %344 : vector<8x8xf32> to vector<8x8xbf16>
    %cst_128 = arith.constant dense<0.000000e+00> : vector<8x8xf32>
    %346 = tpu.matmul %343, %345, %cst_128 {dimension_numbers = #tpu.dot_dimension_numbers<[1], [1], [0], [0], [0, 0, 1, 0], [], []>} : vector<8x8xbf16>, vector<8x8xbf16>, vector<8x8xf32> -> vector<8x8xf32>
    %cst_129 = arith.constant 0.353553385 : f32
    %347 = vector.broadcast %cst_129 : f32 to vector<8x8xf32>
    %348 = arith.mulf %346, %347 : vector<8x8xf32>
    %349 = vector.broadcast %314 : vector<1x8xf32> to vector<8x8xf32>
    %350 = arith.addf %348, %349 : vector<8x8xf32>
    %351 = tpu.concatenate %286, %295, %304, %313, %323, %332, %341, %350 in 0 : vector<8x8xf32>, vector<8x8xf32>, vector<8x8xf32>, vector<8x8xf32>, vector<8x8xf32>, vector<8x8xf32>, vector<8x8xf32>, vector<8x8xf32> -> vector<64x8xf32>
    %cst_130 = arith.constant dense<0xFF800000> : vector<64xf32>
    %352 = vector.multi_reduction <maximumf>, %351, %cst_130 [1] : vector<64x8xf32> to vector<64xf32>
    %353 = vector.shape_cast %352 : vector<64xf32> to vector<64x1xf32>
    %354 = vector.broadcast %353 : vector<64x1xf32> to vector<64x8xf32>
    %355 = arith.subf %351, %354 : vector<64x8xf32>
    %356 = math.exp %355 : vector<64x8xf32>
    %cst_131 = arith.constant dense<0.000000e+00> : vector<64xf32>
    %357 = vector.multi_reduction <add>, %356, %cst_131 [1] : vector<64x8xf32> to vector<64xf32>
    %358 = vector.shape_cast %357 : vector<64xf32> to vector<64x1xf32>
    %359 = tpu.reciprocal %358 {approx = true} : vector<64x1xf32> -> vector<64x1xf32>
    %360 = vector.broadcast %359 : vector<64x1xf32> to vector<64x8xf32>
    %361 = arith.mulf %356, %360 : vector<64x8xf32>
    %362 = vector.extract_strided_slice %361 {offsets = [0, 0], sizes = [8, 8], strides = [1, 1]} : vector<64x8xf32> to vector<8x8xf32>
    %363 = arith.truncf %362 : vector<8x8xf32> to vector<8x8xbf16>
    %364 = vector.extract_strided_slice %276 {offsets = [0, 0], sizes = [8, 8], strides = [1, 1]} : vector<16x32xf32> to vector<8x8xf32>
    %365 = arith.truncf %364 : vector<8x8xf32> to vector<8x8xbf16>
    %cst_132 = arith.constant dense<0.000000e+00> : vector<8x8xf32>
    %366 = tpu.matmul %363, %365, %cst_132 {dimension_numbers = #tpu.dot_dimension_numbers<[1], [0], [0], [1], [0, 0, 1, 1], [], []>} : vector<8x8xbf16>, vector<8x8xbf16>, vector<8x8xf32> -> vector<8x8xf32>
    %c0_133 = arith.constant 0 : index
    %c0_134 = arith.constant 0 : index
    %367 = vector.load %arg23[%c0_133, %c0_134] : memref<16x32xf32, #tpu.memory_space<vmem>>, vector<8x8xf32>
    tpu.vector_store %arg23[%c0_133, %c0_134], %366 {strides = array<i32>} : memref<16x32xf32, #tpu.memory_space<vmem>>, vector<8x8xf32>,
    %368 = vector.extract_strided_slice %361 {offsets = [8, 0], sizes = [8, 8], strides = [1, 1]} : vector<64x8xf32> to vector<8x8xf32>
    %369 = arith.truncf %368 : vector<8x8xf32> to vector<8x8xbf16>
    %370 = vector.extract_strided_slice %276 {offsets = [0, 8], sizes = [8, 8], strides = [1, 1]} : vector<16x32xf32> to vector<8x8xf32>
    %371 = arith.truncf %370 : vector<8x8xf32> to vector<8x8xbf16>
    %cst_135 = arith.constant dense<0.000000e+00> : vector<8x8xf32>
    %372 = tpu.matmul %369, %371, %cst_135 {dimension_numbers = #tpu.dot_dimension_numbers<[1], [0], [0], [1], [0, 0, 1, 1], [], []>} : vector<8x8xbf16>, vector<8x8xbf16>, vector<8x8xf32> -> vector<8x8xf32>
    %c0_136 = arith.constant 0 : index
    %c8_137 = arith.constant 8 : index
    %373 = vector.load %arg23[%c0_136, %c8_137] : memref<16x32xf32, #tpu.memory_space<vmem>>, vector<8x8xf32>
    tpu.vector_store %arg23[%c0_136, %c8_137], %372 {strides = array<i32>} : memref<16x32xf32, #tpu.memory_space<vmem>>, vector<8x8xf32>,
    %374 = vector.extract_strided_slice %361 {offsets = [16, 0], sizes = [8, 8], strides = [1, 1]} : vector<64x8xf32> to vector<8x8xf32>
    %375 = arith.truncf %374 : vector<8x8xf32> to vector<8x8xbf16>
    %376 = vector.extract_strided_slice %276 {offsets = [0, 16], sizes = [8, 8], strides = [1, 1]} : vector<16x32xf32> to vector<8x8xf32>
    %377 = arith.truncf %376 : vector<8x8xf32> to vector<8x8xbf16>
    %cst_138 = arith.constant dense<0.000000e+00> : vector<8x8xf32>
    %378 = tpu.matmul %375, %377, %cst_138 {dimension_numbers = #tpu.dot_dimension_numbers<[1], [0], [0], [1], [0, 0, 1, 1], [], []>} : vector<8x8xbf16>, vector<8x8xbf16>, vector<8x8xf32> -> vector<8x8xf32>
    %c0_139 = arith.constant 0 : index
    %c16_140 = arith.constant 16 : index
    %379 = vector.load %arg23[%c0_139, %c16_140] : memref<16x32xf32, #tpu.memory_space<vmem>>, vector<8x8xf32>
    tpu.vector_store %arg23[%c0_139, %c16_140], %378 {strides = array<i32>} : memref<16x32xf32, #tpu.memory_space<vmem>>, vector<8x8xf32>,
    %380 = vector.extract_strided_slice %361 {offsets = [24, 0], sizes = [8, 8], strides = [1, 1]} : vector<64x8xf32> to vector<8x8xf32>
    %381 = arith.truncf %380 : vector<8x8xf32> to vector<8x8xbf16>
    %382 = vector.extract_strided_slice %276 {offsets = [0, 24], sizes = [8, 8], strides = [1, 1]} : vector<16x32xf32> to vector<8x8xf32>
    %383 = arith.truncf %382 : vector<8x8xf32> to vector<8x8xbf16>
    %cst_141 = arith.constant dense<0.000000e+00> : vector<8x8xf32>
    %384 = tpu.matmul %381, %383, %cst_141 {dimension_numbers = #tpu.dot_dimension_numbers<[1], [0], [0], [1], [0, 0, 1, 1], [], []>} : vector<8x8xbf16>, vector<8x8xbf16>, vector<8x8xf32> -> vector<8x8xf32>
    %c0_142 = arith.constant 0 : index
    %c24_143 = arith.constant 24 : index
    %385 = vector.load %arg23[%c0_142, %c24_143] : memref<16x32xf32, #tpu.memory_space<vmem>>, vector<8x8xf32>
    tpu.vector_store %arg23[%c0_142, %c24_143], %384 {strides = array<i32>} : memref<16x32xf32, #tpu.memory_space<vmem>>, vector<8x8xf32>,
    %386 = vector.extract_strided_slice %361 {offsets = [32, 0], sizes = [8, 8], strides = [1, 1]} : vector<64x8xf32> to vector<8x8xf32>
    %387 = arith.truncf %386 : vector<8x8xf32> to vector<8x8xbf16>
    %388 = vector.extract_strided_slice %276 {offsets = [8, 0], sizes = [8, 8], strides = [1, 1]} : vector<16x32xf32> to vector<8x8xf32>
    %389 = arith.truncf %388 : vector<8x8xf32> to vector<8x8xbf16>
    %cst_144 = arith.constant dense<0.000000e+00> : vector<8x8xf32>
    %390 = tpu.matmul %387, %389, %cst_144 {dimension_numbers = #tpu.dot_dimension_numbers<[1], [0], [0], [1], [0, 0, 1, 1], [], []>} : vector<8x8xbf16>, vector<8x8xbf16>, vector<8x8xf32> -> vector<8x8xf32>
    %c8_145 = arith.constant 8 : index
    %c0_146 = arith.constant 0 : index
    %391 = vector.load %arg23[%c8_145, %c0_146] : memref<16x32xf32, #tpu.memory_space<vmem>>, vector<8x8xf32>
    tpu.vector_store %arg23[%c8_145, %c0_146], %390 {strides = array<i32>} : memref<16x32xf32, #tpu.memory_space<vmem>>, vector<8x8xf32>,
    %392 = vector.extract_strided_slice %361 {offsets = [40, 0], sizes = [8, 8], strides = [1, 1]} : vector<64x8xf32> to vector<8x8xf32>
    %393 = arith.truncf %392 : vector<8x8xf32> to vector<8x8xbf16>
    %394 = vector.extract_strided_slice %276 {offsets = [8, 8], sizes = [8, 8], strides = [1, 1]} : vector<16x32xf32> to vector<8x8xf32>
    %395 = arith.truncf %394 : vector<8x8xf32> to vector<8x8xbf16>
    %cst_147 = arith.constant dense<0.000000e+00> : vector<8x8xf32>
    %396 = tpu.matmul %393, %395, %cst_147 {dimension_numbers = #tpu.dot_dimension_numbers<[1], [0], [0], [1], [0, 0, 1, 1], [], []>} : vector<8x8xbf16>, vector<8x8xbf16>, vector<8x8xf32> -> vector<8x8xf32>
    %c8_148 = arith.constant 8 : index
    %c8_149 = arith.constant 8 : index
    %397 = vector.load %arg23[%c8_148, %c8_149] : memref<16x32xf32, #tpu.memory_space<vmem>>, vector<8x8xf32>
    tpu.vector_store %arg23[%c8_148, %c8_149], %396 {strides = array<i32>} : memref<16x32xf32, #tpu.memory_space<vmem>>, vector<8x8xf32>,
    %398 = vector.extract_strided_slice %361 {offsets = [48, 0], sizes = [8, 8], strides = [1, 1]} : vector<64x8xf32> to vector<8x8xf32>
    %399 = arith.truncf %398 : vector<8x8xf32> to vector<8x8xbf16>
    %400 = vector.extract_strided_slice %276 {offsets = [8, 16], sizes = [8, 8], strides = [1, 1]} : vector<16x32xf32> to vector<8x8xf32>
    %401 = arith.truncf %400 : vector<8x8xf32> to vector<8x8xbf16>
    %cst_150 = arith.constant dense<0.000000e+00> : vector<8x8xf32>
    %402 = tpu.matmul %399, %401, %cst_150 {dimension_numbers = #tpu.dot_dimension_numbers<[1], [0], [0], [1], [0, 0, 1, 1], [], []>} : vector<8x8xbf16>, vector<8x8xbf16>, vector<8x8xf32> -> vector<8x8xf32>
    %c8_151 = arith.constant 8 : index
    %c16_152 = arith.constant 16 : index
    %403 = vector.load %arg23[%c8_151, %c16_152] : memref<16x32xf32, #tpu.memory_space<vmem>>, vector<8x8xf32>
    tpu.vector_store %arg23[%c8_151, %c16_152], %402 {strides = array<i32>} : memref<16x32xf32, #tpu.memory_space<vmem>>, vector<8x8xf32>,
    %404 = vector.extract_strided_slice %361 {offsets = [56, 0], sizes = [8, 8], strides = [1, 1]} : vector<64x8xf32> to vector<8x8xf32>
    %405 = arith.truncf %404 : vector<8x8xf32> to vector<8x8xbf16>
    %406 = vector.extract_strided_slice %276 {offsets = [8, 24], sizes = [8, 8], strides = [1, 1]} : vector<16x32xf32> to vector<8x8xf32>
    %407 = arith.truncf %406 : vector<8x8xf32> to vector<8x8xbf16>
    %cst_153 = arith.constant dense<0.000000e+00> : vector<8x8xf32>
    %408 = tpu.matmul %405, %407, %cst_153 {dimension_numbers = #tpu.dot_dimension_numbers<[1], [0], [0], [1], [0, 0, 1, 1], [], []>} : vector<8x8xbf16>, vector<8x8xbf16>, vector<8x8xf32> -> vector<8x8xf32>
    %c8_154 = arith.constant 8 : index
    %c24_155 = arith.constant 24 : index
    %409 = vector.load %arg23[%c8_154, %c24_155] : memref<16x32xf32, #tpu.memory_space<vmem>>, vector<8x8xf32>
    tpu.vector_store %arg23[%c8_154, %c24_155], %408 {strides = array<i32>} : memref<16x32xf32, #tpu.memory_space<vmem>>, vector<8x8xf32>,
    %c0_156 = arith.constant 0 : index
    %c0_157 = arith.constant 0 : index
    %410 = vector.load %arg23[%c0_156, %c0_157] : memref<16x32xf32, #tpu.memory_space<vmem>>, vector<16x32xf32>
    %c1_158 = arith.constant 1 : index
    %c0_159 = arith.constant 0 : index
    %c0_160 = arith.constant 0 : index
    %411 = vector.load %arg6[%c1_158, %c0_159, %c0_160] : memref<2x32x32xbf16, #tpu.memory_space<vmem>>, vector<1x32x32xbf16>
    %412 = vector.shape_cast %411 : vector<1x32x32xbf16> to vector<32x32xbf16>
    %413 = arith.truncf %410 : vector<16x32xf32> to vector<16x32xbf16>
    %cst_161 = arith.constant dense<0.000000e+00> : vector<16x32xf32>
    %414 = tpu.matmul %413, %412, %cst_161 {dimension_numbers = #tpu.dot_dimension_numbers<[1], [0], [0], [1], [0, 0, 1, 1], [], []>} : vector<16x32xbf16>, vector<32x32xbf16>, vector<16x32xf32> -> vector<16x32xf32>
    %c1_162 = arith.constant 1 : index
    %c0_163 = arith.constant 0 : index
    %c0_164 = arith.constant 0 : index
    %415 = vector.load %arg7[%c1_162, %c0_163, %c0_164] : memref<2x1x32xf32, #tpu.memory_space<vmem>>, vector<1x1x32xf32>
    %416 = vector.shape_cast %415 : vector<1x1x32xf32> to vector<1x32xf32>
    %417 = vector.broadcast %416 : vector<1x32xf32> to vector<16x32xf32>
    %418 = arith.addf %414, %417 : vector<16x32xf32>
    %419 = arith.addf %265, %418 : vector<16x32xf32>
    %c1_165 = arith.constant 1 : index
    %c0_166 = arith.constant 0 : index
    %c0_167 = arith.constant 0 : index
    %420 = vector.load %arg8[%c1_165, %c0_166, %c0_167] : memref<2x1x32xf32, #tpu.memory_space<vmem>>, vector<1x1x32xf32>
    %421 = vector.shape_cast %420 : vector<1x1x32xf32> to vector<1x32xf32>
    %c1_168 = arith.constant 1 : index
    %c0_169 = arith.constant 0 : index
    %c0_170 = arith.constant 0 : index
    %422 = vector.load %arg9[%c1_168, %c0_169, %c0_170] : memref<2x1x32xf32, #tpu.memory_space<vmem>>, vector<1x1x32xf32>
    %423 = vector.shape_cast %422 : vector<1x1x32xf32> to vector<1x32xf32>
    %cst_171 = arith.constant dense<0.000000e+00> : vector<16xf32>
    %424 = vector.multi_reduction <add>, %419, %cst_171 [1] : vector<16x32xf32> to vector<16xf32>
    %425 = vector.shape_cast %424 : vector<16xf32> to vector<16x1xf32>
    %cst_172 = arith.constant 3.200000e+01 : f32
    %426 = vector.broadcast %cst_172 : f32 to vector<16x1xf32>
    %427 = arith.divf %425, %426 : vector<16x1xf32>
    %428 = vector.broadcast %427 : vector<16x1xf32> to vector<16x32xf32>
    %429 = arith.subf %419, %428 : vector<16x32xf32>
    %430 = arith.mulf %429, %429 : vector<16x32xf32>
    %cst_173 = arith.constant dense<0.000000e+00> : vector<16xf32>
    %431 = vector.multi_reduction <add>, %430, %cst_173 [1] : vector<16x32xf32> to vector<16xf32>
    %432 = vector.shape_cast %431 : vector<16xf32> to vector<16x1xf32>
    %cst_174 = arith.constant 3.200000e+01 : f32
    %433 = vector.broadcast %cst_174 : f32 to vector<16x1xf32>
    %434 = arith.divf %432, %433 : vector<16x1xf32>
    %435 = vector.broadcast %427 : vector<16x1xf32> to vector<16x32xf32>
    %436 = arith.subf %419, %435 : vector<16x32xf32>
    %cst_175 = arith.constant 9.99999996E-13 : f32
    %437 = vector.broadcast %cst_175 : f32 to vector<16x1xf32>
    %438 = arith.addf %434, %437 : vector<16x1xf32>
    %439 = math.rsqrt %438 : vector<16x1xf32>
    %440 = vector.broadcast %439 : vector<16x1xf32> to vector<16x32xf32>
    %441 = arith.mulf %436, %440 : vector<16x32xf32>
    %442 = vector.broadcast %421 : vector<1x32xf32> to vector<16x32xf32>
    %443 = arith.mulf %441, %442 : vector<16x32xf32>
    %444 = vector.broadcast %423 : vector<1x32xf32> to vector<16x32xf32>
    %445 = arith.addf %443, %444 : vector<16x32xf32>
    %c1_176 = arith.constant 1 : index
    %c0_177 = arith.constant 0 : index
    %c0_178 = arith.constant 0 : index
    %446 = vector.load %arg10[%c1_176, %c0_177, %c0_178] : memref<2x32x64xbf16, #tpu.memory_space<vmem>>, vector<1x32x64xbf16>
    %447 = vector.shape_cast %446 : vector<1x32x64xbf16> to vector<32x64xbf16>
    %448 = arith.truncf %445 : vector<16x32xf32> to vector<16x32xbf16>
    %cst_179 = arith.constant dense<0.000000e+00> : vector<16x64xf32>
    %449 = tpu.matmul %448, %447, %cst_179 {dimension_numbers = #tpu.dot_dimension_numbers<[1], [0], [0], [1], [0, 0, 1, 1], [], []>} : vector<16x32xbf16>, vector<32x64xbf16>, vector<16x64xf32> -> vector<16x64xf32>
    %c1_180 = arith.constant 1 : index
    %c0_181 = arith.constant 0 : index
    %c0_182 = arith.constant 0 : index
    %450 = vector.load %arg11[%c1_180, %c0_181, %c0_182] : memref<2x1x64xf32, #tpu.memory_space<vmem>>, vector<1x1x64xf32>
    %451 = vector.shape_cast %450 : vector<1x1x64xf32> to vector<1x64xf32>
    %452 = vector.broadcast %451 : vector<1x64xf32> to vector<16x64xf32>
    %453 = arith.addf %449, %452 : vector<16x64xf32>
    %454 = arith.mulf %453, %453 : vector<16x64xf32>
    %455 = arith.mulf %453, %454 : vector<16x64xf32>
    %cst_183 = arith.constant 4.471500e-02 : f32
    %456 = vector.broadcast %cst_183 : f32 to vector<16x64xf32>
    %457 = arith.mulf %456, %455 : vector<16x64xf32>
    %458 = arith.addf %453, %457 : vector<16x64xf32>
    %cst_184 = arith.constant 0.797884583 : f32
    %459 = vector.broadcast %cst_184 : f32 to vector<16x64xf32>
    %460 = arith.mulf %459, %458 : vector<16x64xf32>
    %461 = math.tanh %460 : vector<16x64xf32>
    %cst_185 = arith.constant 1.000000e+00 : f32
    %462 = vector.broadcast %cst_185 : f32 to vector<16x64xf32>
    %463 = arith.addf %462, %461 : vector<16x64xf32>
    %cst_186 = arith.constant 5.000000e-01 : f32
    %464 = vector.broadcast %cst_186 : f32 to vector<16x64xf32>
    %465 = arith.mulf %464, %463 : vector<16x64xf32>
    %466 = arith.mulf %453, %465 : vector<16x64xf32>
    %c1_187 = arith.constant 1 : index
    %c0_188 = arith.constant 0 : index
    %c0_189 = arith.constant 0 : index
    %467 = vector.load %arg12[%c1_187, %c0_188, %c0_189] : memref<2x64x32xbf16, #tpu.memory_space<vmem>>, vector<1x64x32xbf16>
    %468 = vector.shape_cast %467 : vector<1x64x32xbf16> to vector<64x32xbf16>
    %469 = arith.truncf %466 : vector<16x64xf32> to vector<16x64xbf16>
    %cst_190 = arith.constant dense<0.000000e+00> : vector<16x32xf32>
    %470 = tpu.matmul %469, %468, %cst_190 {dimension_numbers = #tpu.dot_dimension_numbers<[1], [0], [0], [1], [0, 0, 1, 1], [], []>} : vector<16x64xbf16>, vector<64x32xbf16>, vector<16x32xf32> -> vector<16x32xf32>
    %c1_191 = arith.constant 1 : index
    %c0_192 = arith.constant 0 : index
    %c0_193 = arith.constant 0 : index
    %471 = vector.load %arg13[%c1_191, %c0_192, %c0_193] : memref<2x1x32xf32, #tpu.memory_space<vmem>>, vector<1x1x32xf32>
    %472 = vector.shape_cast %471 : vector<1x1x32xf32> to vector<1x32xf32>
    %473 = vector.broadcast %472 : vector<1x32xf32> to vector<16x32xf32>
    %474 = arith.addf %470, %473 : vector<16x32xf32>
    %475 = arith.addf %445, %474 : vector<16x32xf32>
    %c1_194 = arith.constant 1 : index
    %c0_195 = arith.constant 0 : index
    %c0_196 = arith.constant 0 : index
    %476 = vector.load %arg14[%c1_194, %c0_195, %c0_196] : memref<2x1x32xf32, #tpu.memory_space<vmem>>, vector<1x1x32xf32>
    %477 = vector.shape_cast %476 : vector<1x1x32xf32> to vector<1x32xf32>
    %c1_197 = arith.constant 1 : index
    %c0_198 = arith.constant 0 : index
    %c0_199 = arith.constant 0 : index
    %478 = vector.load %arg15[%c1_197, %c0_198, %c0_199] : memref<2x1x32xf32, #tpu.memory_space<vmem>>, vector<1x1x32xf32>
    %479 = vector.shape_cast %478 : vector<1x1x32xf32> to vector<1x32xf32>
    %cst_200 = arith.constant dense<0.000000e+00> : vector<16xf32>
    %480 = vector.multi_reduction <add>, %475, %cst_200 [1] : vector<16x32xf32> to vector<16xf32>
    %481 = vector.shape_cast %480 : vector<16xf32> to vector<16x1xf32>
    %cst_201 = arith.constant 3.200000e+01 : f32
    %482 = vector.broadcast %cst_201 : f32 to vector<16x1xf32>
    %483 = arith.divf %481, %482 : vector<16x1xf32>
    %484 = vector.broadcast %483 : vector<16x1xf32> to vector<16x32xf32>
    %485 = arith.subf %475, %484 : vector<16x32xf32>
    %486 = arith.mulf %485, %485 : vector<16x32xf32>
    %cst_202 = arith.constant dense<0.000000e+00> : vector<16xf32>
    %487 = vector.multi_reduction <add>, %486, %cst_202 [1] : vector<16x32xf32> to vector<16xf32>
    %488 = vector.shape_cast %487 : vector<16xf32> to vector<16x1xf32>
    %cst_203 = arith.constant 3.200000e+01 : f32
    %489 = vector.broadcast %cst_203 : f32 to vector<16x1xf32>
    %490 = arith.divf %488, %489 : vector<16x1xf32>
    %491 = vector.broadcast %483 : vector<16x1xf32> to vector<16x32xf32>
    %492 = arith.subf %475, %491 : vector<16x32xf32>
    %cst_204 = arith.constant 9.99999996E-13 : f32
    %493 = vector.broadcast %cst_204 : f32 to vector<16x1xf32>
    %494 = arith.addf %490, %493 : vector<16x1xf32>
    %495 = math.rsqrt %494 : vector<16x1xf32>
    %496 = vector.broadcast %495 : vector<16x1xf32> to vector<16x32xf32>
    %497 = arith.mulf %492, %496 : vector<16x32xf32>
    %498 = vector.broadcast %477 : vector<1x32xf32> to vector<16x32xf32>
    %499 = arith.mulf %497, %498 : vector<16x32xf32>
    %500 = vector.broadcast %479 : vector<1x32xf32> to vector<16x32xf32>
    %501 = arith.addf %499, %500 : vector<16x32xf32>
    %c0_205 = arith.constant 0 : index
    %c0_206 = arith.constant 0 : index
    %502 = vector.load %arg16[%c0_205, %c0_206] : memref<32x128xbf16, #tpu.memory_space<vmem>>, vector<32x128xbf16>
    %503 = arith.truncf %501 : vector<16x32xf32> to vector<16x32xbf16>
    %cst_207 = arith.constant dense<0.000000e+00> : vector<16x128xf32>
    %504 = tpu.matmul %503, %502, %cst_207 {dimension_numbers = #tpu.dot_dimension_numbers<[1], [0], [0], [1], [0, 0, 1, 1], [], []>} : vector<16x32xbf16>, vector<32x128xbf16>, vector<16x128xf32> -> vector<16x128xf32>
    %c0_208 = arith.constant 0 : index
    %c0_209 = arith.constant 0 : index
    %505 = vector.load %arg17[%c0_208, %c0_209] : memref<1x128xf32, #tpu.memory_space<vmem>>, vector<1x128xf32>
    %506 = vector.broadcast %505 : vector<1x128xf32> to vector<16x128xf32>
    %507 = arith.addf %504, %506 : vector<16x128xf32>
    %c0_210 = arith.constant 0 : index
    %c0_211 = arith.constant 0 : index
    %508 = vector.load %arg24[%c0_210, %c0_211] : memref<16x128xf32, #tpu.memory_space<vmem>>, vector<16x128xf32>
    tpu.vector_store %arg24[%c0_210, %c0_211], %507 {strides = array<i32>} : memref<16x128xf32, #tpu.memory_space<vmem>>, vector<16x128xf32>,
    %c0_212 = arith.constant 0 : index
    %c0_213 = arith.constant 0 : index
    %509 = vector.load %arg18[%c0_212, %c0_213] : memref<16x64xbf16, #tpu.memory_space<vmem>>, vector<16x64xbf16>
    %c0_214 = arith.constant 0 : index
    %c0_215 = arith.constant 0 : index
    %510 = vector.load %arg19[%c0_214, %c0_215] : memref<16x64xbf16, #tpu.memory_space<vmem>>, vector<16x64xbf16>
    %cst_216 = arith.constant 0.000000e+00 : f32
    %511 = vector.broadcast %cst_216 : f32 to vector<2x16xf32>
    %c0_217 = arith.constant 0 : index
    %c0_218 = arith.constant 0 : index
    %512 = tpu.strided_load %arg24[%c0_217, %c0_218] {strides = array<i32: 8, 1>} : memref<16x128xf32, #tpu.memory_space<vmem>>, vector<2x128xf32>
    %c7 = arith.constant 7 : index
    %c0_219 = arith.constant 0 : index
    %513 = tpu.strided_load %arg24[%c7, %c0_219] {strides = array<i32: 8, 1>} : memref<16x128xf32, #tpu.memory_space<vmem>>, vector<2x128xf32>
    %514 = vector.extract_strided_slice %512 {offsets = [0, 0], sizes = [2, 64], strides = [1, 1]} : vector<2x128xf32> to vector<2x64xf32>
    %515 = arith.truncf %511 : vector<2x16xf32> to vector<2x16xbf16>
    %cst_220 = arith.constant dense<0.000000e+00> : vector<2x64xf32>
    %516 = tpu.matmul %515, %509, %cst_220 {dimension_numbers = #tpu.dot_dimension_numbers<[1], [0], [0], [1], [0, 0, 1, 1], [], []>} : vector<2x16xbf16>, vector<16x64xbf16>, vector<2x64xf32> -> vector<2x64xf32>
    %517 = arith.addf %514, %516 : vector<2x64xf32>
    %518 = vector.extract_strided_slice %517 {offsets = [0, 0], sizes = [2, 48], strides = [1, 1]} : vector<2x64xf32> to vector<2x48xf32>
    %519 = arith.negf %518 : vector<2x48xf32>
    %520 = math.exp %519 : vector<2x48xf32>
    %cst_221 = arith.constant 1.000000e+00 : f32
    %521 = vector.broadcast %cst_221 : f32 to vector<2x48xf32>
    %522 = arith.addf %521, %520 : vector<2x48xf32>
    %523 = arith.divf %521, %522 : vector<2x48xf32>
    %524 = vector.extract_strided_slice %517 {offsets = [0, 48], sizes = [2, 16], strides = [1, 1]} : vector<2x64xf32> to vector<2x16xf32>
    %525 = math.tanh %524 : vector<2x16xf32>
    %526 = vector.extract_strided_slice %523 {offsets = [0, 0], sizes = [2, 16], strides = [1, 1]} : vector<2x48xf32> to vector<2x16xf32>
    %527 = vector.extract_strided_slice %523 {offsets = [0, 16], sizes = [2, 16], strides = [1, 1]} : vector<2x48xf32> to vector<2x16xf32>
    %528 = vector.extract_strided_slice %523 {offsets = [0, 32], sizes = [2, 16], strides = [1, 1]} : vector<2x48xf32> to vector<2x16xf32>
    %529 = arith.mulf %527, %511 : vector<2x16xf32>
    %530 = arith.mulf %526, %525 : vector<2x16xf32>
    %531 = arith.addf %529, %530 : vector<2x16xf32>
    %532 = math.tanh %531 : vector<2x16xf32>
    %533 = arith.mulf %528, %532 : vector<2x16xf32>
    %534 = vector.extract_strided_slice %513 {offsets = [0, 64], sizes = [2, 64], strides = [1, 1]} : vector<2x128xf32> to vector<2x64xf32>
    %535 = arith.truncf %511 : vector<2x16xf32> to vector<2x16xbf16>
    %cst_222 = arith.constant dense<0.000000e+00> : vector<2x64xf32>
    %536 = tpu.matmul %535, %510, %cst_222 {dimension_numbers = #tpu.dot_dimension_numbers<[1], [0], [0], [1], [0, 0, 1, 1], [], []>} : vector<2x16xbf16>, vector<16x64xbf16>, vector<2x64xf32> -> vector<2x64xf32>
    %537 = arith.addf %534, %536 : vector<2x64xf32>
    %538 = vector.extract_strided_slice %537 {offsets = [0, 0], sizes = [2, 48], strides = [1, 1]} : vector<2x64xf32> to vector<2x48xf32>
    %539 = arith.negf %538 : vector<2x48xf32>
    %540 = math.exp %539 : vector<2x48xf32>
    %cst_223 = arith.constant 1.000000e+00 : f32
    %541 = vector.broadcast %cst_223 : f32 to vector<2x48xf32>
    %542 = arith.addf %541, %540 : vector<2x48xf32>
    %543 = arith.divf %541, %542 : vector<2x48xf32>
    %544 = vector.extract_strided_slice %537 {offsets = [0, 48], sizes = [2, 16], strides = [1, 1]} : vector<2x64xf32> to vector<2x16xf32>
    %545 = math.tanh %544 : vector<2x16xf32>
    %546 = vector.extract_strided_slice %543 {offsets = [0, 0], sizes = [2, 16], strides = [1, 1]} : vector<2x48xf32> to vector<2x16xf32>
    %547 = vector.extract_strided_slice %543 {offsets = [0, 16], sizes = [2, 16], strides = [1, 1]} : vector<2x48xf32> to vector<2x16xf32>
    %548 = vector.extract_strided_slice %543 {offsets = [0, 32], sizes = [2, 16], strides = [1, 1]} : vector<2x48xf32> to vector<2x16xf32>
    %549 = arith.mulf %547, %511 : vector<2x16xf32>
    %550 = arith.mulf %546, %545 : vector<2x16xf32>
    %551 = arith.addf %549, %550 : vector<2x16xf32>
    %552 = math.tanh %551 : vector<2x16xf32>
    %553 = arith.mulf %548, %552 : vector<2x16xf32>
    %c1_224 = arith.constant 1 : index
    %c0_225 = arith.constant 0 : index
    %554 = tpu.strided_load %arg24[%c1_224, %c0_225] {strides = array<i32: 8, 1>} : memref<16x128xf32, #tpu.memory_space<vmem>>, vector<2x128xf32>
    %c6 = arith.constant 6 : index
    %c0_226 = arith.constant 0 : index
    %555 = tpu.strided_load %arg24[%c6, %c0_226] {strides = array<i32: 8, 1>} : memref<16x128xf32, #tpu.memory_space<vmem>>, vector<2x128xf32>
    %556 = vector.extract_strided_slice %554 {offsets = [0, 0], sizes = [2, 64], strides = [1, 1]} : vector<2x128xf32> to vector<2x64xf32>
    %557 = arith.truncf %533 : vector<2x16xf32> to vector<2x16xbf16>
    %cst_227 = arith.constant dense<0.000000e+00> : vector<2x64xf32>
    %558 = tpu.matmul %557, %509, %cst_227 {dimension_numbers = #tpu.dot_dimension_numbers<[1], [0], [0], [1], [0, 0, 1, 1], [], []>} : vector<2x16xbf16>, vector<16x64xbf16>, vector<2x64xf32> -> vector<2x64xf32>
    %559 = arith.addf %556, %558 : vector<2x64xf32>
    %560 = vector.extract_strided_slice %559 {offsets = [0, 0], sizes = [2, 48], strides = [1, 1]} : vector<2x64xf32> to vector<2x48xf32>
    %561 = arith.negf %560 : vector<2x48xf32>
    %562 = math.exp %561 : vector<2x48xf32>
    %cst_228 = arith.constant 1.000000e+00 : f32
    %563 = vector.broadcast %cst_228 : f32 to vector<2x48xf32>
    %564 = arith.addf %563, %562 : vector<2x48xf32>
    %565 = arith.divf %563, %564 : vector<2x48xf32>
    %566 = vector.extract_strided_slice %559 {offsets = [0, 48], sizes = [2, 16], strides = [1, 1]} : vector<2x64xf32> to vector<2x16xf32>
    %567 = math.tanh %566 : vector<2x16xf32>
    %568 = vector.extract_strided_slice %565 {offsets = [0, 0], sizes = [2, 16], strides = [1, 1]} : vector<2x48xf32> to vector<2x16xf32>
    %569 = vector.extract_strided_slice %565 {offsets = [0, 16], sizes = [2, 16], strides = [1, 1]} : vector<2x48xf32> to vector<2x16xf32>
    %570 = vector.extract_strided_slice %565 {offsets = [0, 32], sizes = [2, 16], strides = [1, 1]} : vector<2x48xf32> to vector<2x16xf32>
    %571 = arith.mulf %569, %531 : vector<2x16xf32>
    %572 = arith.mulf %568, %567 : vector<2x16xf32>
    %573 = arith.addf %571, %572 : vector<2x16xf32>
    %574 = math.tanh %573 : vector<2x16xf32>
    %575 = arith.mulf %570, %574 : vector<2x16xf32>
    %576 = vector.extract_strided_slice %555 {offsets = [0, 64], sizes = [2, 64], strides = [1, 1]} : vector<2x128xf32> to vector<2x64xf32>
    %577 = arith.truncf %553 : vector<2x16xf32> to vector<2x16xbf16>
    %cst_229 = arith.constant dense<0.000000e+00> : vector<2x64xf32>
    %578 = tpu.matmul %577, %510, %cst_229 {dimension_numbers = #tpu.dot_dimension_numbers<[1], [0], [0], [1], [0, 0, 1, 1], [], []>} : vector<2x16xbf16>, vector<16x64xbf16>, vector<2x64xf32> -> vector<2x64xf32>
    %579 = arith.addf %576, %578 : vector<2x64xf32>
    %580 = vector.extract_strided_slice %579 {offsets = [0, 0], sizes = [2, 48], strides = [1, 1]} : vector<2x64xf32> to vector<2x48xf32>
    %581 = arith.negf %580 : vector<2x48xf32>
    %582 = math.exp %581 : vector<2x48xf32>
    %cst_230 = arith.constant 1.000000e+00 : f32
    %583 = vector.broadcast %cst_230 : f32 to vector<2x48xf32>
    %584 = arith.addf %583, %582 : vector<2x48xf32>
    %585 = arith.divf %583, %584 : vector<2x48xf32>
    %586 = vector.extract_strided_slice %579 {offsets = [0, 48], sizes = [2, 16], strides = [1, 1]} : vector<2x64xf32> to vector<2x16xf32>
    %587 = math.tanh %586 : vector<2x16xf32>
    %588 = vector.extract_strided_slice %585 {offsets = [0, 0], sizes = [2, 16], strides = [1, 1]} : vector<2x48xf32> to vector<2x16xf32>
    %589 = vector.extract_strided_slice %585 {offsets = [0, 16], sizes = [2, 16], strides = [1, 1]} : vector<2x48xf32> to vector<2x16xf32>
    %590 = vector.extract_strided_slice %585 {offsets = [0, 32], sizes = [2, 16], strides = [1, 1]} : vector<2x48xf32> to vector<2x16xf32>
    %591 = arith.mulf %589, %551 : vector<2x16xf32>
    %592 = arith.mulf %588, %587 : vector<2x16xf32>
    %593 = arith.addf %591, %592 : vector<2x16xf32>
    %594 = math.tanh %593 : vector<2x16xf32>
    %595 = arith.mulf %590, %594 : vector<2x16xf32>
    %c2 = arith.constant 2 : index
    %c0_231 = arith.constant 0 : index
    %596 = tpu.strided_load %arg24[%c2, %c0_231] {strides = array<i32: 8, 1>} : memref<16x128xf32, #tpu.memory_space<vmem>>, vector<2x128xf32>
    %c5 = arith.constant 5 : index
    %c0_232 = arith.constant 0 : index
    %597 = tpu.strided_load %arg24[%c5, %c0_232] {strides = array<i32: 8, 1>} : memref<16x128xf32, #tpu.memory_space<vmem>>, vector<2x128xf32>
    %598 = vector.extract_strided_slice %596 {offsets = [0, 0], sizes = [2, 64], strides = [1, 1]} : vector<2x128xf32> to vector<2x64xf32>
    %599 = arith.truncf %575 : vector<2x16xf32> to vector<2x16xbf16>
    %cst_233 = arith.constant dense<0.000000e+00> : vector<2x64xf32>
    %600 = tpu.matmul %599, %509, %cst_233 {dimension_numbers = #tpu.dot_dimension_numbers<[1], [0], [0], [1], [0, 0, 1, 1], [], []>} : vector<2x16xbf16>, vector<16x64xbf16>, vector<2x64xf32> -> vector<2x64xf32>
    %601 = arith.addf %598, %600 : vector<2x64xf32>
    %602 = vector.extract_strided_slice %601 {offsets = [0, 0], sizes = [2, 48], strides = [1, 1]} : vector<2x64xf32> to vector<2x48xf32>
    %603 = arith.negf %602 : vector<2x48xf32>
    %604 = math.exp %603 : vector<2x48xf32>
    %cst_234 = arith.constant 1.000000e+00 : f32
    %605 = vector.broadcast %cst_234 : f32 to vector<2x48xf32>
    %606 = arith.addf %605, %604 : vector<2x48xf32>
    %607 = arith.divf %605, %606 : vector<2x48xf32>
    %608 = vector.extract_strided_slice %601 {offsets = [0, 48], sizes = [2, 16], strides = [1, 1]} : vector<2x64xf32> to vector<2x16xf32>
    %609 = math.tanh %608 : vector<2x16xf32>
    %610 = vector.extract_strided_slice %607 {offsets = [0, 0], sizes = [2, 16], strides = [1, 1]} : vector<2x48xf32> to vector<2x16xf32>
    %611 = vector.extract_strided_slice %607 {offsets = [0, 16], sizes = [2, 16], strides = [1, 1]} : vector<2x48xf32> to vector<2x16xf32>
    %612 = vector.extract_strided_slice %607 {offsets = [0, 32], sizes = [2, 16], strides = [1, 1]} : vector<2x48xf32> to vector<2x16xf32>
    %613 = arith.mulf %611, %573 : vector<2x16xf32>
    %614 = arith.mulf %610, %609 : vector<2x16xf32>
    %615 = arith.addf %613, %614 : vector<2x16xf32>
    %616 = math.tanh %615 : vector<2x16xf32>
    %617 = arith.mulf %612, %616 : vector<2x16xf32>
    %618 = vector.extract_strided_slice %597 {offsets = [0, 64], sizes = [2, 64], strides = [1, 1]} : vector<2x128xf32> to vector<2x64xf32>
    %619 = arith.truncf %595 : vector<2x16xf32> to vector<2x16xbf16>
    %cst_235 = arith.constant dense<0.000000e+00> : vector<2x64xf32>
    %620 = tpu.matmul %619, %510, %cst_235 {dimension_numbers = #tpu.dot_dimension_numbers<[1], [0], [0], [1], [0, 0, 1, 1], [], []>} : vector<2x16xbf16>, vector<16x64xbf16>, vector<2x64xf32> -> vector<2x64xf32>
    %621 = arith.addf %618, %620 : vector<2x64xf32>
    %622 = vector.extract_strided_slice %621 {offsets = [0, 0], sizes = [2, 48], strides = [1, 1]} : vector<2x64xf32> to vector<2x48xf32>
    %623 = arith.negf %622 : vector<2x48xf32>
    %624 = math.exp %623 : vector<2x48xf32>
    %cst_236 = arith.constant 1.000000e+00 : f32
    %625 = vector.broadcast %cst_236 : f32 to vector<2x48xf32>
    %626 = arith.addf %625, %624 : vector<2x48xf32>
    %627 = arith.divf %625, %626 : vector<2x48xf32>
    %628 = vector.extract_strided_slice %621 {offsets = [0, 48], sizes = [2, 16], strides = [1, 1]} : vector<2x64xf32> to vector<2x16xf32>
    %629 = math.tanh %628 : vector<2x16xf32>
    %630 = vector.extract_strided_slice %627 {offsets = [0, 0], sizes = [2, 16], strides = [1, 1]} : vector<2x48xf32> to vector<2x16xf32>
    %631 = vector.extract_strided_slice %627 {offsets = [0, 16], sizes = [2, 16], strides = [1, 1]} : vector<2x48xf32> to vector<2x16xf32>
    %632 = vector.extract_strided_slice %627 {offsets = [0, 32], sizes = [2, 16], strides = [1, 1]} : vector<2x48xf32> to vector<2x16xf32>
    %633 = arith.mulf %631, %593 : vector<2x16xf32>
    %634 = arith.mulf %630, %629 : vector<2x16xf32>
    %635 = arith.addf %633, %634 : vector<2x16xf32>
    %636 = math.tanh %635 : vector<2x16xf32>
    %637 = arith.mulf %632, %636 : vector<2x16xf32>
    %c3 = arith.constant 3 : index
    %c0_237 = arith.constant 0 : index
    %638 = tpu.strided_load %arg24[%c3, %c0_237] {strides = array<i32: 8, 1>} : memref<16x128xf32, #tpu.memory_space<vmem>>, vector<2x128xf32>
    %c4 = arith.constant 4 : index
    %c0_238 = arith.constant 0 : index
    %639 = tpu.strided_load %arg24[%c4, %c0_238] {strides = array<i32: 8, 1>} : memref<16x128xf32, #tpu.memory_space<vmem>>, vector<2x128xf32>
    %640 = vector.extract_strided_slice %638 {offsets = [0, 0], sizes = [2, 64], strides = [1, 1]} : vector<2x128xf32> to vector<2x64xf32>
    %641 = arith.truncf %617 : vector<2x16xf32> to vector<2x16xbf16>
    %cst_239 = arith.constant dense<0.000000e+00> : vector<2x64xf32>
    %642 = tpu.matmul %641, %509, %cst_239 {dimension_numbers = #tpu.dot_dimension_numbers<[1], [0], [0], [1], [0, 0, 1, 1], [], []>} : vector<2x16xbf16>, vector<16x64xbf16>, vector<2x64xf32> -> vector<2x64xf32>
    %643 = arith.addf %640, %642 : vector<2x64xf32>
    %644 = vector.extract_strided_slice %643 {offsets = [0, 0], sizes = [2, 48], strides = [1, 1]} : vector<2x64xf32> to vector<2x48xf32>
    %645 = arith.negf %644 : vector<2x48xf32>
    %646 = math.exp %645 : vector<2x48xf32>
    %cst_240 = arith.constant 1.000000e+00 : f32
    %647 = vector.broadcast %cst_240 : f32 to vector<2x48xf32>
    %648 = arith.addf %647, %646 : vector<2x48xf32>
    %649 = arith.divf %647, %648 : vector<2x48xf32>
    %650 = vector.extract_strided_slice %643 {offsets = [0, 48], sizes = [2, 16], strides = [1, 1]} : vector<2x64xf32> to vector<2x16xf32>
    %651 = math.tanh %650 : vector<2x16xf32>
    %652 = vector.extract_strided_slice %649 {offsets = [0, 0], sizes = [2, 16], strides = [1, 1]} : vector<2x48xf32> to vector<2x16xf32>
    %653 = vector.extract_strided_slice %649 {offsets = [0, 16], sizes = [2, 16], strides = [1, 1]} : vector<2x48xf32> to vector<2x16xf32>
    %654 = vector.extract_strided_slice %649 {offsets = [0, 32], sizes = [2, 16], strides = [1, 1]} : vector<2x48xf32> to vector<2x16xf32>
    %655 = arith.mulf %653, %615 : vector<2x16xf32>
    %656 = arith.mulf %652, %651 : vector<2x16xf32>
    %657 = arith.addf %655, %656 : vector<2x16xf32>
    %658 = math.tanh %657 : vector<2x16xf32>
    %659 = arith.mulf %654, %658 : vector<2x16xf32>
    %660 = vector.extract_strided_slice %639 {offsets = [0, 64], sizes = [2, 64], strides = [1, 1]} : vector<2x128xf32> to vector<2x64xf32>
    %661 = arith.truncf %637 : vector<2x16xf32> to vector<2x16xbf16>
    %cst_241 = arith.constant dense<0.000000e+00> : vector<2x64xf32>
    %662 = tpu.matmul %661, %510, %cst_241 {dimension_numbers = #tpu.dot_dimension_numbers<[1], [0], [0], [1], [0, 0, 1, 1], [], []>} : vector<2x16xbf16>, vector<16x64xbf16>, vector<2x64xf32> -> vector<2x64xf32>
    %663 = arith.addf %660, %662 : vector<2x64xf32>
    %664 = vector.extract_strided_slice %663 {offsets = [0, 0], sizes = [2, 48], strides = [1, 1]} : vector<2x64xf32> to vector<2x48xf32>
    %665 = arith.negf %664 : vector<2x48xf32>
    %666 = math.exp %665 : vector<2x48xf32>
    %cst_242 = arith.constant 1.000000e+00 : f32
    %667 = vector.broadcast %cst_242 : f32 to vector<2x48xf32>
    %668 = arith.addf %667, %666 : vector<2x48xf32>
    %669 = arith.divf %667, %668 : vector<2x48xf32>
    %670 = vector.extract_strided_slice %663 {offsets = [0, 48], sizes = [2, 16], strides = [1, 1]} : vector<2x64xf32> to vector<2x16xf32>
    %671 = math.tanh %670 : vector<2x16xf32>
    %672 = vector.extract_strided_slice %669 {offsets = [0, 0], sizes = [2, 16], strides = [1, 1]} : vector<2x48xf32> to vector<2x16xf32>
    %673 = vector.extract_strided_slice %669 {offsets = [0, 16], sizes = [2, 16], strides = [1, 1]} : vector<2x48xf32> to vector<2x16xf32>
    %674 = vector.extract_strided_slice %669 {offsets = [0, 32], sizes = [2, 16], strides = [1, 1]} : vector<2x48xf32> to vector<2x16xf32>
    %675 = arith.mulf %673, %635 : vector<2x16xf32>
    %676 = arith.mulf %672, %671 : vector<2x16xf32>
    %677 = arith.addf %675, %676 : vector<2x16xf32>
    %678 = math.tanh %677 : vector<2x16xf32>
    %679 = arith.mulf %674, %678 : vector<2x16xf32>
    %c4_243 = arith.constant 4 : index
    %c0_244 = arith.constant 0 : index
    %680 = tpu.strided_load %arg24[%c4_243, %c0_244] {strides = array<i32: 8, 1>} : memref<16x128xf32, #tpu.memory_space<vmem>>, vector<2x128xf32>
    %c3_245 = arith.constant 3 : index
    %c0_246 = arith.constant 0 : index
    %681 = tpu.strided_load %arg24[%c3_245, %c0_246] {strides = array<i32: 8, 1>} : memref<16x128xf32, #tpu.memory_space<vmem>>, vector<2x128xf32>
    %682 = vector.extract_strided_slice %680 {offsets = [0, 0], sizes = [2, 64], strides = [1, 1]} : vector<2x128xf32> to vector<2x64xf32>
    %683 = arith.truncf %659 : vector<2x16xf32> to vector<2x16xbf16>
    %cst_247 = arith.constant dense<0.000000e+00> : vector<2x64xf32>
    %684 = tpu.matmul %683, %509, %cst_247 {dimension_numbers = #tpu.dot_dimension_numbers<[1], [0], [0], [1], [0, 0, 1, 1], [], []>} : vector<2x16xbf16>, vector<16x64xbf16>, vector<2x64xf32> -> vector<2x64xf32>
    %685 = arith.addf %682, %684 : vector<2x64xf32>
    %686 = vector.extract_strided_slice %685 {offsets = [0, 0], sizes = [2, 48], strides = [1, 1]} : vector<2x64xf32> to vector<2x48xf32>
    %687 = arith.negf %686 : vector<2x48xf32>
    %688 = math.exp %687 : vector<2x48xf32>
    %cst_248 = arith.constant 1.000000e+00 : f32
    %689 = vector.broadcast %cst_248 : f32 to vector<2x48xf32>
    %690 = arith.addf %689, %688 : vector<2x48xf32>
    %691 = arith.divf %689, %690 : vector<2x48xf32>
    %692 = vector.extract_strided_slice %685 {offsets = [0, 48], sizes = [2, 16], strides = [1, 1]} : vector<2x64xf32> to vector<2x16xf32>
    %693 = math.tanh %692 : vector<2x16xf32>
    %694 = vector.extract_strided_slice %691 {offsets = [0, 0], sizes = [2, 16], strides = [1, 1]} : vector<2x48xf32> to vector<2x16xf32>
    %695 = vector.extract_strided_slice %691 {offsets = [0, 16], sizes = [2, 16], strides = [1, 1]} : vector<2x48xf32> to vector<2x16xf32>
    %696 = vector.extract_strided_slice %691 {offsets = [0, 32], sizes = [2, 16], strides = [1, 1]} : vector<2x48xf32> to vector<2x16xf32>
    %697 = arith.mulf %695, %657 : vector<2x16xf32>
    %698 = arith.mulf %694, %693 : vector<2x16xf32>
    %699 = arith.addf %697, %698 : vector<2x16xf32>
    %700 = math.tanh %699 : vector<2x16xf32>
    %701 = arith.mulf %696, %700 : vector<2x16xf32>
    %702 = vector.extract_strided_slice %681 {offsets = [0, 64], sizes = [2, 64], strides = [1, 1]} : vector<2x128xf32> to vector<2x64xf32>
    %703 = arith.truncf %679 : vector<2x16xf32> to vector<2x16xbf16>
    %cst_249 = arith.constant dense<0.000000e+00> : vector<2x64xf32>
    %704 = tpu.matmul %703, %510, %cst_249 {dimension_numbers = #tpu.dot_dimension_numbers<[1], [0], [0], [1], [0, 0, 1, 1], [], []>} : vector<2x16xbf16>, vector<16x64xbf16>, vector<2x64xf32> -> vector<2x64xf32>
    %705 = arith.addf %702, %704 : vector<2x64xf32>
    %706 = vector.extract_strided_slice %705 {offsets = [0, 0], sizes = [2, 48], strides = [1, 1]} : vector<2x64xf32> to vector<2x48xf32>
    %707 = arith.negf %706 : vector<2x48xf32>
    %708 = math.exp %707 : vector<2x48xf32>
    %cst_250 = arith.constant 1.000000e+00 : f32
    %709 = vector.broadcast %cst_250 : f32 to vector<2x48xf32>
    %710 = arith.addf %709, %708 : vector<2x48xf32>
    %711 = arith.divf %709, %710 : vector<2x48xf32>
    %712 = vector.extract_strided_slice %705 {offsets = [0, 48], sizes = [2, 16], strides = [1, 1]} : vector<2x64xf32> to vector<2x16xf32>
    %713 = math.tanh %712 : vector<2x16xf32>
    %714 = vector.extract_strided_slice %711 {offsets = [0, 0], sizes = [2, 16], strides = [1, 1]} : vector<2x48xf32> to vector<2x16xf32>
    %715 = vector.extract_strided_slice %711 {offsets = [0, 16], sizes = [2, 16], strides = [1, 1]} : vector<2x48xf32> to vector<2x16xf32>
    %716 = vector.extract_strided_slice %711 {offsets = [0, 32], sizes = [2, 16], strides = [1, 1]} : vector<2x48xf32> to vector<2x16xf32>
    %717 = arith.mulf %715, %677 : vector<2x16xf32>
    %718 = arith.mulf %714, %713 : vector<2x16xf32>
    %719 = arith.addf %717, %718 : vector<2x16xf32>
    %720 = math.tanh %719 : vector<2x16xf32>
    %721 = arith.mulf %716, %720 : vector<2x16xf32>
    %c5_251 = arith.constant 5 : index
    %c0_252 = arith.constant 0 : index
    %722 = tpu.strided_load %arg24[%c5_251, %c0_252] {strides = array<i32: 8, 1>} : memref<16x128xf32, #tpu.memory_space<vmem>>, vector<2x128xf32>
    %c2_253 = arith.constant 2 : index
    %c0_254 = arith.constant 0 : index
    %723 = tpu.strided_load %arg24[%c2_253, %c0_254] {strides = array<i32: 8, 1>} : memref<16x128xf32, #tpu.memory_space<vmem>>, vector<2x128xf32>
    %724 = vector.extract_strided_slice %722 {offsets = [0, 0], sizes = [2, 64], strides = [1, 1]} : vector<2x128xf32> to vector<2x64xf32>
    %725 = arith.truncf %701 : vector<2x16xf32> to vector<2x16xbf16>
    %cst_255 = arith.constant dense<0.000000e+00> : vector<2x64xf32>
    %726 = tpu.matmul %725, %509, %cst_255 {dimension_numbers = #tpu.dot_dimension_numbers<[1], [0], [0], [1], [0, 0, 1, 1], [], []>} : vector<2x16xbf16>, vector<16x64xbf16>, vector<2x64xf32> -> vector<2x64xf32>
    %727 = arith.addf %724, %726 : vector<2x64xf32>
    %728 = vector.extract_strided_slice %727 {offsets = [0, 0], sizes = [2, 48], strides = [1, 1]} : vector<2x64xf32> to vector<2x48xf32>
    %729 = arith.negf %728 : vector<2x48xf32>
    %730 = math.exp %729 : vector<2x48xf32>
    %cst_256 = arith.constant 1.000000e+00 : f32
    %731 = vector.broadcast %cst_256 : f32 to vector<2x48xf32>
    %732 = arith.addf %731, %730 : vector<2x48xf32>
    %733 = arith.divf %731, %732 : vector<2x48xf32>
    %734 = vector.extract_strided_slice %727 {offsets = [0, 48], sizes = [2, 16], strides = [1, 1]} : vector<2x64xf32> to vector<2x16xf32>
    %735 = math.tanh %734 : vector<2x16xf32>
    %736 = vector.extract_strided_slice %733 {offsets = [0, 0], sizes = [2, 16], strides = [1, 1]} : vector<2x48xf32> to vector<2x16xf32>
    %737 = vector.extract_strided_slice %733 {offsets = [0, 16], sizes = [2, 16], strides = [1, 1]} : vector<2x48xf32> to vector<2x16xf32>
    %738 = vector.extract_strided_slice %733 {offsets = [0, 32], sizes = [2, 16], strides = [1, 1]} : vector<2x48xf32> to vector<2x16xf32>
    %739 = arith.mulf %737, %699 : vector<2x16xf32>
    %740 = arith.mulf %736, %735 : vector<2x16xf32>
    %741 = arith.addf %739, %740 : vector<2x16xf32>
    %742 = math.tanh %741 : vector<2x16xf32>
    %743 = arith.mulf %738, %742 : vector<2x16xf32>
    %744 = vector.extract_strided_slice %723 {offsets = [0, 64], sizes = [2, 64], strides = [1, 1]} : vector<2x128xf32> to vector<2x64xf32>
    %745 = arith.truncf %721 : vector<2x16xf32> to vector<2x16xbf16>
    %cst_257 = arith.constant dense<0.000000e+00> : vector<2x64xf32>
    %746 = tpu.matmul %745, %510, %cst_257 {dimension_numbers = #tpu.dot_dimension_numbers<[1], [0], [0], [1], [0, 0, 1, 1], [], []>} : vector<2x16xbf16>, vector<16x64xbf16>, vector<2x64xf32> -> vector<2x64xf32>
    %747 = arith.addf %744, %746 : vector<2x64xf32>
    %748 = vector.extract_strided_slice %747 {offsets = [0, 0], sizes = [2, 48], strides = [1, 1]} : vector<2x64xf32> to vector<2x48xf32>
    %749 = arith.negf %748 : vector<2x48xf32>
    %750 = math.exp %749 : vector<2x48xf32>
    %cst_258 = arith.constant 1.000000e+00 : f32
    %751 = vector.broadcast %cst_258 : f32 to vector<2x48xf32>
    %752 = arith.addf %751, %750 : vector<2x48xf32>
    %753 = arith.divf %751, %752 : vector<2x48xf32>
    %754 = vector.extract_strided_slice %747 {offsets = [0, 48], sizes = [2, 16], strides = [1, 1]} : vector<2x64xf32> to vector<2x16xf32>
    %755 = math.tanh %754 : vector<2x16xf32>
    %756 = vector.extract_strided_slice %753 {offsets = [0, 0], sizes = [2, 16], strides = [1, 1]} : vector<2x48xf32> to vector<2x16xf32>
    %757 = vector.extract_strided_slice %753 {offsets = [0, 16], sizes = [2, 16], strides = [1, 1]} : vector<2x48xf32> to vector<2x16xf32>
    %758 = vector.extract_strided_slice %753 {offsets = [0, 32], sizes = [2, 16], strides = [1, 1]} : vector<2x48xf32> to vector<2x16xf32>
    %759 = arith.mulf %757, %719 : vector<2x16xf32>
    %760 = arith.mulf %756, %755 : vector<2x16xf32>
    %761 = arith.addf %759, %760 : vector<2x16xf32>
    %762 = math.tanh %761 : vector<2x16xf32>
    %763 = arith.mulf %758, %762 : vector<2x16xf32>
    %c6_259 = arith.constant 6 : index
    %c0_260 = arith.constant 0 : index
    %764 = tpu.strided_load %arg24[%c6_259, %c0_260] {strides = array<i32: 8, 1>} : memref<16x128xf32, #tpu.memory_space<vmem>>, vector<2x128xf32>
    %c1_261 = arith.constant 1 : index
    %c0_262 = arith.constant 0 : index
    %765 = tpu.strided_load %arg24[%c1_261, %c0_262] {strides = array<i32: 8, 1>} : memref<16x128xf32, #tpu.memory_space<vmem>>, vector<2x128xf32>
    %766 = vector.extract_strided_slice %764 {offsets = [0, 0], sizes = [2, 64], strides = [1, 1]} : vector<2x128xf32> to vector<2x64xf32>
    %767 = arith.truncf %743 : vector<2x16xf32> to vector<2x16xbf16>
    %cst_263 = arith.constant dense<0.000000e+00> : vector<2x64xf32>
    %768 = tpu.matmul %767, %509, %cst_263 {dimension_numbers = #tpu.dot_dimension_numbers<[1], [0], [0], [1], [0, 0, 1, 1], [], []>} : vector<2x16xbf16>, vector<16x64xbf16>, vector<2x64xf32> -> vector<2x64xf32>
    %769 = arith.addf %766, %768 : vector<2x64xf32>
    %770 = vector.extract_strided_slice %769 {offsets = [0, 0], sizes = [2, 48], strides = [1, 1]} : vector<2x64xf32> to vector<2x48xf32>
    %771 = arith.negf %770 : vector<2x48xf32>
    %772 = math.exp %771 : vector<2x48xf32>
    %cst_264 = arith.constant 1.000000e+00 : f32
    %773 = vector.broadcast %cst_264 : f32 to vector<2x48xf32>
    %774 = arith.addf %773, %772 : vector<2x48xf32>
    %775 = arith.divf %773, %774 : vector<2x48xf32>
    %776 = vector.extract_strided_slice %769 {offsets = [0, 48], sizes = [2, 16], strides = [1, 1]} : vector<2x64xf32> to vector<2x16xf32>
    %777 = math.tanh %776 : vector<2x16xf32>
    %778 = vector.extract_strided_slice %775 {offsets = [0, 0], sizes = [2, 16], strides = [1, 1]} : vector<2x48xf32> to vector<2x16xf32>
    %779 = vector.extract_strided_slice %775 {offsets = [0, 16], sizes = [2, 16], strides = [1, 1]} : vector<2x48xf32> to vector<2x16xf32>
    %780 = vector.extract_strided_slice %775 {offsets = [0, 32], sizes = [2, 16], strides = [1, 1]} : vector<2x48xf32> to vector<2x16xf32>
    %781 = arith.mulf %779, %741 : vector<2x16xf32>
    %782 = arith.mulf %778, %777 : vector<2x16xf32>
    %783 = arith.addf %781, %782 : vector<2x16xf32>
    %784 = math.tanh %783 : vector<2x16xf32>
    %785 = arith.mulf %780, %784 : vector<2x16xf32>
    %786 = vector.extract_strided_slice %765 {offsets = [0, 64], sizes = [2, 64], strides = [1, 1]} : vector<2x128xf32> to vector<2x64xf32>
    %787 = arith.truncf %763 : vector<2x16xf32> to vector<2x16xbf16>
    %cst_265 = arith.constant dense<0.000000e+00> : vector<2x64xf32>
    %788 = tpu.matmul %787, %510, %cst_265 {dimension_numbers = #tpu.dot_dimension_numbers<[1], [0], [0], [1], [0, 0, 1, 1], [], []>} : vector<2x16xbf16>, vector<16x64xbf16>, vector<2x64xf32> -> vector<2x64xf32>
    %789 = arith.addf %786, %788 : vector<2x64xf32>
    %790 = vector.extract_strided_slice %789 {offsets = [0, 0], sizes = [2, 48], strides = [1, 1]} : vector<2x64xf32> to vector<2x48xf32>
    %791 = arith.negf %790 : vector<2x48xf32>
    %792 = math.exp %791 : vector<2x48xf32>
    %cst_266 = arith.constant 1.000000e+00 : f32
    %793 = vector.broadcast %cst_266 : f32 to vector<2x48xf32>
    %794 = arith.addf %793, %792 : vector<2x48xf32>
    %795 = arith.divf %793, %794 : vector<2x48xf32>
    %796 = vector.extract_strided_slice %789 {offsets = [0, 48], sizes = [2, 16], strides = [1, 1]} : vector<2x64xf32> to vector<2x16xf32>
    %797 = math.tanh %796 : vector<2x16xf32>
    %798 = vector.extract_strided_slice %795 {offsets = [0, 0], sizes = [2, 16], strides = [1, 1]} : vector<2x48xf32> to vector<2x16xf32>
    %799 = vector.extract_strided_slice %795 {offsets = [0, 16], sizes = [2, 16], strides = [1, 1]} : vector<2x48xf32> to vector<2x16xf32>
    %800 = vector.extract_strided_slice %795 {offsets = [0, 32], sizes = [2, 16], strides = [1, 1]} : vector<2x48xf32> to vector<2x16xf32>
    %801 = arith.mulf %799, %761 : vector<2x16xf32>
    %802 = arith.mulf %798, %797 : vector<2x16xf32>
    %803 = arith.addf %801, %802 : vector<2x16xf32>
    %804 = math.tanh %803 : vector<2x16xf32>
    %805 = arith.mulf %800, %804 : vector<2x16xf32>
    %c7_267 = arith.constant 7 : index
    %c0_268 = arith.constant 0 : index
    %806 = tpu.strided_load %arg24[%c7_267, %c0_268] {strides = array<i32: 8, 1>} : memref<16x128xf32, #tpu.memory_space<vmem>>, vector<2x128xf32>
    %c0_269 = arith.constant 0 : index
    %c0_270 = arith.constant 0 : index
    %807 = tpu.strided_load %arg24[%c0_269, %c0_270] {strides = array<i32: 8, 1>} : memref<16x128xf32, #tpu.memory_space<vmem>>, vector<2x128xf32>
    %808 = vector.extract_strided_slice %806 {offsets = [0, 0], sizes = [2, 64], strides = [1, 1]} : vector<2x128xf32> to vector<2x64xf32>
    %809 = arith.truncf %785 : vector<2x16xf32> to vector<2x16xbf16>
    %cst_271 = arith.constant dense<0.000000e+00> : vector<2x64xf32>
    %810 = tpu.matmul %809, %509, %cst_271 {dimension_numbers = #tpu.dot_dimension_numbers<[1], [0], [0], [1], [0, 0, 1, 1], [], []>} : vector<2x16xbf16>, vector<16x64xbf16>, vector<2x64xf32> -> vector<2x64xf32>
    %811 = arith.addf %808, %810 : vector<2x64xf32>
    %812 = vector.extract_strided_slice %811 {offsets = [0, 0], sizes = [2, 48], strides = [1, 1]} : vector<2x64xf32> to vector<2x48xf32>
    %813 = arith.negf %812 : vector<2x48xf32>
    %814 = math.exp %813 : vector<2x48xf32>
    %cst_272 = arith.constant 1.000000e+00 : f32
    %815 = vector.broadcast %cst_272 : f32 to vector<2x48xf32>
    %816 = arith.addf %815, %814 : vector<2x48xf32>
    %817 = arith.divf %815, %816 : vector<2x48xf32>
    %818 = vector.extract_strided_slice %811 {offsets = [0, 48], sizes = [2, 16], strides = [1, 1]} : vector<2x64xf32> to vector<2x16xf32>
    %819 = math.tanh %818 : vector<2x16xf32>
    %820 = vector.extract_strided_slice %817 {offsets = [0, 0], sizes = [2, 16], strides = [1, 1]} : vector<2x48xf32> to vector<2x16xf32>
    %821 = vector.extract_strided_slice %817 {offsets = [0, 16], sizes = [2, 16], strides = [1, 1]} : vector<2x48xf32> to vector<2x16xf32>
    %822 = vector.extract_strided_slice %817 {offsets = [0, 32], sizes = [2, 16], strides = [1, 1]} : vector<2x48xf32> to vector<2x16xf32>
    %823 = arith.mulf %821, %783 : vector<2x16xf32>
    %824 = arith.mulf %820, %819 : vector<2x16xf32>
    %825 = arith.addf %823, %824 : vector<2x16xf32>
    %826 = math.tanh %825 : vector<2x16xf32>
    %827 = arith.mulf %822, %826 : vector<2x16xf32>
    %828 = vector.extract_strided_slice %807 {offsets = [0, 64], sizes = [2, 64], strides = [1, 1]} : vector<2x128xf32> to vector<2x64xf32>
    %829 = arith.truncf %805 : vector<2x16xf32> to vector<2x16xbf16>
    %cst_273 = arith.constant dense<0.000000e+00> : vector<2x64xf32>
    %830 = tpu.matmul %829, %510, %cst_273 {dimension_numbers = #tpu.dot_dimension_numbers<[1], [0], [0], [1], [0, 0, 1, 1], [], []>} : vector<2x16xbf16>, vector<16x64xbf16>, vector<2x64xf32> -> vector<2x64xf32>
    %831 = arith.addf %828, %830 : vector<2x64xf32>
    %832 = vector.extract_strided_slice %831 {offsets = [0, 0], sizes = [2, 48], strides = [1, 1]} : vector<2x64xf32> to vector<2x48xf32>
    %833 = arith.negf %832 : vector<2x48xf32>
    %834 = math.exp %833 : vector<2x48xf32>
    %cst_274 = arith.constant 1.000000e+00 : f32
    %835 = vector.broadcast %cst_274 : f32 to vector<2x48xf32>
    %836 = arith.addf %835, %834 : vector<2x48xf32>
    %837 = arith.divf %835, %836 : vector<2x48xf32>
    %838 = vector.extract_strided_slice %831 {offsets = [0, 48], sizes = [2, 16], strides = [1, 1]} : vector<2x64xf32> to vector<2x16xf32>
    %839 = math.tanh %838 : vector<2x16xf32>
    %840 = vector.extract_strided_slice %837 {offsets = [0, 0], sizes = [2, 16], strides = [1, 1]} : vector<2x48xf32> to vector<2x16xf32>
    %841 = vector.extract_strided_slice %837 {offsets = [0, 16], sizes = [2, 16], strides = [1, 1]} : vector<2x48xf32> to vector<2x16xf32>
    %842 = vector.extract_strided_slice %837 {offsets = [0, 32], sizes = [2, 16], strides = [1, 1]} : vector<2x48xf32> to vector<2x16xf32>
    %843 = arith.mulf %841, %803 : vector<2x16xf32>
    %844 = arith.mulf %840, %839 : vector<2x16xf32>
    %845 = arith.addf %843, %844 : vector<2x16xf32>
    %846 = math.tanh %845 : vector<2x16xf32>
    %847 = arith.mulf %842, %846 : vector<2x16xf32>
    %848 = tpu.concatenate %827, %847 in 1 : vector<2x16xf32>, vector<2x16xf32> -> vector<2x32xf32>
    %849 = arith.truncf %848 : vector<2x32xf32> to vector<2x32xbf16>
    %c0_275 = arith.constant 0 : index
    %c0_276 = arith.constant 0 : index
    %850 = vector.load %arg20[%c0_275, %c0_276] : memref<32x2xbf16, #tpu.memory_space<vmem>>, vector<32x2xbf16>
    %cst_277 = arith.constant dense<0.000000e+00> : vector<2x2xf32>
    %851 = tpu.matmul %849, %850, %cst_277 {dimension_numbers = #tpu.dot_dimension_numbers<[1], [0], [0], [1], [0, 0, 1, 1], [], []>} : vector<2x32xbf16>, vector<32x2xbf16>, vector<2x2xf32> -> vector<2x2xf32>
    %c0_278 = arith.constant 0 : index
    %c0_279 = arith.constant 0 : index
    %852 = vector.load %arg21[%c0_278, %c0_279] : memref<1x2xf32, #tpu.memory_space<vmem>>, vector<1x2xf32>
    %853 = vector.broadcast %852 : vector<1x2xf32> to vector<2x2xf32>
    %854 = arith.addf %851, %853 : vector<2x2xf32>
    %c0_280 = arith.constant 0 : index
    %c0_281 = arith.constant 0 : index
    %855 = vector.load %arg22[%c0_280, %c0_281] : memref<2x2xf32, #tpu.memory_space<vmem>>, vector<2x2xf32>
    tpu.vector_store %arg22[%c0_280, %c0_281], %854 {strides = array<i32>} : memref<2x2xf32, #tpu.memory_space<vmem>>, vector<2x2xf32>,
    return
  }
}

</mosaic_0001>

<bundles_post_ra>
// kernel: bert_lstm_forward.1
= control target key start
LH: loop header
LB: loop body
LE: loop exit
PB: predicated region body
PF: predicated region fallthrough
CT: control target
= control target key end

     0   :  { %s6156_s0 = inlined_call_operand.vmem [shape: f32[16,32], index: 0, kind: input, shape index: {}]   ;;  %s6157_s1 = inlined_call_operand.vmem [shape: f32[2,8], index: 1, kind: input, shape index: {}]   ;;  %s6158_s2 = inlined_call_operand.vmem [shape: f32[1,32], index: 2, kind: input, shape index: {}]   ;;  %s6159_s3 = inlined_call_operand.vmem [shape: f32[1,32], index: 3, kind: input, shape index: {}]   ;;  %s6160_s4 = inlined_call_operand.vmem [shape: bf16[2,32,96], index: 4, kind: input, shape index: {}]   ;;  %s6161_s5 = inlined_call_operand.vmem [shape: f32[2,1,96], index: 5, kind: input, shape index: {}]   ;;  %s6162_s6 = inlined_call_operand.vmem [shape: bf16[2,32,32], index: 6, kind: input, shape index: {}]   ;;  %s6163_s7 = inlined_call_operand.vmem [shape: f32[2,1,32], index: 7, kind: input, shape index: {}]   ;;  %s6164_s8 = inlined_call_operand.vmem [shape: f32[2,1,32], index: 8, kind: input, shape index: {}]   ;;  %s6165_s9 = inlined_call_operand.vmem [shape: f32[2,1,32], index: 9, kind: input, shape index: {}]   ;;  %s6166_s10 = inlined_call_operand.vmem [shape: bf16[2,32,64], index: 10, kind: input, shape index: {}]   ;;  %s6167_s11 = inlined_call_operand.vmem [shape: f32[2,1,64], index: 11, kind: input, shape index: {}]   ;;  %s6168_s12 = inlined_call_operand.vmem [shape: bf16[2,64,32], index: 12, kind: input, shape index: {}]   ;;  %s6169_s13 = inlined_call_operand.vmem [shape: f32[2,1,32], index: 13, kind: input, shape index: {}]   ;;  %s6170_s14 = inlined_call_operand.vmem [shape: f32[2,1,32], index: 14, kind: input, shape index: {}]   ;;  %s6171_s15 = inlined_call_operand.vmem [shape: f32[2,1,32], index: 15, kind: input, shape index: {}]   ;;  %s6172_s16 = inlined_call_operand.vmem [shape: bf16[32,128], index: 16, kind: input, shape index: {}]   ;;  %s6173_s17 = inlined_call_operand.vmem [shape: f32[1,128], index: 17, kind: input, shape index: {}]   ;;  %s6174_s18 = inlined_call_operand.vmem [shape: bf16[16,64], index: 18, kind: input, shape index: {}]   ;;  %s6175_s19 = inlined_call_operand.vmem [shape: bf16[16,64], index: 19, kind: input, shape index: {}]   ;;  %s6176_s20 = inlined_call_operand.vmem [shape: bf16[32,2], index: 20, kind: input, shape index: {}]   ;;  %s6177_s21 = inlined_call_operand.vmem [shape: f32[1,2], index: 21, kind: input, shape index: {}]   ;;  %s6178_s22 = inlined_call_operand.hbm [shape: f32[2,2], index: 22, kind: output, shape index: {}]  }
   0x1   :  { %6201 = sst [smem:[#allocation7_spill]] %s6156_s0 }
   0x2   :  { %6202 = sst [smem:[#allocation8_spill]] %s6157_s1 }
   0x3   :  { %6203 = sst [smem:[#allocation9_spill]] %s6158_s2 }
   0x4   :  { %6204 = sst [smem:[#allocation10_spill]] %s6159_s3 }
   0x5   :  { %6205 = sst [smem:[#allocation11_spill]] %s6160_s4 }
   0x6   :  { %6206 = sst [smem:[#allocation12_spill]] %s6161_s5 }
   0x7   :  { %6207 = sst [smem:[#allocation13_spill]] %s6162_s6 }
   0x8   :  { %s6208_s29 = sld [smem:[#allocation7_spill]]  ;;  %vm77_vm0 = vcmask 261120  }
   0xe   :  { %v73_v0 = vld [vmem:[%s6208_s29] sm:$0xff]  ;;  %v74_v1 = vld [vmem:[%s6208_s29 + $0x8] sm:$0xff] }
   0xf   :  { %v78_v2 = vsel %vm77_vm0, %v73_v0, 0.0  ;;  %v81_v3 = vsel %vm77_vm0, %v74_v1, 0.0 }
  0x10   :  { %79 = vadd.xlane.f32.xlu0 %v78_v2 }
  0x14   :  { %82 = vadd.xlane.f32.xlu0 %v81_v3 }
  0x15   :  { %27 = vsyncpa [#allocation5], 0  ;;  %s6209_s1 = sld [smem:[#allocation11_spill]]  ;;  %v5114_v15 = vmov 0.0   ;;  %vm5115_vm1 = vmmov 0   ;;  %s6210_s26 = sld [smem:[#allocation9_spill]] }
  0x16   :  { %4449 = vmatprep.subr.bf16.mxu0 %v5114_v15  ;;  %4453 = vmatprep.mubr.msk.bf16.mxu0 %vm5115_vm1, %v5114_v15  ;;  %s6211_s3 = sld [smem:[#allocation10_spill]]  ;;  %s6212_s30 = sld [smem:[#allocation12_spill]]  ;;  %vm196_vm2 = vcmask 64512   ;;  %vm711_vm3 = vcmask 1043456   ;;  %vm809_vm4 = vcmask 130112   ;;  %vm864_vm5 = vcmask 195712  }
  0x17   :  { %4457 = vmatprep.subr.bf16.mxu1 %v5114_v15  ;;  %4459 = vmatprep.mubr.msk.bf16.mxu1 %vm5115_vm1, %v5114_v15  ;;  %s5116_s4 = smov 88   ;;  %s5117_s0 = smov 96   ;;  %vm919_vm6 = vcmask 261312   ;;  %vm1375_vm7 = vcmask 523264   ;;  %vm2889_vm8 = vcmask 130048   ;;  %vm4157_vm9 = vcmask 9216  }
  0x18   :  { %s5118_s23 = smov 80   ;;  %s5119_s5 = smov 72  }
  0x19   :  { %s5120_s24 = smov 120   ;;  %s6193_s6 = smov 112  }
  0x1a   :  { %s6191_s25 = smov 104   ;;  %s6213_s27 = sld [smem:[#allocation8_spill]] }
  0x1b   :  { %v4844_v14 = vld [vmem:[%s6209_s1] sm:$0xff]   ;;  %v4845_v16 = vld [vmem:[%s6209_s1 + $0x8] sm:$0xff]   ;;  %s6187_s28 = smov 48   ;;  %s6185_s29 = smov 64  }
  0x1c   :  { %4450 = vmatpush3.bf16.msra.mxu0 %v4844_v14  ;;  %v4173_v25 = vld [vmem:[%s6210_s26] ss:$0 sm:$0xff]  ;;  %s6183_s26 = smov 40   ;;  %s6199_s2 = smov 8  }
  0x1d   :  { %4451 = vmatprep.subr.bf16.mxu0 %v5114_v15  ;;  %v4174_v29 = vld [vmem:[%s6211_s3] ss:$0 sm:$0xff]  ;;  %s6189_s3 = smov 56  }
  0x1e   :  { %v4175_v34 = vld [vmem:[%s6212_s30] ss:$0 sm:$0xff] }
  0x20   :  { %4452 = vmatpush3.bf16.msra.mxu0 %v4845_v16  ;;  %v121_v2 = vld [vmem:[%s6213_s27] sm:$0x3]  ;;  %s6197_s27 = smov 16  }
  0x21   :  { %4463 = vmatprep.subr.bf16.mxu0 %v5114_v15  ;;  %v122_v3 = vsub.f32 1.0, %v121_v2 }
  0x9d   :  { %v80_v4 = vpop.xlane.xlu0 %79 }
  0x9e   :  { %v85_v5 = vmul.f32 0.03125, %v80_v4 }
  0xa0   :  { %v87_v6 = vsub.f32 %v73_v0, %v85_v5  ;;  %v123_v5 = vmul.f32 -1e+09, %v122_v3 }
  0xa1   :  { %v83_v7 = vpop.xlane.xlu0 %82 }
  0xa2   :  { %v86_v8 = vmul.f32 0.03125, %v83_v7  ;;  %v89_v9 = vmul.f32 %v87_v6, %v87_v6 }
  0xa4   :  { %v88_v10 = vsub.f32 %v74_v1, %v86_v8  ;;  %v91_v11 = vsel %vm77_vm0, %v89_v9, 0.0  ;;  %v244_v1 = vlaneseq }
  0xa5   :  { %92 = vadd.xlane.f32.xlu1 %v91_v11 }
  0xa6   :  { %v90_v12 = vmul.f32 %v88_v10, %v88_v10  ;;  %v245_v4 = vshrl.u32 %v244_v1, 7 }
  0xa8   :  { %v94_v13 = vsel %vm77_vm0, %v90_v12, 0.0 }
  0xa9   :  { %95 = vadd.xlane.f32.xlu1 %v94_v13 }
 0x132   :  { %v93_v17 = vpop.xlane.xlu1 %92 }
 0x133   :  { %v97_v18 = vmul.f32 0.03125, %v93_v17 }
 0x135   :  { %v99_v19 = vadd.f32 1e-12, %v97_v18 }
 0x136   :  { %v96_v20 = vpop.xlane.xlu1 %95 }
 0x137   :  { %4870 = vrsqrt.f32 %v99_v19  ;;  %v98_v21 = vmul.f32 0.03125, %v96_v20 }
 0x139   :  { %v100_v22 = vadd.f32 1e-12, %v98_v21 }
 0x13b   :  { %4872 = vrsqrt.f32 %v100_v22 }
 0x141   :  { %v4871_v23 = vpop.eup %4870 }
 0x142   :  { %v103_v24 = vmul.f32 %v4871_v23, %v87_v6  ;;  %v246_v6 = vsub.s32 0, %v245_v4 }
 0x144   :  { %v111_v28 = vmul.f32 %v4173_v25, %v103_v24  ;;  %v5367_v7 = vrot.slane %v123_v5, %v246_v6 }
 0x145   :  { %v4873_v26 = vpop.eup %4872 }
 0x146   :  { %v104_v27 = vmul.f32 %v4873_v26, %v88_v10  ;;  %v5278_v31 = vadd.f32 %v4174_v29, %v111_v28 }
 0x148   :  { %v112_v30 = vmul.f32 %v4173_v25, %v104_v27 }
 0x14a   :  { %v5280_v32 = vadd.f32 %v4174_v29, %v112_v30 }
 0x14c   :  { %v128_v33 = vpack.c.bf16 %v5280_v32, %v5278_v31 }
 0x14e   :  { %4454 = vmatmul.mubr.msk.bf16.vlgmr.msra.gmra.mrb[0].mxu0 %vm77_vm0, %v128_v33 }
 0x14f   :  { %4465 = vmatprep.mubr.msk.bf16.mxu0 %vm5115_vm1, %v5114_v15 }
 0x221   :  { %v185_v35 = vpop.f32.mrb[0].mxu0 }
 0x222   :  { %v186_v36 = vadd.f32 %v4175_v34, %v185_v35  ;;  %v4455_v37 = vpop.f32.mrb[1].mxu0 }
 0x223   :  { %v188_v38 = vpop.f32.mrb[2].mxu0 }
 0x224   :  { %v5290_v39 = vpack.c.bf16 %v186_v36, %v186_v36  ;;  %v4456_v40 = vpop.f32.mrb[3].mxu0  ;;  %v189_v41 = vadd.f32 %v4175_v34, %v188_v38  ;;  %v458_v36 = vsub.s32 1, %v245_v4 }
 0x226   :  { %251 = vrot.lane.b32.xlu1 %v5290_v39, %s5116_s4  ;;  %194 = vrot.lane.b32.xlu0 %v5290_v39, %s5117_s0  ;;  %v5300_v42 = vpack.c.bf16 %v189_v41, %v189_v41  ;;  %v5384_v40 = vrot.slane %v123_v5, %v458_v36 }
 0x22a   :  { %303 = vrot.lane.b32.xlu1 %v5290_v39, %s5118_s23  ;;  %355 = vrot.lane.b32.xlu0 %v5290_v39, %s5119_s5 }
 0x22e   :  { %249 = vrot.lane.b32.xlu1 %v5290_v39, %s5120_s24  ;;  %407 = vrot.lane.b32.xlu0 %v5300_v42, %s5117_s0 }
 0x232   :  { %301 = vrot.lane.b32.xlu1 %v5290_v39, %s6193_s6  ;;  %463 = vrot.lane.b32.xlu0 %v5300_v42, %s5116_s4 }
 0x236   :  { %353 = vrot.lane.b32.xlu1 %v5290_v39, %s6191_s25  ;;  %461 = vrot.lane.b32.xlu0 %v5300_v42, %s5120_s24 }
 0x23a   :  { %515 = vrot.lane.b32.xlu1 %v5300_v42, %s5118_s23  ;;  %513 = vrot.lane.b32.xlu0 %v5300_v42, %s6193_s6 }
 0x23e   :  { %567 = vrot.lane.b32.xlu1 %v5300_v42, %s5119_s5 }
 0x242   :  { %565 = vrot.lane.b32.xlu1 %v5300_v42, %s6191_s25 }
 0x298   :  { %v252_v43 = vpop.permute.xlu1 %251  ;;  %v195_v44 = vpop.permute.xlu0 %194 }
 0x299   :  { %v257_v45 = vsel %vm196_vm2, %v252_v43, 0  ;;  %v201_v46 = vsel %vm196_vm2, %v195_v44, 0 }
 0x29a   :  { %4458 = vmatpush3.bf16.xpose.msra.mxu1 %v201_v46  ;;  %4464 = vmatpush3.bf16.xpose.msra.mxu0 %v257_v45 }
 0x29b   :  { %4469 = vmatprep.subr.bf16.mxu1 %v5114_v15  ;;  %4475 = vmatprep.subr.bf16.mxu0 %v5114_v15 }
 0x29c   :  { %v304_v47 = vpop.permute.xlu1 %303  ;;  %v356_v48 = vpop.permute.xlu0 %355 }
 0x29d   :  { %v309_v51 = vsel %vm196_vm2, %v304_v47, 0  ;;  %v361_v52 = vsel %vm196_vm2, %v356_v48, 0 }
 0x2a0   :  { %v250_v49 = vpop.permute.xlu1 %249  ;;  %v408_v50 = vpop.permute.xlu0 %407 }
 0x2a1   :  { %4460 = vmatmul.mubr.msk.bf16.vlgmr.msra.gmra.mrb[0].mxu1 %vm196_vm2, %v5290_v39  ;;  %4466 = vmatmul.mubr.msk.bf16.vlgmr.msra.gmra.mrb[4].mxu0 %vm196_vm2, %v250_v49  ;;  %v413_v56 = vsel %vm196_vm2, %v408_v50, 0 }
 0x2a2   :  { %4470 = vmatpush3.bf16.xpose.msra.mxu1 %v309_v51  ;;  %4476 = vmatpush3.bf16.xpose.msra.mxu0 %v361_v52 }
 0x2a3   :  { %4477 = vmatprep.mubr.msk.bf16.mxu0 %vm5115_vm1, %v5114_v15  ;;  %4471 = vmatprep.mubr.msk.bf16.mxu1 %vm5115_vm1, %v5114_v15 }
 0x2a4   :  { %v302_v53 = vpop.permute.xlu1 %301  ;;  %4481 = vmatprep.subr.bf16.mxu1 %v5114_v15  ;;  %4487 = vmatprep.subr.bf16.mxu0 %v5114_v15  ;;  %v464_v54 = vpop.permute.xlu0 %463 }
 0x2a5   :  { %v469_v57 = vsel %vm196_vm2, %v464_v54, 0 }
 0x2a8   :  { %v354_v55 = vpop.permute.xlu1 %353  ;;  %v462_v59 = vpop.permute.xlu0 %461 }
 0x2a9   :  { %4472 = vmatmul.mubr.msk.bf16.vlgmr.msra.gmra.mrb[4].mxu1 %vm196_vm2, %v302_v53  ;;  %4478 = vmatmul.mubr.msk.bf16.vlgmr.msra.gmra.mrb[8].mxu0 %vm196_vm2, %v354_v55 }
 0x2aa   :  { %4482 = vmatpush3.bf16.xpose.msra.mxu1 %v413_v56  ;;  %4488 = vmatpush3.bf16.xpose.msra.mxu0 %v469_v57 }
 0x2ab   :  { %4483 = vmatprep.mubr.msk.bf16.mxu1 %vm5115_vm1, %v5114_v15  ;;  %4489 = vmatprep.mubr.msk.bf16.mxu0 %vm5115_vm1, %v5114_v15 }
 0x2ac   :  { %v516_v58 = vpop.permute.xlu1 %515  ;;  %4493 = vmatprep.subr.bf16.mxu1 %v5114_v15  ;;  %4499 = vmatprep.subr.bf16.mxu0 %v5114_v15  ;;  %v514_v63 = vpop.permute.xlu0 %513 }
 0x2ad   :  { %v521_v61 = vsel %vm196_vm2, %v516_v58, 0 }
 0x2b0   :  { %v568_v60 = vpop.permute.xlu1 %567 }
 0x2b1   :  { %v573_v62 = vsel %vm196_vm2, %v568_v60, 0  ;;  %4484 = vmatmul.mubr.msk.bf16.vlgmr.msra.gmra.mrb[8].mxu1 %vm196_vm2, %v5300_v42  ;;  %4490 = vmatmul.mubr.msk.bf16.vlgmr.msra.gmra.mrb[12].mxu0 %vm196_vm2, %v462_v59 }
 0x2b2   :  { %4494 = vmatpush3.bf16.xpose.msra.mxu1 %v521_v61  ;;  %4500 = vmatpush3.bf16.xpose.msra.mxu0 %v573_v62 }
 0x2b3   :  { %4495 = vmatprep.mubr.msk.bf16.mxu1 %vm5115_vm1, %v5114_v15  ;;  %4501 = vmatprep.mubr.msk.bf16.mxu0 %vm5115_vm1, %v5114_v15 }
 0x2b4   :  { %4511 = vmatprep.subr.bf16.mxu0 %v5114_v15  ;;  %4505 = vmatprep.subr.bf16.mxu1 %v5114_v15  ;;  %v566_v0 = vpop.permute.xlu1 %565 }
 0x2b9   :  { %4496 = vmatmul.mubr.msk.bf16.vlgmr.msra.gmra.mrb[12].mxu1 %vm196_vm2, %v514_v63  ;;  %4502 = vmatmul.mubr.msk.bf16.vlgmr.msra.gmra.mrb[16].mxu0 %vm196_vm2, %v566_v0 }
 0x2ba   :  { %4507 = vmatprep.mubr.msk.bf16.mxu1 %vm5115_vm1, %v5114_v15  ;;  %4513 = vmatprep.mubr.msk.bf16.mxu0 %vm5115_vm1, %v5114_v15 }
 0x374   :  { %v237_v8 = vpop.f32.mrb[0].mxu1  ;;  %v293_v9 = vpop.f32.mrb[4].mxu0 }
 0x375   :  { %v243_v10 = vmul.f32 0.35355338, %v237_v8  ;;  %v299_v11 = vmul.f32 0.35355338, %v293_v9  ;;  %v4461_v12 = vpop.f32.mrb[1].mxu1  ;;  %v4467_v13 = vpop.f32.mrb[5].mxu0 }
 0x376   :  { %v240_v14 = vpop.f32.mrb[2].mxu1  ;;  %v296_v16 = vpop.f32.mrb[6].mxu0 }
 0x377   :  { %v4462_v17 = vpop.f32.mrb[3].mxu1  ;;  %v4468_v18 = vpop.f32.mrb[7].mxu0  ;;  %v5370_v19 = vadd.f32 %v5367_v7, %v243_v10  ;;  %v5373_v20 = vadd.f32 %v299_v11, %v5367_v7 }
 0x379   :  { %v617_v21 = vsel %vm196_vm2, %v5370_v19, -inf  ;;  %v620_v22 = vsel %vm196_vm2, %v5373_v20, -inf }
 0x37a   :  { %618 = vmax.xlane.f32.xlu0 %v617_v21  ;;  %621 = vmax.xlane.f32.xlu1 %v620_v22 }
 0x37c   :  { %v345_v23 = vpop.f32.mrb[4].mxu1  ;;  %v397_v24 = vpop.f32.mrb[8].mxu0 }
 0x37d   :  { %v351_v25 = vmul.f32 0.35355338, %v345_v23  ;;  %v403_v26 = vmul.f32 0.35355338, %v397_v24  ;;  %v4473_v27 = vpop.f32.mrb[5].mxu1  ;;  %v4479_v28 = vpop.f32.mrb[9].mxu0 }
 0x37e   :  { %v348_v29 = vpop.f32.mrb[6].mxu1  ;;  %v400_v30 = vpop.f32.mrb[10].mxu0 }
 0x37f   :  { %v4474_v33 = vpop.f32.mrb[7].mxu1  ;;  %v4480_v34 = vpop.f32.mrb[11].mxu0  ;;  %v352_v35 = vadd.f32 %v351_v25, %v5367_v7  ;;  %v5381_v37 = vadd.f32 %v403_v26, %v5367_v7 }
 0x381   :  { %v623_v38 = vsel %vm196_vm2, %v352_v35, -inf  ;;  %v626_v44 = vsel %vm196_vm2, %v5381_v37, -inf }
 0x382   :  { %624 = vmax.xlane.f32.xlu0 %v623_v38 }
 0x384   :  { %v449_v41 = vpop.f32.mrb[8].mxu1  ;;  %v505_v43 = vpop.f32.mrb[12].mxu0 }
 0x385   :  { %v455_v45 = vmul.f32 0.35355338, %v449_v41  ;;  %v511_v46 = vmul.f32 0.35355338, %v505_v43  ;;  %v4485_v47 = vpop.f32.mrb[9].mxu1  ;;  %v4491_v48 = vpop.f32.mrb[13].mxu0 }
 0x386   :  { %v452_v49 = vpop.f32.mrb[10].mxu1  ;;  %627 = vmax.xlane.f32.xlu0 %v626_v44  ;;  %v508_v50 = vpop.f32.mrb[14].mxu0 }
 0x387   :  { %v4486_v51 = vpop.f32.mrb[11].mxu1  ;;  %v4492_v52 = vpop.f32.mrb[15].mxu0  ;;  %v5389_v53 = vadd.f32 %v5384_v40, %v455_v45  ;;  %v5392_v54 = vadd.f32 %v511_v46, %v5384_v40 }
 0x389   :  { %v629_v55 = vsel %vm196_vm2, %v5389_v53, -inf  ;;  %v632_v56 = vsel %vm196_vm2, %v5392_v54, -inf }
 0x38a   :  { %630 = vmax.xlane.f32.xlu0 %v629_v55  ;;  %633 = vmax.xlane.f32.xlu1 %v632_v56 }
 0x38c   :  { %v557_v57 = vpop.f32.mrb[12].mxu1  ;;  %v609_v58 = vpop.f32.mrb[16].mxu0 }
 0x38d   :  { %v563_v59 = vmul.f32 0.35355338, %v557_v57  ;;  %v4497_v60 = vpop.f32.mrb[13].mxu1  ;;  %v4503_v61 = vpop.f32.mrb[17].mxu0  ;;  %v615_v4 = vmul.f32 0.35355338, %v609_v58 }
 0x38e   :  { %v560_v62 = vpop.f32.mrb[14].mxu1  ;;  %v612_v63 = vpop.f32.mrb[18].mxu0 }
 0x38f   :  { %v4498_v0 = vpop.f32.mrb[15].mxu1  ;;  %v4504_v1 = vpop.f32.mrb[19].mxu0  ;;  %v564_v2 = vadd.f32 %v563_v59, %v5384_v40  ;;  %v5407_v5 = vadd.f32 %v615_v4, %v5384_v40 }
 0x391   :  { %v635_v3 = vsel %vm196_vm2, %v564_v2, -inf  ;;  %v638_v6 = vsel %vm196_vm2, %v5407_v5, -inf }
 0x392   :  { %636 = vmax.xlane.f32.xlu0 %v635_v3 }
 0x39b   :  { %757 = vrot.lane.b32.xlu1 %v5290_v39, %s6189_s3 }
 0x39f   :  { %812 = vrot.lane.b32.xlu1 %v5290_v39, %s6187_s28 }
 0x3a8   :  { %706 = vrot.lane.b32.xlu0 %v5290_v39, %s6185_s29 }
 0x3c3   :  { %639 = vmax.xlane.f32.xlu1 %v638_v6 }
 0x3d4   :  { %867 = vrot.lane.b32.xlu1 %v5290_v39, %s6183_s26 }
 0x407   :  { %v619_v8 = vpop.xlane.xlu0 %618  ;;  %v622_v9 = vpop.xlane.xlu1 %621 }
 0x408   :  { %v641_v10 = vsub.f32 %v5370_v19, %v619_v8  ;;  %v642_v11 = vsub.f32 %v5373_v20, %v622_v9 }
 0x40a   :  { %v649_v12 = vmul.f32 1.442695, %v641_v10  ;;  %v651_v13 = vmul.f32 1.442695, %v642_v11 }
 0x40c   :  { %4874 = vpow2.f32 %v649_v12 }
 0x40d   :  { %4876 = vpow2.f32 %v651_v13 }
 0x40f   :  { %v625_v14 = vpop.xlane.xlu0 %624 }
 0x410   :  { %v643_v16 = vsub.f32 %v352_v35, %v625_v14 }
 0x412   :  { %v653_v17 = vmul.f32 1.442695, %v643_v16 }
 0x413   :  { %v628_v18 = vpop.xlane.xlu0 %627 }
 0x414   :  { %4878 = vpow2.f32 %v653_v17  ;;  %v644_v33 = vsub.f32 %v5381_v37, %v628_v18 }
 0x416   :  { %v5415_v21 = vpop.eup %4874  ;;  %v655_v34 = vmul.f32 1.442695, %v644_v33 }
 0x417   :  { %v5417_v22 = vpop.eup %4876  ;;  %v634_v39 = vpop.xlane.xlu1 %633  ;;  %v665_v23 = vsel %vm196_vm2, %v5415_v21, 0.0 }
 0x418   :  { %666 = vadd.xlane.f32.xlu0 %v665_v23  ;;  %v668_v19 = vsel %vm196_vm2, %v5417_v22, 0.0  ;;  %v631_v20 = vpop.xlane.xlu0 %630  ;;  %v646_v35 = vsub.f32 %v5392_v54, %v634_v39  ;;  %4880 = vpow2.f32 %v655_v34 }
 0x419   :  { %669 = vadd.xlane.f32.xlu1 %v668_v19  ;;  %v645_v36 = vsub.f32 %v5389_v53, %v631_v20 }
 0x41a   :  { %v659_v38 = vmul.f32 1.442695, %v646_v35 }
 0x41b   :  { %v758_v24 = vpop.permute.xlu1 %757  ;;  %v657_v41 = vmul.f32 1.442695, %v645_v36 }
 0x41c   :  { %v763_v25 = vsel %vm711_vm3, %v758_v24, 0  ;;  %4882 = vpow2.f32 %v659_v38 }
 0x41d   :  { %4512 = vmatpush3.bf16.msra.mxu0 %v763_v25  ;;  %4884 = vpow2.f32 %v657_v41 }
 0x41e   :  { %v5424_v26 = vpop.eup %4878  ;;  %4523 = vmatprep.subr.bf16.mxu0 %v5114_v15 }
 0x41f   :  { %v637_v27 = vpop.xlane.xlu0 %636  ;;  %v671_v28 = vsel %vm196_vm2, %v5424_v26, 0.0  ;;  %v813_v46 = vpop.permute.xlu1 %812 }
 0x420   :  { %672 = vadd.xlane.f32.xlu0 %v671_v28  ;;  %v647_v43 = vsub.f32 %v564_v2, %v637_v27  ;;  %v818_v4 = vsel %vm711_vm3, %v813_v46, 0 }
 0x422   :  { %v661_v44 = vmul.f32 1.442695, %v647_v43  ;;  %v5438_v45 = vpop.eup %4880 }
 0x423   :  { %v707_v29 = vpop.permute.xlu0 %706  ;;  %v674_v47 = vsel %vm196_vm2, %v5438_v45, 0.0 }
 0x424   :  { %v713_v30 = vsel %vm711_vm3, %v707_v29, 0  ;;  %4886 = vpow2.f32 %v661_v44 }
 0x425   :  { %4506 = vmatpush3.bf16.msra.mxu1 %v713_v30 }
 0x426   :  { %4517 = vmatprep.subr.bf16.mxu1 %v5114_v15  ;;  %v5442_v37 = vpop.eup %4882 }
 0x427   :  { %v5444_v49 = vpop.eup %4884  ;;  %v680_v51 = vsel %vm196_vm2, %v5442_v37, 0.0 }
 0x428   :  { %v677_v53 = vsel %vm196_vm2, %v5444_v49, 0.0 }
 0x42a   :  { %972 = vrot.lane.b32.xlu1 %v5300_v42, %s6189_s3  ;;  %s6214_s3 = sld [smem:[#allocation13_spill]] }
 0x42e   :  { %v5451_v54 = vpop.eup %4886 }
 0x42f   :  { %v683_v55 = vsel %vm196_vm2, %v5451_v54, 0.0 }
 0x436   :  { %922 = vrot.lane.b32.xlu0 %v5300_v42, %s6185_s29 }
 0x44e   :  { %675 = vadd.xlane.f32.xlu1 %v674_v47 }
 0x450   :  { %v640_v48 = vpop.xlane.xlu1 %639 }
 0x451   :  { %v648_v50 = vsub.f32 %v5407_v5, %v640_v48 }
 0x452   :  { %681 = vadd.xlane.f32.xlu1 %v680_v51 }
 0x453   :  { %v663_v52 = vmul.f32 1.442695, %v648_v50 }
 0x454   :  { %v868_v58 = vpop.permute.xlu1 %867 }
 0x455   :  { %4888 = vpow2.f32 %v663_v52  ;;  %678 = vadd.xlane.f32.xlu0 %v677_v53 }
 0x459   :  { %684 = vadd.xlane.f32.xlu0 %v683_v55 }
 0x45f   :  { %v5455_v56 = vpop.eup %4888 }
 0x460   :  { %v686_v57 = vsel %vm196_vm2, %v5455_v56, 0.0 }
 0x461   :  { %687 = vadd.xlane.f32.xlu1 %v686_v57 }
 0x46f   :  { %1026 = vrot.lane.b32.xlu0 %v5300_v42, %s6187_s28  ;;  %s6221_s28 = smov 8  }
 0x472   :  { %1080 = vrot.lane.b32.xlu1 %v5300_v42, %s6183_s26  ;;  %v873_v42 = vsel %vm711_vm3, %v868_v58, 0  ;;  %s6195_s26 = smov 24  }
 0x4a5   :  { %v667_v59 = vpop.xlane.xlu0 %666 }
 0x4a6   :  { %4890 = vrcp.f32 %v667_v59  ;;  %v670_v60 = vpop.xlane.xlu1 %669  ;;  %v4846_v59 = vld [vmem:[%s6214_s3] sm:$0xff]  }
 0x4a7   :  { %4892 = vrcp.f32 %v670_v60 }
 0x4aa   :  { %v973_v11 = vpop.permute.xlu1 %972 }
 0x4ab   :  { %v978_v39 = vsel %vm711_vm3, %v973_v11, 0 }
 0x4ad   :  { %v673_v61 = vpop.xlane.xlu0 %672 }
 0x4ae   :  { %4894 = vrcp.f32 %v673_v61 }
 0x4b0   :  { %v4891_v62 = vpop.eup %4890 }
 0x4b1   :  { %v4893_v63 = vpop.eup %4892  ;;  %v697_v0 = vmul.f32 %v4891_v62, %v5415_v21  ;;  %v923_v8 = vpop.permute.xlu0 %922 }
 0x4b2   :  { %v698_v1 = vmul.f32 %v4893_v63, %v5417_v22  ;;  %v928_v10 = vsel %vm711_vm3, %v923_v8, 0 }
 0x4b3   :  { %v705_v2 = vpack.c.bf16 %v697_v0, %v697_v0  ;;  %v4847_v0 = vld [vmem:[%s6214_s3 + $0x8] sm:$0xff]  }
 0x4b4   :  { %v756_v3 = vpack.c.bf16 %v698_v1, %v698_v1 }
 0x4b5   :  { %4508 = vmatmul.mubr.msk.bf16.vlgmr.msra.gmra.mrb[16].mxu1 %vm196_vm2, %v705_v2 }
 0x4b6   :  { %4514 = vmatmul.mubr.msk.bf16.vlgmr.msra.gmra.mrb[20].mxu0 %vm196_vm2, %v756_v3  ;;  %4518 = vmatpush3.bf16.msra.mxu1 %v818_v4 }
 0x4b7   :  { %4524 = vmatpush3.bf16.msra.mxu0 %v873_v42  ;;  %4519 = vmatprep.mubr.msk.bf16.mxu1 %vm5115_vm1, %v5114_v15 }
 0x4b8   :  { %v4895_v5 = vpop.eup %4894  ;;  %4529 = vmatprep.subr.bf16.mxu1 %v5114_v15  ;;  %4525 = vmatprep.mubr.msk.bf16.mxu0 %vm5115_vm1, %v5114_v15 }
 0x4b9   :  { %v699_v6 = vmul.f32 %v4895_v5, %v5424_v26  ;;  %4535 = vmatprep.subr.bf16.mxu0 %v5114_v15 }
 0x4bb   :  { %v811_v9 = vpack.c.bf16 %v699_v6, %v699_v6 }
 0x4bd   :  { %4520 = vmatmul.mubr.msk.bf16.vlgmr.msra.gmra.mrb[20].mxu1 %vm196_vm2, %v811_v9 }
 0x4be   :  { %4530 = vmatpush3.bf16.msra.mxu1 %v928_v10  ;;  %4531 = vmatprep.mubr.msk.bf16.mxu1 %vm5115_vm1, %v5114_v15 }
 0x4bf   :  { %4541 = vmatprep.subr.bf16.mxu1 %v5114_v15 }
 0x4db   :  { %v676_v12 = vpop.xlane.xlu1 %675 }
 0x4dc   :  { %4896 = vrcp.f32 %v676_v12 }
 0x4df   :  { %v682_v13 = vpop.xlane.xlu1 %681 }
 0x4e0   :  { %4898 = vrcp.f32 %v682_v13 }
 0x4e2   :  { %v679_v14 = vpop.xlane.xlu0 %678 }
 0x4e3   :  { %4900 = vrcp.f32 %v679_v14 }
 0x4e6   :  { %v4897_v16 = vpop.eup %4896  ;;  %v685_v17 = vpop.xlane.xlu0 %684 }
 0x4e7   :  { %4902 = vrcp.f32 %v685_v17  ;;  %v700_v18 = vmul.f32 %v4897_v16, %v5438_v45 }
 0x4e9   :  { %v866_v21 = vpack.c.bf16 %v700_v18, %v700_v18 }
 0x4ea   :  { %v4899_v22 = vpop.eup %4898  ;;  %v1027_v25 = vpop.permute.xlu0 %1026 }
 0x4eb   :  { %4526 = vmatmul.mubr.msk.bf16.vlgmr.msra.gmra.mrb[24].mxu0 %vm196_vm2, %v866_v21  ;;  %v702_v19 = vmul.f32 %v4899_v22, %v5442_v37  ;;  %v1032_v29 = vsel %vm711_vm3, %v1027_v25, 0 }
 0x4ec   :  { %4536 = vmatpush3.bf16.msra.mxu0 %v978_v39  ;;  %4537 = vmatprep.mubr.msk.bf16.mxu0 %vm5115_vm1, %v5114_v15 }
 0x4ed   :  { %v4901_v23 = vpop.eup %4900  ;;  %4547 = vmatprep.subr.bf16.mxu0 %v5114_v15  ;;  %v971_v28 = vpack.c.bf16 %v702_v19, %v702_v19 }
 0x4ee   :  { %v688_v20 = vpop.xlane.xlu1 %687  ;;  %v701_v24 = vmul.f32 %v4901_v23, %v5444_v49  ;;  %v4195_v23 = vld [vmem:[%s6163_s7] ss:$0 sm:$0xff] }
 0x4ef   :  { %4904 = vrcp.f32 %v688_v20 }
 0x4f0   :  { %v921_v26 = vpack.c.bf16 %v701_v24, %v701_v24 }
 0x4f1   :  { %v4903_v27 = vpop.eup %4902 }
 0x4f2   :  { %4532 = vmatmul.mubr.msk.bf16.vlgmr.msra.gmra.mrb[24].mxu1 %vm196_vm2, %v921_v26  ;;  %v1081_v30 = vpop.permute.xlu1 %1080  ;;  %v703_v34 = vmul.f32 %v4903_v27, %v5451_v54 }
 0x4f3   :  { %4538 = vmatmul.mubr.msk.bf16.vlgmr.msra.gmra.mrb[28].mxu0 %vm196_vm2, %v971_v28  ;;  %4542 = vmatpush3.bf16.msra.mxu1 %v1032_v29  ;;  %v1086_v33 = vsel %vm711_vm3, %v1081_v30, 0 }
 0x4f4   :  { %4548 = vmatpush3.bf16.msra.mxu0 %v1086_v33  ;;  %4543 = vmatprep.mubr.msk.bf16.mxu1 %vm5115_vm1, %v5114_v15  ;;  %v1025_v35 = vpack.c.bf16 %v703_v34, %v703_v34 }
 0x4f5   :  { %4549 = vmatprep.mubr.msk.bf16.mxu0 %vm5115_vm1, %v5114_v15  ;;  %4553 = vmatprep.subr.bf16.mxu1 %v5114_v15 }
 0x4f6   :  { %4561 = vmatprep.subr.bf16.mxu0 %v5114_v15 }
 0x4f9   :  { %v4905_v36 = vpop.eup %4904 }
 0x4fa   :  { %4544 = vmatmul.mubr.msk.bf16.vlgmr.msra.gmra.mrb[28].mxu1 %vm196_vm2, %v1025_v35  ;;  %v704_v38 = vmul.f32 %v4905_v36, %v5455_v56 }
 0x4fb   :  { %4557 = vmatprep.mubr.msk.bf16.mxu1 %vm5115_vm1, %v5114_v15  ;;  %4554 = vmatpush3.bf16.msra.mxu1 %v4846_v59  ;;  %v4200_v59 = vld [vmem:[%s6165_s9] ss:$0 sm:$0xff] }
 0x4fc   :  { %v1079_v41 = vpack.c.bf16 %v704_v38, %v704_v38  ;;  %4555 = vmatprep.subr.bf16.mxu1 %v5114_v15 }
 0x4fe   :  { %4550 = vmatmul.mubr.msk.bf16.vlgmr.msra.gmra.mrb[32].mxu0 %vm196_vm2, %v1079_v41 }
 0x4ff   :  { %4565 = vmatprep.mubr.msk.bf16.mxu0 %vm5115_vm1, %v5114_v15  ;;  %4556 = vmatpush3.bf16.msra.mxu1 %v4847_v0  ;;  %v4850_v0 = vld [vmem:[%s6168_s12] sm:$0xff]  }
 0x500   :  { %4569 = vmatprep.subr.bf16.mxu1 %v5114_v15 }
 0x588   :  { %v749_v43 = vpop.f32.mrb[16].mxu1 }
 0x589   :  { %755 = vst.msk [vmem:[#allocation2] sm:$0xff] %vm196_vm2, %v749_v43  ;;  %v799_v44 = vpop.f32.mrb[20].mxu0  ;;  %v4509_v45 = vpop.f32.mrb[17].mxu1 }
 0x58a   :  { %806 = vrot.lane.b32.xlu0 %v799_v44, %s6199_s2  ;;  %v4515_v46 = vpop.f32.mrb[21].mxu0  ;;  %v752_v47 = vpop.f32.mrb[18].mxu1 }
 0x58b   :  { %v802_v37 = vpop.f32.mrb[22].mxu0  ;;  %v4510_v48 = vpop.f32.mrb[19].mxu1  ;;  %v4849_v47 = vld [vmem:[%s6166_s10 + $0x8] sm:$0xff]  }
 0x58c   :  { %v4516_v49 = vpop.f32.mrb[23].mxu0 }
 0x590   :  { %v854_v50 = vpop.f32.mrb[20].mxu1 }
 0x591   :  { %v4521_v51 = vpop.f32.mrb[21].mxu1  ;;  %861 = vrot.lane.b32.xlu0 %v854_v50, %s6197_s27 }
 0x592   :  { %v857_v52 = vpop.f32.mrb[22].mxu1 }
 0x593   :  { %v4522_v53 = vpop.f32.mrb[23].mxu1 }
 0x5be   :  { %v909_v54 = vpop.f32.mrb[24].mxu0 }
 0x5bf   :  { %916 = vrot.lane.b32.xlu0 %v909_v54, %s6195_s26  ;;  %v4527_v55 = vpop.f32.mrb[25].mxu0 }
 0x5c0   :  { %v912_v56 = vpop.f32.mrb[26].mxu0  ;;  %v4199_v55 = vld [vmem:[%s6164_s8] ss:$0 sm:$0xff] }
 0x5c1   :  { %v4528_v57 = vpop.f32.mrb[27].mxu0 }
 0x5c5   :  { %v964_v58 = vpop.f32.mrb[24].mxu1 }
 0x5c6   :  { %970 = vst.msk [vmem:[#allocation2 + $0x8] sm:$0xff] %vm196_vm2, %v964_v58  ;;  %v1014_v60 = vpop.f32.mrb[28].mxu0  ;;  %v4533_v61 = vpop.f32.mrb[25].mxu1 }
 0x5c7   :  { %1021 = vrot.lane.b32.xlu1 %v1014_v60, %s6199_s2  ;;  %v4539_v62 = vpop.f32.mrb[29].mxu0  ;;  %v967_v63 = vpop.f32.mrb[26].mxu1  ;;  %s6222_s2 = smov 16  }
 0x5c8   :  { %v1017_v1 = vpop.f32.mrb[30].mxu0  ;;  %v4534_v2 = vpop.f32.mrb[27].mxu1 }
 0x5c9   :  { %v4540_v3 = vpop.f32.mrb[31].mxu0  ;;  %v4851_v1 = vld [vmem:[%s6168_s12 + $0x8] sm:$0xff]   ;;  %v4852_v2 = vld [vmem:[%s6168_s12 + $0x10] sm:$0xff]  }
 0x5ca   :  { %v4853_v3 = vld [vmem:[%s6168_s12 + $0x18] sm:$0xff]  }
 0x5cd   :  { %v1068_v4 = vpop.f32.mrb[28].mxu1 }
 0x5ce   :  { %v4545_v42 = vpop.f32.mrb[29].mxu1  ;;  %1075 = vrot.lane.b32.xlu1 %v1068_v4, %s6197_s27  ;;  %v4201_v4 = vld [vmem:[%s6167_s11] ss:$0 sm:$0xff]  ;;  %s6220_s27 = smov 40  }
 0x5cf   :  { %v1071_v5 = vpop.f32.mrb[30].mxu1 }
 0x5d0   :  { %v4546_v6 = vpop.f32.mrb[31].mxu1 }
 0x5d1   :  { %v1122_v8 = vpop.f32.mrb[32].mxu0 }
 0x5d2   :  { %1129 = vrot.lane.b32.xlu1 %v1122_v8, %s6195_s26  ;;  %v4551_v9 = vpop.f32.mrb[33].mxu0  ;;  %s6216_s26 = smov 104  }
 0x5d3   :  { %v1125_v10 = vpop.f32.mrb[34].mxu0 }
 0x5d4   :  { %v4552_v11 = vpop.f32.mrb[35].mxu0 }
 0x5fc   :  { %v807_v12 = vpop.permute.xlu0 %806 }
 0x5fd   :  { %810 = vst.msk [vmem:[#allocation2] sm:$0xff] %vm809_vm4, %v807_v12 }
 0x603   :  { %v862_v13 = vpop.permute.xlu0 %861 }
 0x604   :  { %865 = vst.msk [vmem:[#allocation2] sm:$0xff] %vm864_vm5, %v862_v13 }
 0x631   :  { %v917_v14 = vpop.permute.xlu0 %916 }
 0x632   :  { %920 = vst.msk [vmem:[#allocation2] sm:$0xff] %vm919_vm6, %v917_v14 }
 0x639   :  { %v1022_v16 = vpop.permute.xlu1 %1021  ;;  %v1133_v21 = vld [vmem:[#allocation2] sm:$0xff] }
 0x63a   :  { %1024 = vst.msk [vmem:[#allocation2 + $0x8] sm:$0xff] %vm809_vm4, %v1022_v16 }
 0x640   :  { %v1076_v17 = vpop.permute.xlu1 %1075 }
 0x641   :  { %1078 = vst.msk [vmem:[#allocation2 + $0x8] sm:$0xff] %vm864_vm5, %v1076_v17 }
 0x644   :  { %v1130_v18 = vpop.permute.xlu1 %1129 }
 0x645   :  { %1132 = vst.msk [vmem:[#allocation2 + $0x8] sm:$0xff] %vm919_vm6, %v1130_v18 }
 0x64c   :  { %v1134_v22 = vld [vmem:[#allocation2 + $0x8] sm:$0xff] }
 0x64d   :  { %v1139_v39 = vpack.c.bf16 %v1134_v22, %v1133_v21 }
 0x64f   :  { %4558 = vmatmul.mubr.msk.bf16.vlgmr.msra.gmra.mrb[32].mxu1 %vm77_vm0, %v1139_v39 }
 0x650   :  { %4577 = vmatprep.mubr.msk.bf16.mxu1 %vm5115_vm1, %v5114_v15  ;;  %4570 = vmatpush3.bf16.msra.mxu1 %v4850_v0 }
 0x651   :  { %4571 = vmatprep.subr.bf16.mxu1 %v5114_v15 }
 0x654   :  { %4572 = vmatpush3.bf16.msra.mxu1 %v4851_v1 }
 0x655   :  { %4573 = vmatprep.subr.bf16.mxu1 %v5114_v15 }
 0x658   :  { %4574 = vmatpush3.bf16.msra.mxu1 %v4852_v2 }
 0x659   :  { %4575 = vmatprep.subr.bf16.mxu1 %v5114_v15 }
 0x65c   :  { %4576 = vmatpush3.bf16.msra.mxu1 %v4853_v3 }
 0x65d   :  { %4595 = vmatprep.subr.bf16.mxu1 %v5114_v15 }
 0x722   :  { %v1196_v19 = vpop.f32.mrb[32].mxu1 }
 0x723   :  { %v1197_v20 = vadd.f32 %v4195_v23, %v1196_v19  ;;  %v4559_v24 = vpop.f32.mrb[33].mxu1 }
 0x724   :  { %v1199_v25 = vpop.f32.mrb[34].mxu1 }
 0x725   :  { %v1200_v26 = vadd.f32 %v4195_v23, %v1199_v25  ;;  %v4560_v27 = vpop.f32.mrb[35].mxu1  ;;  %v1203_v28 = vadd.f32 %v1197_v20, %v5278_v31 }
 0x727   :  { %v1207_v29 = vsel %vm77_vm0, %v1203_v28, 0.0  ;;  %v1204_v30 = vadd.f32 %v1200_v26, %v5280_v32  ;;  %v4848_v32 = vld [vmem:[%s6166_s10] sm:$0xff]  }
 0x728   :  { %1208 = vadd.xlane.f32.xlu0 %v1207_v29  ;;  %4562 = vmatpush3.bf16.msra.mxu0 %v4848_v32 }
 0x729   :  { %v1210_v33 = vsel %vm77_vm0, %v1204_v30, 0.0  ;;  %4563 = vmatprep.subr.bf16.mxu0 %v5114_v15 }
 0x72a   :  { %1211 = vadd.xlane.f32.xlu1 %v1210_v33 }
 0x72c   :  { %4564 = vmatpush3.bf16.msra.mxu0 %v4849_v47 }
 0x72d   :  { %4581 = vmatprep.subr.bf16.mxu0 %v5114_v15 }
 0x7b5   :  { %v1209_v34 = vpop.xlane.xlu0 %1208 }
 0x7b6   :  { %v1213_v35 = vmul.f32 0.03125, %v1209_v34 }
 0x7b7   :  { %v1212_v36 = vpop.xlane.xlu1 %1211 }
 0x7b8   :  { %v1215_v38 = vsub.f32 %v1203_v28, %v1213_v35  ;;  %v1214_v41 = vmul.f32 0.03125, %v1212_v36 }
 0x7ba   :  { %v1216_v43 = vsub.f32 %v1204_v30, %v1214_v41  ;;  %v1217_v44 = vmul.f32 %v1215_v38, %v1215_v38  ;;  %v4205_v30 = vld [vmem:[%s6169_s13] ss:$0 sm:$0xff] }
 0x7bc   :  { %v1219_v45 = vsel %vm77_vm0, %v1217_v44, 0.0  ;;  %v1218_v46 = vmul.f32 %v1216_v43, %v1216_v43 }
 0x7bd   :  { %1220 = vadd.xlane.f32.xlu0 %v1219_v45 }
 0x7be   :  { %v1222_v31 = vsel %vm77_vm0, %v1218_v46, 0.0 }
 0x7c1   :  { %1223 = vadd.xlane.f32.xlu0 %v1222_v31 }
 0x84a   :  { %v1221_v37 = vpop.xlane.xlu0 %1220 }
 0x84b   :  { %v1225_v48 = vmul.f32 0.03125, %v1221_v37 }
 0x84d   :  { %v1227_v49 = vadd.f32 1e-12, %v1225_v48 }
 0x84e   :  { %v1224_v50 = vpop.xlane.xlu0 %1223 }
 0x84f   :  { %4906 = vrsqrt.f32 %v1227_v49  ;;  %v1226_v51 = vmul.f32 0.03125, %v1224_v50 }
 0x851   :  { %v1228_v52 = vadd.f32 1e-12, %v1226_v51 }
 0x853   :  { %4908 = vrsqrt.f32 %v1228_v52 }
 0x859   :  { %v4907_v53 = vpop.eup %4906 }
 0x85a   :  { %v1231_v54 = vmul.f32 %v4907_v53, %v1215_v38 }
 0x85c   :  { %v1239_v57 = vmul.f32 %v4199_v55, %v1231_v54  ;;  %v4854_v54 = vld [vmem:[%s6209_s1 + $0x10] sm:$0xff]  }
 0x85d   :  { %v4909_v56 = vpop.eup %4908 }
 0x85e   :  { %v1232_v58 = vmul.f32 %v4909_v56, %v1216_v43  ;;  %v1247_v61 = vadd.f32 %v4200_v59, %v1239_v57 }
 0x860   :  { %v1240_v60 = vmul.f32 %v4199_v55, %v1232_v58  ;;  %v4855_v55 = vld [vmem:[%s6209_s1 + $0x18] sm:$0xff]   ;;  %s6223_s1 = smov 24  }
 0x862   :  { %v1248_v62 = vadd.f32 %v4200_v59, %v1240_v60 }
 0x864   :  { %v1253_v63 = vpack.c.bf16 %v1248_v62, %v1247_v61 }
 0x866   :  { %4566 = vmatmul.mubr.msk.bf16.vlgmr.msra.gmra.mrb[36].mxu0 %vm77_vm0, %v1253_v63  ;;  %v4211_v63 = vld [vmem:[%s6170_s14] ss:$0 sm:$0xff] }
 0x867   :  { %4585 = vmatprep.mubr.msk.bf16.mxu0 %vm5115_vm1, %v5114_v15  ;;  %4582 = vmatpush3.bf16.msra.mxu0 %v4854_v54 }
 0x868   :  { %4583 = vmatprep.subr.bf16.mxu0 %v5114_v15 }
 0x86b   :  { %4584 = vmatpush3.bf16.msra.mxu0 %v4855_v55 }
 0x86c   :  { %4589 = vmatprep.subr.bf16.mxu0 %v5114_v15 }
 0x939   :  { %v1310_v42 = vpop.f32.mrb[36].mxu0 }
 0x93a   :  { %v1311_v5 = vadd.f32 %v4201_v4, %v1310_v42  ;;  %v4567_v6 = vpop.f32.mrb[37].mxu0 }
 0x93b   :  { %v1313_v8 = vpop.f32.mrb[38].mxu0 }
 0x93c   :  { %v1317_v9 = vmul.f32 %v1311_v5, %v1311_v5  ;;  %v1314_v10 = vadd.f32 %v4201_v4, %v1313_v8  ;;  %v4568_v11 = vpop.f32.mrb[39].mxu0  ;;  %v4212_v4 = vld [vmem:[%s6171_s15] ss:$0 sm:$0xff] }
 0x93e   :  { %v1319_v12 = vmul.f32 %v1317_v9, %v1311_v5  ;;  %v1318_v13 = vmul.f32 %v1314_v10, %v1314_v10  ;;  %v4218_v9 = vld [vmem:[%s6212_s30 + $0x1] ss:$0 sm:$0xff]  ;;  %s6215_s30 = smov 112  }
 0x940   :  { %v1321_v14 = vmul.f32 0.044715, %v1319_v12  ;;  %v1320_v16 = vmul.f32 %v1318_v13, %v1314_v10 }
 0x942   :  { %v1323_v17 = vadd.f32 %v1321_v14, %v1311_v5  ;;  %v1322_v18 = vmul.f32 0.044715, %v1320_v16 }
 0x944   :  { %v1325_v21 = vmul.f32 0.7978846, %v1323_v17  ;;  %v1324_v22 = vadd.f32 %v1322_v18, %v1314_v10 }
 0x946   :  { %4910 = vtanh.f32 %v1325_v21  ;;  %v1326_v39 = vmul.f32 0.7978846, %v1324_v22 }
 0x948   :  { %4912 = vtanh.f32 %v1326_v39 }
 0x950   :  { %v4911_v23 = vpop.eup %4910 }
 0x951   :  { %v1329_v19 = vadd.f32 1.0, %v4911_v23 }
 0x952   :  { %v4913_v20 = vpop.eup %4912 }
 0x953   :  { %v1331_v24 = vmul.f32 0.5, %v1329_v19  ;;  %v1330_v25 = vadd.f32 1.0, %v4913_v20 }
 0x955   :  { %v1332_v26 = vmul.f32 0.5, %v1330_v25  ;;  %v1333_v27 = vmul.f32 %v1331_v24, %v1311_v5 }
 0x957   :  { %v1334_v28 = vmul.f32 %v1332_v26, %v1314_v10 }
 0x959   :  { %v1343_v29 = vpack.c.bf16 %v1334_v28, %v1333_v27 }
 0x95b   :  { %4578 = vmatmul.mubr.msk.bf16.vlgmr.msra.gmra.mrb[36].mxu1 %vm1375_vm7, %v1343_v29 }
 0x95c   :  { %4597 = vmatprep.mubr.msk.bf16.mxu1 %vm5115_vm1, %v5114_v15 }
 0xa2e   :  { %v1413_v33 = vpop.f32.mrb[36].mxu1 }
 0xa2f   :  { %v1414_v34 = vadd.f32 %v4205_v30, %v1413_v33  ;;  %v4579_v35 = vpop.f32.mrb[37].mxu1 }
 0xa30   :  { %v1416_v36 = vpop.f32.mrb[38].mxu1 }
 0xa31   :  { %v1417_v38 = vadd.f32 %v4205_v30, %v1416_v36  ;;  %v4580_v41 = vpop.f32.mrb[39].mxu1  ;;  %v1420_v43 = vadd.f32 %v1414_v34, %v1247_v61 }
 0xa33   :  { %v1424_v44 = vsel %vm77_vm0, %v1420_v43, 0.0  ;;  %v1421_v45 = vadd.f32 %v1417_v38, %v1248_v62 }
 0xa34   :  { %1425 = vadd.xlane.f32.xlu0 %v1424_v44 }
 0xa35   :  { %v1427_v46 = vsel %vm77_vm0, %v1421_v45, 0.0 }
 0xa36   :  { %1428 = vadd.xlane.f32.xlu1 %v1427_v46 }
 0xac1   :  { %v1426_v31 = vpop.xlane.xlu0 %1425 }
 0xac2   :  { %v1430_v32 = vmul.f32 0.03125, %v1426_v31 }
 0xac3   :  { %v1429_v47 = vpop.xlane.xlu1 %1428 }
 0xac4   :  { %v1432_v37 = vsub.f32 %v1420_v43, %v1430_v32  ;;  %v1431_v48 = vmul.f32 0.03125, %v1429_v47 }
 0xac6   :  { %v1433_v49 = vsub.f32 %v1421_v45, %v1431_v48  ;;  %v1434_v50 = vmul.f32 %v1432_v37, %v1432_v37 }
 0xac8   :  { %v1436_v51 = vsel %vm77_vm0, %v1434_v50, 0.0  ;;  %v1435_v52 = vmul.f32 %v1433_v49, %v1433_v49 }
 0xac9   :  { %1437 = vadd.xlane.f32.xlu0 %v1436_v51 }
 0xaca   :  { %v1439_v53 = vsel %vm77_vm0, %v1435_v52, 0.0 }
 0xacb   :  { %1440 = vadd.xlane.f32.xlu1 %v1439_v53 }
 0xb56   :  { %v1438_v56 = vpop.xlane.xlu0 %1437 }
 0xb57   :  { %v1442_v57 = vmul.f32 0.03125, %v1438_v56 }
 0xb58   :  { %v1441_v58 = vpop.xlane.xlu1 %1440 }
 0xb59   :  { %v1444_v59 = vadd.f32 1e-12, %v1442_v57  ;;  %v1443_v60 = vmul.f32 0.03125, %v1441_v58 }
 0xb5b   :  { %4914 = vrsqrt.f32 %v1444_v59  ;;  %v1445_v61 = vadd.f32 1e-12, %v1443_v60 }
 0xb5d   :  { %4916 = vrsqrt.f32 %v1445_v61 }
 0xb65   :  { %v4915_v62 = vpop.eup %4914 }
 0xb66   :  { %v1448_v0 = vmul.f32 %v4915_v62, %v1432_v37 }
 0xb67   :  { %v4917_v1 = vpop.eup %4916 }
 0xb68   :  { %v1456_v2 = vmul.f32 %v4211_v63, %v1448_v0  ;;  %v1449_v3 = vmul.f32 %v4917_v1, %v1433_v49 }
 0xb6a   :  { %v1457_v42 = vmul.f32 %v4211_v63, %v1449_v3  ;;  %v5601_v5 = vadd.f32 %v4212_v4, %v1456_v2 }
 0xb6c   :  { %v5603_v6 = vadd.f32 %v4212_v4, %v1457_v42 }
 0xb6e   :  { %v1471_v8 = vpack.c.bf16 %v5603_v6, %v5601_v5 }
 0xb70   :  { %4586 = vmatmul.mubr.msk.bf16.vlgmr.msra.gmra.mrb[40].mxu0 %vm77_vm0, %v1471_v8 }
 0xb71   :  { %4591 = vmatprep.mubr.msk.bf16.mxu0 %vm5115_vm1, %v5114_v15 }
 0xc43   :  { %v1529_v10 = vpop.f32.mrb[40].mxu0 }
 0xc44   :  { %v1530_v11 = vadd.f32 %v4218_v9, %v1529_v10  ;;  %v4587_v12 = vpop.f32.mrb[41].mxu0 }
 0xc45   :  { %v1532_v13 = vpop.f32.mrb[42].mxu0 }
 0xc46   :  { %v5613_v14 = vpack.c.bf16 %v1530_v11, %v1530_v11  ;;  %v4588_v16 = vpop.f32.mrb[43].mxu0  ;;  %v1533_v17 = vadd.f32 %v4218_v9, %v1532_v13 }
 0xc48   :  { %1590 = vrot.lane.b32.xlu1 %v5613_v14, %s5116_s4  ;;  %1538 = vrot.lane.b32.xlu0 %v5613_v14, %s5117_s0  ;;  %v5623_v18 = vpack.c.bf16 %v1533_v17, %v1533_v17 }
 0xc4c   :  { %1642 = vrot.lane.b32.xlu1 %v5613_v14, %s5118_s23  ;;  %1694 = vrot.lane.b32.xlu0 %v5613_v14, %s5119_s5 }
 0xc50   :  { %1588 = vrot.lane.b32.xlu1 %v5613_v14, %s5120_s24  ;;  %1746 = vrot.lane.b32.xlu0 %v5623_v18, %s5117_s0 }
 0xc54   :  { %1640 = vrot.lane.b32.xlu1 %v5613_v14, %s6215_s30  ;;  %1798 = vrot.lane.b32.xlu0 %v5623_v18, %s5116_s4  ;;  %s6217_s4 = smov 56  }
 0xc58   :  { %1692 = vrot.lane.b32.xlu1 %v5613_v14, %s6216_s26  ;;  %1796 = vrot.lane.b32.xlu0 %v5623_v18, %s5120_s24  ;;  %s6219_s24 = smov 64  }
 0xc5c   :  { %1850 = vrot.lane.b32.xlu1 %v5623_v18, %s5118_s23  ;;  %1848 = vrot.lane.b32.xlu0 %v5623_v18, %s6215_s30 }
 0xc60   :  { %1902 = vrot.lane.b32.xlu1 %v5623_v18, %s5119_s5  ;;  %s6218_s5 = smov 48  }
 0xc64   :  { %1900 = vrot.lane.b32.xlu1 %v5623_v18, %s6216_s26 }
 0xcba   :  { %v1591_v21 = vpop.permute.xlu1 %1590  ;;  %v1539_v22 = vpop.permute.xlu0 %1538 }
 0xcbb   :  { %v1596_v39 = vsel %vm196_vm2, %v1591_v21, 0  ;;  %v1544_v23 = vsel %vm196_vm2, %v1539_v22, 0 }
 0xcbc   :  { %4590 = vmatpush3.bf16.xpose.msra.mxu0 %v1544_v23  ;;  %4596 = vmatpush3.bf16.xpose.msra.mxu1 %v1596_v39 }
 0xcbd   :  { %4601 = vmatprep.subr.bf16.mxu0 %v5114_v15  ;;  %4607 = vmatprep.subr.bf16.mxu1 %v5114_v15 }
 0xcbe   :  { %v1643_v19 = vpop.permute.xlu1 %1642  ;;  %v1695_v20 = vpop.permute.xlu0 %1694 }
 0xcbf   :  { %v1648_v26 = vsel %vm196_vm2, %v1643_v19, 0  ;;  %v1700_v27 = vsel %vm196_vm2, %v1695_v20, 0 }
 0xcc2   :  { %v1589_v24 = vpop.permute.xlu1 %1588  ;;  %v1747_v25 = vpop.permute.xlu0 %1746 }
 0xcc3   :  { %4592 = vmatmul.mubr.msk.bf16.vlgmr.msra.gmra.mrb[44].mxu0 %vm196_vm2, %v5613_v14  ;;  %4598 = vmatmul.mubr.msk.bf16.vlgmr.msra.gmra.mrb[40].mxu1 %vm196_vm2, %v1589_v24  ;;  %v1752_v33 = vsel %vm196_vm2, %v1747_v25, 0 }
 0xcc4   :  { %4602 = vmatpush3.bf16.xpose.msra.mxu0 %v1648_v26  ;;  %4608 = vmatpush3.bf16.xpose.msra.mxu1 %v1700_v27 }
 0xcc5   :  { %4609 = vmatprep.mubr.msk.bf16.mxu1 %vm5115_vm1, %v5114_v15  ;;  %4603 = vmatprep.mubr.msk.bf16.mxu0 %vm5115_vm1, %v5114_v15 }
 0xcc6   :  { %v1641_v28 = vpop.permute.xlu1 %1640  ;;  %4613 = vmatprep.subr.bf16.mxu0 %v5114_v15  ;;  %4619 = vmatprep.subr.bf16.mxu1 %v5114_v15  ;;  %v1799_v29 = vpop.permute.xlu0 %1798 }
 0xcc7   :  { %v1804_v34 = vsel %vm196_vm2, %v1799_v29, 0 }
 0xcca   :  { %v1693_v30 = vpop.permute.xlu1 %1692  ;;  %v1797_v36 = vpop.permute.xlu0 %1796 }
 0xccb   :  { %4604 = vmatmul.mubr.msk.bf16.vlgmr.msra.gmra.mrb[48].mxu0 %vm196_vm2, %v1641_v28  ;;  %4610 = vmatmul.mubr.msk.bf16.vlgmr.msra.gmra.mrb[44].mxu1 %vm196_vm2, %v1693_v30 }
 0xccc   :  { %4614 = vmatpush3.bf16.xpose.msra.mxu0 %v1752_v33  ;;  %4620 = vmatpush3.bf16.xpose.msra.mxu1 %v1804_v34 }
 0xccd   :  { %4615 = vmatprep.mubr.msk.bf16.mxu0 %vm5115_vm1, %v5114_v15  ;;  %4621 = vmatprep.mubr.msk.bf16.mxu1 %vm5115_vm1, %v5114_v15 }
 0xcce   :  { %v1851_v35 = vpop.permute.xlu1 %1850  ;;  %4625 = vmatprep.subr.bf16.mxu0 %v5114_v15  ;;  %4631 = vmatprep.subr.bf16.mxu1 %v5114_v15  ;;  %v1849_v44 = vpop.permute.xlu0 %1848 }
 0xccf   :  { %v1856_v41 = vsel %vm196_vm2, %v1851_v35, 0 }
 0xcd2   :  { %v1903_v38 = vpop.permute.xlu1 %1902 }
 0xcd3   :  { %v1908_v43 = vsel %vm196_vm2, %v1903_v38, 0  ;;  %4616 = vmatmul.mubr.msk.bf16.vlgmr.msra.gmra.mrb[52].mxu0 %vm196_vm2, %v5623_v18  ;;  %4622 = vmatmul.mubr.msk.bf16.vlgmr.msra.gmra.mrb[48].mxu1 %vm196_vm2, %v1797_v36 }
 0xcd4   :  { %4626 = vmatpush3.bf16.xpose.msra.mxu0 %v1856_v41  ;;  %4632 = vmatpush3.bf16.xpose.msra.mxu1 %v1908_v43 }
 0xcd5   :  { %4627 = vmatprep.mubr.msk.bf16.mxu0 %vm5115_vm1, %v5114_v15  ;;  %4633 = vmatprep.mubr.msk.bf16.mxu1 %vm5115_vm1, %v5114_v15 }
 0xcd6   :  { %4643 = vmatprep.subr.bf16.mxu1 %v5114_v15  ;;  %4637 = vmatprep.subr.bf16.mxu0 %v5114_v15  ;;  %v1901_v45 = vpop.permute.xlu1 %1900 }
 0xcdb   :  { %4628 = vmatmul.mubr.msk.bf16.vlgmr.msra.gmra.mrb[56].mxu0 %vm196_vm2, %v1849_v44  ;;  %4634 = vmatmul.mubr.msk.bf16.vlgmr.msra.gmra.mrb[52].mxu1 %vm196_vm2, %v1901_v45 }
 0xcdc   :  { %4639 = vmatprep.mubr.msk.bf16.mxu0 %vm5115_vm1, %v5114_v15  ;;  %4645 = vmatprep.mubr.msk.bf16.mxu1 %vm5115_vm1, %v5114_v15 }
 0xd96   :  { %v1580_v46 = vpop.f32.mrb[44].mxu0  ;;  %v1632_v31 = vpop.f32.mrb[40].mxu1 }
 0xd97   :  { %v1586_v32 = vmul.f32 0.35355338, %v1580_v46  ;;  %v1638_v47 = vmul.f32 0.35355338, %v1632_v31  ;;  %v4593_v37 = vpop.f32.mrb[45].mxu0  ;;  %v4599_v48 = vpop.f32.mrb[41].mxu1 }
 0xd98   :  { %v1583_v49 = vpop.f32.mrb[46].mxu0  ;;  %v1635_v50 = vpop.f32.mrb[42].mxu1 }
 0xd99   :  { %v4594_v51 = vpop.f32.mrb[47].mxu0  ;;  %v4600_v52 = vpop.f32.mrb[43].mxu1  ;;  %v1639_v53 = vadd.f32 %v1638_v47, %v5367_v7  ;;  %v1587_v54 = vadd.f32 %v1586_v32, %v5367_v7 }
 0xd9b   :  { %v1955_v55 = vsel %vm196_vm2, %v1639_v53, -inf  ;;  %v1952_v56 = vsel %vm196_vm2, %v1587_v54, -inf }
 0xd9c   :  { %1956 = vmax.xlane.f32.xlu1 %v1955_v55  ;;  %1953 = vmax.xlane.f32.xlu0 %v1952_v56 }
 0xd9e   :  { %v1684_v57 = vpop.f32.mrb[48].mxu0  ;;  %v1736_v58 = vpop.f32.mrb[44].mxu1 }
 0xd9f   :  { %v1690_v59 = vmul.f32 0.35355338, %v1684_v57  ;;  %v1742_v60 = vmul.f32 0.35355338, %v1736_v58  ;;  %v4605_v61 = vpop.f32.mrb[49].mxu0  ;;  %v4611_v62 = vpop.f32.mrb[45].mxu1 }
 0xda0   :  { %v1687_v63 = vpop.f32.mrb[50].mxu0  ;;  %v1739_v0 = vpop.f32.mrb[46].mxu1 }
 0xda1   :  { %v4606_v1 = vpop.f32.mrb[51].mxu0  ;;  %v4612_v2 = vpop.f32.mrb[47].mxu1  ;;  %v1691_v3 = vadd.f32 %v1690_v59, %v5367_v7  ;;  %v5693_v4 = vadd.f32 %v1742_v60, %v5367_v7 }
 0xda3   :  { %v1958_v42 = vsel %vm196_vm2, %v1691_v3, -inf  ;;  %v1961_v10 = vsel %vm196_vm2, %v5693_v4, -inf }
 0xda4   :  { %1959 = vmax.xlane.f32.xlu0 %v1958_v42 }
 0xda6   :  { %v1788_v8 = vpop.f32.mrb[52].mxu0  ;;  %v1840_v9 = vpop.f32.mrb[48].mxu1 }
 0xda7   :  { %v1794_v11 = vmul.f32 0.35355338, %v1788_v8  ;;  %v1846_v12 = vmul.f32 0.35355338, %v1840_v9  ;;  %v4617_v13 = vpop.f32.mrb[53].mxu0  ;;  %v4623_v16 = vpop.f32.mrb[49].mxu1 }
 0xda8   :  { %v1843_v17 = vpop.f32.mrb[50].mxu1  ;;  %1962 = vmax.xlane.f32.xlu0 %v1961_v10  ;;  %v1791_v21 = vpop.f32.mrb[54].mxu0 }
 0xda9   :  { %v4618_v22 = vpop.f32.mrb[55].mxu0  ;;  %v4624_v39 = vpop.f32.mrb[51].mxu1  ;;  %v5699_v7 = vadd.f32 %v1846_v12, %v5384_v40  ;;  %v5702_v23 = vadd.f32 %v1794_v11, %v5384_v40 }
 0xdab   :  { %v1967_v19 = vsel %vm196_vm2, %v5699_v7, -inf  ;;  %v1964_v20 = vsel %vm196_vm2, %v5702_v23, -inf }
 0xdac   :  { %1968 = vmax.xlane.f32.xlu1 %v1967_v19  ;;  %1965 = vmax.xlane.f32.xlu0 %v1964_v20 }
 0xdae   :  { %v1892_v24 = vpop.f32.mrb[56].mxu0  ;;  %v1944_v25 = vpop.f32.mrb[52].mxu1 }
 0xdaf   :  { %v1898_v26 = vmul.f32 0.35355338, %v1892_v24  ;;  %v4629_v27 = vpop.f32.mrb[57].mxu0  ;;  %v4635_v28 = vpop.f32.mrb[53].mxu1  ;;  %v1950_v38 = vmul.f32 0.35355338, %v1944_v25 }
 0xdb0   :  { %v1895_v29 = vpop.f32.mrb[58].mxu0  ;;  %v1947_v30 = vpop.f32.mrb[54].mxu1 }
 0xdb1   :  { %v4630_v33 = vpop.f32.mrb[59].mxu0  ;;  %v4636_v34 = vpop.f32.mrb[55].mxu1  ;;  %v1899_v35 = vadd.f32 %v1898_v26, %v5384_v40  ;;  %v1951_v41 = vadd.f32 %v1950_v38, %v5384_v40 }
 0xdb3   :  { %v1970_v36 = vsel %vm196_vm2, %v1899_v35, -inf  ;;  %v1973_v43 = vsel %vm196_vm2, %v1951_v41, -inf }
 0xdb4   :  { %1971 = vmax.xlane.f32.xlu0 %v1970_v36 }
 0xdbd   :  { %2091 = vrot.lane.b32.xlu1 %v5613_v14, %s6217_s4 }
 0xdc1   :  { %2145 = vrot.lane.b32.xlu1 %v5613_v14, %s6218_s5 }
 0xdca   :  { %2041 = vrot.lane.b32.xlu0 %v5613_v14, %s6219_s24 }
 0xde5   :  { %1974 = vmax.xlane.f32.xlu1 %v1973_v43 }
 0xdf6   :  { %2199 = vrot.lane.b32.xlu1 %v5613_v14, %s6220_s27 }
 0xe29   :  { %v1957_v44 = vpop.xlane.xlu1 %1956  ;;  %v1954_v45 = vpop.xlane.xlu0 %1953 }
 0xe2a   :  { %v1977_v46 = vsub.f32 %v1639_v53, %v1957_v44  ;;  %v1976_v31 = vsub.f32 %v1587_v54, %v1954_v45 }
 0xe2c   :  { %v1986_v32 = vmul.f32 1.442695, %v1977_v46  ;;  %v1984_v47 = vmul.f32 1.442695, %v1976_v31 }
 0xe2e   :  { %4918 = vpow2.f32 %v1986_v32 }
 0xe2f   :  { %4920 = vpow2.f32 %v1984_v47 }
 0xe31   :  { %v1960_v37 = vpop.xlane.xlu0 %1959 }
 0xe32   :  { %v1978_v48 = vsub.f32 %v1691_v3, %v1960_v37 }
 0xe34   :  { %v1988_v49 = vmul.f32 1.442695, %v1978_v48 }
 0xe35   :  { %v1963_v50 = vpop.xlane.xlu0 %1962 }
 0xe36   :  { %4922 = vpow2.f32 %v1988_v49  ;;  %v1979_v62 = vsub.f32 %v5693_v4, %v1963_v50 }
 0xe38   :  { %v5720_v40 = vpop.eup %4918  ;;  %v1990_v63 = vmul.f32 1.442695, %v1979_v62 }
 0xe39   :  { %v5722_v51 = vpop.eup %4920  ;;  %v1969_v52 = vpop.xlane.xlu1 %1968  ;;  %v2003_v14 = vsel %vm196_vm2, %v5720_v40, 0.0 }
 0xe3a   :  { %2004 = vadd.xlane.f32.xlu1 %v2003_v14  ;;  %v2000_v53 = vsel %vm196_vm2, %v5722_v51, 0.0  ;;  %v1966_v54 = vpop.xlane.xlu0 %1965  ;;  %v1981_v0 = vsub.f32 %v5699_v7, %v1969_v52  ;;  %4924 = vpow2.f32 %v1990_v63 }
 0xe3b   :  { %2001 = vadd.xlane.f32.xlu0 %v2000_v53  ;;  %v1980_v2 = vsub.f32 %v5702_v23, %v1966_v54 }
 0xe3c   :  { %v1994_v1 = vmul.f32 1.442695, %v1981_v0 }
 0xe3d   :  { %v2092_v55 = vpop.permute.xlu1 %2091  ;;  %v1992_v3 = vmul.f32 1.442695, %v1980_v2 }
 0xe3e   :  { %v2097_v56 = vsel %vm711_vm3, %v2092_v55, 0  ;;  %4926 = vpow2.f32 %v1994_v1 }
 0xe3f   :  { %4644 = vmatpush3.bf16.msra.mxu1 %v2097_v56  ;;  %4928 = vpow2.f32 %v1992_v3 }
 0xe40   :  { %v5729_v57 = vpop.eup %4922  ;;  %4655 = vmatprep.subr.bf16.mxu1 %v5114_v15 }
 0xe41   :  { %v1972_v58 = vpop.xlane.xlu0 %1971  ;;  %v2006_v59 = vsel %vm196_vm2, %v5729_v57, 0.0  ;;  %v2146_v10 = vpop.permute.xlu1 %2145 }
 0xe42   :  { %2007 = vadd.xlane.f32.xlu0 %v2006_v59  ;;  %v1982_v42 = vsub.f32 %v1899_v35, %v1972_v58 }
 0xe44   :  { %v1996_v8 = vmul.f32 1.442695, %v1982_v42  ;;  %v5743_v9 = vpop.eup %4924 }
 0xe45   :  { %v2042_v60 = vpop.permute.xlu0 %2041  ;;  %v2009_v11 = vsel %vm196_vm2, %v5743_v9, 0.0 }
 0xe46   :  { %v2047_v61 = vsel %vm711_vm3, %v2042_v60, 0  ;;  %4930 = vpow2.f32 %v1996_v8 }
 0xe47   :  { %4638 = vmatpush3.bf16.msra.mxu0 %v2047_v61 }
 0xe48   :  { %4649 = vmatprep.subr.bf16.mxu0 %v5114_v15  ;;  %v5747_v4 = vpop.eup %4926 }
 0xe49   :  { %v2015_v13 = vsel %vm196_vm2, %v5747_v4, 0.0  ;;  %v5751_v16 = vpop.eup %4928 }
 0xe4a   :  { %v2012_v22 = vsel %vm196_vm2, %v5751_v16, 0.0 }
 0xe4b   :  { %2303 = vrot.lane.b32.xlu1 %v5623_v18, %s6217_s4 }
 0xe50   :  { %v5755_v39 = vpop.eup %4930 }
 0xe51   :  { %v2018_v7 = vsel %vm196_vm2, %v5755_v39, 0.0 }
 0xe58   :  { %2253 = vrot.lane.b32.xlu0 %v5623_v18, %s6219_s24 }
 0xe6f   :  { %2010 = vadd.xlane.f32.xlu1 %v2009_v11 }
 0xe72   :  { %v1975_v12 = vpop.xlane.xlu1 %1974 }
 0xe73   :  { %v1983_v17 = vsub.f32 %v1951_v41, %v1975_v12  ;;  %2016 = vadd.xlane.f32.xlu1 %v2015_v13 }
 0xe75   :  { %v1998_v21 = vmul.f32 1.442695, %v1983_v17 }
 0xe76   :  { %v2200_v20 = vpop.permute.xlu1 %2199 }
 0xe77   :  { %4932 = vpow2.f32 %v1998_v21  ;;  %2013 = vadd.xlane.f32.xlu0 %v2012_v22  ;;  %v2205_v35 = vsel %vm711_vm3, %v2200_v20, 0  ;;  %v4856_v20 = vld [vmem:[%s6214_s3 + $0x10] sm:$0xff]  }
 0xe7b   :  { %2019 = vadd.xlane.f32.xlu0 %v2018_v7 }
 0xe81   :  { %v5759_v23 = vpop.eup %4932 }
 0xe82   :  { %v2021_v19 = vsel %vm196_vm2, %v5759_v23, 0.0 }
 0xe83   :  { %2022 = vadd.xlane.f32.xlu1 %v2021_v19 }
 0xe91   :  { %2357 = vrot.lane.b32.xlu0 %v5623_v18, %s6218_s5 }
 0xe94   :  { %2411 = vrot.lane.b32.xlu1 %v5623_v18, %s6220_s27  ;;  %v2151_v18 = vsel %vm711_vm3, %v2146_v10, 0 }
 0xec7   :  { %v2005_v24 = vpop.xlane.xlu1 %2004 }
 0xec8   :  { %4934 = vrcp.f32 %v2005_v24  ;;  %v2002_v25 = vpop.xlane.xlu0 %2001 }
 0xec9   :  { %4936 = vrcp.f32 %v2002_v25 }
 0xecb   :  { %v2304_v45 = vpop.permute.xlu1 %2303 }
 0xecf   :  { %v2008_v26 = vpop.xlane.xlu0 %2007 }
 0xed0   :  { %4938 = vrcp.f32 %v2008_v26 }
 0xed2   :  { %v4935_v27 = vpop.eup %4934 }
 0xed3   :  { %v4937_v28 = vpop.eup %4936  ;;  %v2033_v29 = vmul.f32 %v4935_v27, %v5720_v40  ;;  %v2254_v41 = vpop.permute.xlu0 %2253  ;;  %v2309_v40 = vsel %vm711_vm3, %v2304_v45, 0 }
 0xed4   :  { %v2032_v30 = vmul.f32 %v4937_v28, %v5722_v51  ;;  %v2259_v44 = vsel %vm711_vm3, %v2254_v41, 0  ;;  %v4857_v28 = vld [vmem:[%s6214_s3 + $0x18] sm:$0xff]  }
 0xed5   :  { %v2090_v33 = vpack.c.bf16 %v2033_v29, %v2033_v29 }
 0xed6   :  { %v2040_v34 = vpack.c.bf16 %v2032_v30, %v2032_v30 }
 0xed7   :  { %4646 = vmatmul.mubr.msk.bf16.vlgmr.msra.gmra.mrb[56].mxu1 %vm196_vm2, %v2090_v33 }
 0xed8   :  { %4640 = vmatmul.mubr.msk.bf16.vlgmr.msra.gmra.mrb[60].mxu0 %vm196_vm2, %v2040_v34  ;;  %4656 = vmatpush3.bf16.msra.mxu1 %v2205_v35 }
 0xed9   :  { %4650 = vmatpush3.bf16.msra.mxu0 %v2151_v18  ;;  %4651 = vmatprep.mubr.msk.bf16.mxu0 %vm5115_vm1, %v5114_v15 }
 0xeda   :  { %v4939_v36 = vpop.eup %4938  ;;  %4661 = vmatprep.subr.bf16.mxu0 %v5114_v15  ;;  %4657 = vmatprep.mubr.msk.bf16.mxu1 %vm5115_vm1, %v5114_v15 }
 0xedb   :  { %v2034_v38 = vmul.f32 %v4939_v36, %v5729_v57  ;;  %4667 = vmatprep.subr.bf16.mxu1 %v5114_v15 }
 0xedd   :  { %v2144_v43 = vpack.c.bf16 %v2034_v38, %v2034_v38 }
 0xee0   :  { %4652 = vmatmul.mubr.msk.bf16.vlgmr.msra.gmra.mrb[64].mxu0 %vm196_vm2, %v2144_v43 }
 0xee1   :  { %4662 = vmatpush3.bf16.msra.mxu0 %v2259_v44  ;;  %4663 = vmatprep.mubr.msk.bf16.mxu0 %vm5115_vm1, %v5114_v15 }
 0xee2   :  { %4673 = vmatprep.subr.bf16.mxu0 %v5114_v15 }
 0xefc   :  { %v2011_v46 = vpop.xlane.xlu1 %2010 }
 0xefd   :  { %4940 = vrcp.f32 %v2011_v46 }
 0xf00   :  { %v2017_v31 = vpop.xlane.xlu1 %2016 }
 0xf01   :  { %4942 = vrcp.f32 %v2017_v31 }
 0xf04   :  { %v2014_v32 = vpop.xlane.xlu0 %2013 }
 0xf05   :  { %4944 = vrcp.f32 %v2014_v32 }
 0xf07   :  { %v4941_v47 = vpop.eup %4940 }
 0xf08   :  { %v2035_v37 = vmul.f32 %v4941_v47, %v5743_v9  ;;  %v2020_v48 = vpop.xlane.xlu0 %2019 }
 0xf09   :  { %4946 = vrcp.f32 %v2020_v48 }
 0xf0a   :  { %v2198_v49 = vpack.c.bf16 %v2035_v37, %v2035_v37 }
 0xf0b   :  { %v4943_v50 = vpop.eup %4942 }
 0xf0c   :  { %4658 = vmatmul.mubr.msk.bf16.vlgmr.msra.gmra.mrb[60].mxu1 %vm196_vm2, %v2198_v49  ;;  %v2037_v51 = vmul.f32 %v4943_v50, %v5747_v4  ;;  %v2358_v54 = vpop.permute.xlu0 %2357  ;;  %v4243_v50 = vld [vmem:[%s6163_s7 + $0x1] ss:$0 sm:$0xff] }
 0xf0d   :  { %4668 = vmatpush3.bf16.msra.mxu1 %v2309_v40  ;;  %4669 = vmatprep.mubr.msk.bf16.mxu1 %vm5115_vm1, %v5114_v15  ;;  %v2363_v58 = vsel %vm711_vm3, %v2358_v54, 0 }
 0xf0e   :  { %4679 = vmatprep.subr.bf16.mxu1 %v5114_v15  ;;  %v2302_v55 = vpack.c.bf16 %v2037_v51, %v2037_v51 }
 0xf0f   :  { %v4945_v52 = vpop.eup %4944 }
 0xf10   :  { %v2036_v14 = vmul.f32 %v4945_v52, %v5751_v16  ;;  %v2023_v53 = vpop.xlane.xlu1 %2022 }
 0xf11   :  { %4948 = vrcp.f32 %v2023_v53 }
 0xf12   :  { %v2252_v56 = vpack.c.bf16 %v2036_v14, %v2036_v14 }
 0xf13   :  { %v4947_v57 = vpop.eup %4946 }
 0xf14   :  { %4670 = vmatmul.mubr.msk.bf16.vlgmr.msra.gmra.mrb[64].mxu1 %vm196_vm2, %v2302_v55  ;;  %v2412_v59 = vpop.permute.xlu1 %2411  ;;  %4664 = vmatmul.mubr.msk.bf16.vlgmr.msra.gmra.mrb[68].mxu0 %vm196_vm2, %v2252_v56  ;;  %v2038_v61 = vmul.f32 %v4947_v57, %v5755_v39 }
 0xf15   :  { %v2417_v60 = vsel %vm711_vm3, %v2412_v59, 0  ;;  %4674 = vmatpush3.bf16.msra.mxu0 %v2363_v58  ;;  %4675 = vmatprep.mubr.msk.bf16.mxu0 %vm5115_vm1, %v5114_v15 }
 0xf16   :  { %4680 = vmatpush3.bf16.msra.mxu1 %v2417_v60  ;;  %4681 = vmatprep.mubr.msk.bf16.mxu1 %vm5115_vm1, %v5114_v15  ;;  %v2356_v62 = vpack.c.bf16 %v2038_v61, %v2038_v61 }
 0xf17   :  { %4685 = vmatprep.subr.bf16.mxu0 %v5114_v15  ;;  %4693 = vmatprep.subr.bf16.mxu1 %v5114_v15 }
 0xf1b   :  { %v4949_v63 = vpop.eup %4948 }
 0xf1c   :  { %v2039_v0 = vmul.f32 %v4949_v63, %v5759_v23  ;;  %4676 = vmatmul.mubr.msk.bf16.vlgmr.msra.gmra.mrb[72].mxu0 %vm196_vm2, %v2356_v62 }
 0xf1d   :  { %4689 = vmatprep.mubr.msk.bf16.mxu0 %vm5115_vm1, %v5114_v15  ;;  %4686 = vmatpush3.bf16.msra.mxu0 %v4856_v20 }
 0xf1e   :  { %v2410_v1 = vpack.c.bf16 %v2039_v0, %v2039_v0  ;;  %4687 = vmatprep.subr.bf16.mxu0 %v5114_v15 }
 0xf20   :  { %4682 = vmatmul.mubr.msk.bf16.vlgmr.msra.gmra.mrb[68].mxu1 %vm196_vm2, %v2410_v1 }
 0xf21   :  { %4697 = vmatprep.mubr.msk.bf16.mxu1 %vm5115_vm1, %v5114_v15  ;;  %4688 = vmatpush3.bf16.msra.mxu0 %v4857_v28  ;;  %v4863_v28 = vld [vmem:[%s6168_s12 + $0x38] sm:$0xff]  }
 0xf22   :  { %4701 = vmatprep.subr.bf16.mxu0 %v5114_v15 }
 0xfaa   :  { %v2133_v2 = vpop.f32.mrb[56].mxu1 }
 0xfab   :  { %v2083_v3 = vpop.f32.mrb[60].mxu0  ;;  %v4647_v42 = vpop.f32.mrb[57].mxu1  ;;  %2140 = vrot.lane.b32.xlu0 %v2133_v2, %s6221_s28 }
 0xfac   :  { %2089 = vst.msk [vmem:[#allocation2] sm:$0xff] %vm196_vm2, %v2083_v3  ;;  %v4641_v8 = vpop.f32.mrb[61].mxu0  ;;  %v2136_v9 = vpop.f32.mrb[58].mxu1  ;;  %v4859_v42 = vld [vmem:[%s6166_s10 + $0x18] sm:$0xff]  }
 0xfad   :  { %v2086_v10 = vpop.f32.mrb[62].mxu0  ;;  %v4648_v11 = vpop.f32.mrb[59].mxu1 }
 0xfae   :  { %v4642_v4 = vpop.f32.mrb[63].mxu0 }
 0xfb3   :  { %v2187_v12 = vpop.f32.mrb[64].mxu0 }
 0xfb4   :  { %2194 = vrot.lane.b32.xlu0 %v2187_v12, %s6222_s2  ;;  %v4653_v13 = vpop.f32.mrb[65].mxu0 }
 0xfb5   :  { %v2190_v16 = vpop.f32.mrb[66].mxu0 }
 0xfb6   :  { %v4654_v17 = vpop.f32.mrb[67].mxu0 }
 0xfb7   :  { %v4249_v17 = vld [vmem:[%s6164_s8 + $0x1] ss:$0 sm:$0xff] }
 0xfdf   :  { %v2241_v21 = vpop.f32.mrb[60].mxu1 }
 0xfe0   :  { %v4659_v22 = vpop.f32.mrb[61].mxu1  ;;  %2248 = vrot.lane.b32.xlu0 %v2241_v21, %s6223_s1 }
 0xfe1   :  { %v2244_v39 = vpop.f32.mrb[62].mxu1 }
 0xfe2   :  { %v4660_v7 = vpop.f32.mrb[63].mxu1 }
 0xfe3   :  { %v4250_v7 = vld [vmem:[%s6165_s9 + $0x1] ss:$0 sm:$0xff] }
 0xfe7   :  { %v2295_v23 = vpop.f32.mrb[68].mxu0  ;;  %v2345_v19 = vpop.f32.mrb[64].mxu1 }
 0xfe8   :  { %2301 = vst.msk [vmem:[#allocation2 + $0x8] sm:$0xff] %vm196_vm2, %v2295_v23  ;;  %2352 = vrot.lane.b32.xlu1 %v2345_v19, %s6221_s28  ;;  %v4665_v24 = vpop.f32.mrb[69].mxu0  ;;  %v4671_v25 = vpop.f32.mrb[65].mxu1 }
 0xfe9   :  { %v2298_v26 = vpop.f32.mrb[70].mxu0  ;;  %v2348_v27 = vpop.f32.mrb[66].mxu1  ;;  %v4860_v25 = vld [vmem:[%s6168_s12 + $0x20] sm:$0xff]  }
 0xfea   :  { %v4666_v29 = vpop.f32.mrb[71].mxu0  ;;  %v4672_v30 = vpop.f32.mrb[67].mxu1  ;;  %v4861_v26 = vld [vmem:[%s6168_s12 + $0x28] sm:$0xff]   ;;  %v4862_v27 = vld [vmem:[%s6168_s12 + $0x30] sm:$0xff]  }
 0xfeb   :  { %v4256_v29 = vld [vmem:[%s6167_s11 + $0x1] ss:$0 sm:$0xff] }
 0xfef   :  { %v2399_v33 = vpop.f32.mrb[72].mxu0 }
 0xff0   :  { %2406 = vrot.lane.b32.xlu1 %v2399_v33, %s6222_s2  ;;  %v4677_v34 = vpop.f32.mrb[73].mxu0 }
 0xff1   :  { %v2402_v35 = vpop.f32.mrb[74].mxu0 }
 0xff2   :  { %v4678_v18 = vpop.f32.mrb[75].mxu0 }
 0xff3   :  { %v2453_v36 = vpop.f32.mrb[68].mxu1 }
 0xff4   :  { %v4683_v38 = vpop.f32.mrb[69].mxu1  ;;  %2460 = vrot.lane.b32.xlu1 %v2453_v36, %s6223_s1 }
 0xff5   :  { %v2456_v41 = vpop.f32.mrb[70].mxu1 }
 0xff6   :  { %v4684_v43 = vpop.f32.mrb[71].mxu1 }
0x101d   :  { %v2141_v44 = vpop.permute.xlu0 %2140 }
0x101e   :  { %2143 = vst.msk [vmem:[#allocation2] sm:$0xff] %vm809_vm4, %v2141_v44 }
0x1026   :  { %v2195_v45 = vpop.permute.xlu0 %2194 }
0x1027   :  { %2197 = vst.msk [vmem:[#allocation2] sm:$0xff] %vm864_vm5, %v2195_v45 }
0x1052   :  { %v2249_v46 = vpop.permute.xlu0 %2248 }
0x1053   :  { %2251 = vst.msk [vmem:[#allocation2] sm:$0xff] %vm919_vm6, %v2249_v46 }
0x105a   :  { %v2353_v31 = vpop.permute.xlu1 %2352  ;;  %v2464_v37 = vld [vmem:[#allocation2] sm:$0xff] }
0x105b   :  { %2355 = vst.msk [vmem:[#allocation2 + $0x8] sm:$0xff] %vm809_vm4, %v2353_v31 }
0x1062   :  { %v2407_v32 = vpop.permute.xlu1 %2406 }
0x1063   :  { %2409 = vst.msk [vmem:[#allocation2 + $0x8] sm:$0xff] %vm864_vm5, %v2407_v32 }
0x1066   :  { %v2461_v47 = vpop.permute.xlu1 %2460 }
0x1067   :  { %2463 = vst.msk [vmem:[#allocation2 + $0x8] sm:$0xff] %vm919_vm6, %v2461_v47 }
0x106e   :  { %v2465_v48 = vld [vmem:[#allocation2 + $0x8] sm:$0xff] }
0x106f   :  { %v2471_v49 = vpack.c.bf16 %v2465_v48, %v2464_v37 }
0x1071   :  { %4690 = vmatmul.mubr.msk.bf16.vlgmr.msra.gmra.mrb[76].mxu0 %vm77_vm0, %v2471_v49 }
0x1072   :  { %4709 = vmatprep.mubr.msk.bf16.mxu0 %vm5115_vm1, %v5114_v15  ;;  %4702 = vmatpush3.bf16.msra.mxu0 %v4860_v25 }
0x1073   :  { %4703 = vmatprep.subr.bf16.mxu0 %v5114_v15 }
0x1076   :  { %4704 = vmatpush3.bf16.msra.mxu0 %v4861_v26 }
0x1077   :  { %4705 = vmatprep.subr.bf16.mxu0 %v5114_v15 }
0x107a   :  { %4706 = vmatpush3.bf16.msra.mxu0 %v4862_v27 }
0x107b   :  { %4707 = vmatprep.subr.bf16.mxu0 %v5114_v15 }
0x107e   :  { %4708 = vmatpush3.bf16.msra.mxu0 %v4863_v28  ;;  %v4277_v28 = vld [vmem:[%s6170_s14 + $0x1] ss:$0 sm:$0xff] }
0x107f   :  { %4727 = vmatprep.subr.bf16.mxu0 %v5114_v15 }
0x1144   :  { %v2529_v40 = vpop.f32.mrb[76].mxu0 }
0x1145   :  { %v2530_v51 = vadd.f32 %v4243_v50, %v2529_v40  ;;  %v4691_v52 = vpop.f32.mrb[77].mxu0 }
0x1146   :  { %v2532_v14 = vpop.f32.mrb[78].mxu0 }
0x1147   :  { %v2536_v53 = vadd.f32 %v2530_v51, %v5601_v5  ;;  %v2533_v54 = vadd.f32 %v4243_v50, %v2532_v14  ;;  %v4692_v55 = vpop.f32.mrb[79].mxu0 }
0x1148   :  { %v4269_v55 = vld [vmem:[%s6169_s13 + $0x1] ss:$0 sm:$0xff] }
0x1149   :  { %v2537_v56 = vadd.f32 %v2533_v54, %v5603_v6  ;;  %v2542_v57 = vsel %vm77_vm0, %v2536_v53, 0.0  ;;  %v4858_v6 = vld [vmem:[%s6166_s10 + $0x10] sm:$0xff]  }
0x114a   :  { %2543 = vadd.xlane.f32.xlu0 %v2542_v57  ;;  %4694 = vmatpush3.bf16.msra.mxu1 %v4858_v6 }
0x114b   :  { %v2545_v58 = vsel %vm77_vm0, %v2537_v56, 0.0  ;;  %4695 = vmatprep.subr.bf16.mxu1 %v5114_v15 }
0x114c   :  { %2546 = vadd.xlane.f32.xlu1 %v2545_v58 }
0x114e   :  { %4696 = vmatpush3.bf16.msra.mxu1 %v4859_v42 }
0x114f   :  { %4713 = vmatprep.subr.bf16.mxu1 %v5114_v15 }
0x11d7   :  { %v2544_v59 = vpop.xlane.xlu0 %2543 }
0x11d8   :  { %v2548_v60 = vmul.f32 0.03125, %v2544_v59 }
0x11d9   :  { %v2547_v61 = vpop.xlane.xlu1 %2546 }
0x11da   :  { %v2550_v62 = vsub.f32 %v2536_v53, %v2548_v60  ;;  %v2549_v63 = vmul.f32 0.03125, %v2547_v61 }
0x11dc   :  { %v2551_v0 = vsub.f32 %v2537_v56, %v2549_v63  ;;  %v2552_v1 = vmul.f32 %v2550_v62, %v2550_v62 }
0x11de   :  { %v2554_v2 = vsel %vm77_vm0, %v2552_v1, 0.0  ;;  %v2553_v5 = vmul.f32 %v2551_v0, %v2551_v0 }
0x11df   :  { %2555 = vadd.xlane.f32.xlu0 %v2554_v2  ;;  %v5892_v2 = vld [vmem:[%s6175_s19] sm:$0xff]  }
0x11e0   :  { %v2557_v3 = vsel %vm77_vm0, %v2553_v5, 0.0  ;;  %v5130_v5 = vmov 0  }
0x11e3   :  { %2558 = vadd.xlane.f32.xlu0 %v2557_v3 }
0x126c   :  { %v2556_v8 = vpop.xlane.xlu0 %2555 }
0x126d   :  { %v2560_v9 = vmul.f32 0.03125, %v2556_v8 }
0x126f   :  { %v2562_v10 = vadd.f32 1e-12, %v2560_v9 }
0x1270   :  { %v2559_v11 = vpop.xlane.xlu0 %2558 }
0x1271   :  { %4950 = vrsqrt.f32 %v2562_v10  ;;  %v2561_v4 = vmul.f32 0.03125, %v2559_v11 }
0x1273   :  { %v2563_v12 = vadd.f32 1e-12, %v2561_v4 }
0x1275   :  { %4952 = vrsqrt.f32 %v2563_v12 }
0x127b   :  { %v4951_v13 = vpop.eup %4950 }
0x127c   :  { %v2566_v16 = vmul.f32 %v4951_v13, %v2550_v62 }
0x127e   :  { %v2574_v22 = vmul.f32 %v4249_v17, %v2566_v16  ;;  %v4865_v16 = vld [vmem:[%s6172_s16] sm:$0xff]  }
0x127f   :  { %v4953_v21 = vpop.eup %4952 }
0x1280   :  { %v2567_v39 = vmul.f32 %v4953_v21, %v2551_v0  ;;  %v2582_v19 = vadd.f32 %v4250_v7, %v2574_v22 }
0x1282   :  { %v2575_v23 = vmul.f32 %v4249_v17, %v2567_v39  ;;  %v4866_v17 = vld [vmem:[%s6172_s16 + $0x8] sm:$0xff]  }
0x1284   :  { %v2583_v20 = vadd.f32 %v4250_v7, %v2575_v23 }
0x1286   :  { %v2589_v24 = vpack.c.bf16 %v2583_v20, %v2582_v19 }
0x1288   :  { %4698 = vmatmul.mubr.msk.bf16.vlgmr.msra.gmra.mrb[72].mxu1 %vm77_vm0, %v2589_v24 }
0x1289   :  { %4717 = vmatprep.mubr.msk.bf16.mxu1 %vm5115_vm1, %v5114_v15  ;;  %4714 = vmatpush3.bf16.msra.mxu1 %v4865_v16 }
0x128a   :  { %4715 = vmatprep.subr.bf16.mxu1 %v5114_v15 }
0x128d   :  { %4716 = vmatpush3.bf16.msra.mxu1 %v4866_v17 }
0x128e   :  { %4721 = vmatprep.subr.bf16.mxu1 %v5114_v15 }
0x135b   :  { %v2647_v30 = vpop.f32.mrb[72].mxu1 }
0x135c   :  { %v2648_v33 = vadd.f32 %v4256_v29, %v2647_v30  ;;  %v4699_v34 = vpop.f32.mrb[73].mxu1 }
0x135d   :  { %v2650_v35 = vpop.f32.mrb[74].mxu1 }
0x135e   :  { %v2654_v18 = vmul.f32 %v2648_v33, %v2648_v33  ;;  %v2651_v36 = vadd.f32 %v4256_v29, %v2650_v35  ;;  %v4700_v38 = vpop.f32.mrb[75].mxu1  ;;  %v4278_v35 = vld [vmem:[%s6171_s15 + $0x1] ss:$0 sm:$0xff] }
0x1360   :  { %v2656_v41 = vmul.f32 %v2654_v18, %v2648_v33  ;;  %v2655_v43 = vmul.f32 %v2651_v36, %v2651_v36 }
0x1362   :  { %v2658_v44 = vmul.f32 0.044715, %v2656_v41  ;;  %v2657_v45 = vmul.f32 %v2655_v43, %v2651_v36  ;;  %v5920_v41 = vld [vmem:[%s6174_s18] sm:$0xff]  }
0x1364   :  { %v2660_v46 = vadd.f32 %v2658_v44, %v2648_v33  ;;  %v2659_v31 = vmul.f32 0.044715, %v2657_v45  ;;  %v4279_v44 = vld [vmem:[%s6173_s17] ss:$0 sm:$0xff]  ;;  %s5131_s17 = smov 32  }
0x1366   :  { %v2662_v32 = vmul.f32 0.7978846, %v2660_v46  ;;  %v2661_v47 = vadd.f32 %v2659_v31, %v2651_v36 }
0x1368   :  { %4954 = vtanh.f32 %v2662_v32  ;;  %v2663_v37 = vmul.f32 0.7978846, %v2661_v47 }
0x136a   :  { %4956 = vtanh.f32 %v2663_v37 }
0x1372   :  { %v4955_v48 = vpop.eup %4954 }
0x1373   :  { %v2666_v49 = vadd.f32 1.0, %v4955_v48 }
0x1374   :  { %v4957_v50 = vpop.eup %4956 }
0x1375   :  { %v2668_v40 = vmul.f32 0.5, %v2666_v49  ;;  %v2667_v51 = vadd.f32 1.0, %v4957_v50 }
0x1377   :  { %v2669_v52 = vmul.f32 0.5, %v2667_v51  ;;  %v2670_v14 = vmul.f32 %v2668_v40, %v2648_v33 }
0x1379   :  { %v2671_v53 = vmul.f32 %v2669_v52, %v2651_v36 }
0x137b   :  { %v2681_v54 = vpack.c.bf16 %v2671_v53, %v2670_v14 }
0x137d   :  { %4710 = vmatmul.mubr.msk.bf16.vlgmr.msra.gmra.mrb[80].mxu0 %vm1375_vm7, %v2681_v54 }
0x137e   :  { %4729 = vmatprep.mubr.msk.bf16.mxu0 %vm5115_vm1, %v5114_v15  ;;  %4728 = vmatpush3.bf16.msra.mxu0 %v5892_v2 }
0x137f   :  { %4739 = vmatprep.subr.bf16.mxu0 %v5114_v15 }
0x1385   :  { %4730 = vmatmul.mubr.bf16.vlgmr.msra.gmra.mrb[84].mxu0 %v5130_v5 }
0x1386   :  { %4740 = vmatpush3.bf16.msra.mxu0 %v5892_v2  ;;  %4741 = vmatprep.mubr.msk.bf16.mxu0 %vm5115_vm1, %v5114_v15 }
0x1387   :  { %4751 = vmatprep.subr.bf16.mxu0 %v5114_v15 }
0x1450   :  { %v2751_v56 = vpop.f32.mrb[80].mxu0 }
0x1451   :  { %v2752_v57 = vadd.f32 %v4269_v55, %v2751_v56  ;;  %v4711_v58 = vpop.f32.mrb[81].mxu0 }
0x1452   :  { %v2754_v59 = vpop.f32.mrb[82].mxu0 }
0x1453   :  { %v2758_v60 = vadd.f32 %v2752_v57, %v2582_v19  ;;  %v2755_v61 = vadd.f32 %v4269_v55, %v2754_v59  ;;  %v4712_v62 = vpop.f32.mrb[83].mxu0 }
0x1455   :  { %v2759_v63 = vadd.f32 %v2755_v61, %v2583_v20  ;;  %v2764_v0 = vsel %vm77_vm0, %v2758_v60, 0.0 }
0x1456   :  { %2765 = vadd.xlane.f32.xlu0 %v2764_v0 }
0x1457   :  { %v2767_v1 = vsel %vm77_vm0, %v2759_v63, 0.0 }
0x1458   :  { %2768 = vadd.xlane.f32.xlu1 %v2767_v1  ;;  %v2998_v21 = vpop.f32.mrb[84].mxu0 }
0x1459   :  { %v4731_v22 = vpop.f32.mrb[85].mxu0 }
0x145a   :  { %v3001_v39 = vpop.f32.mrb[86].mxu0 }
0x145b   :  { %v4732_v7 = vpop.f32.mrb[87].mxu0 }
0x14e3   :  { %v2766_v3 = vpop.xlane.xlu0 %2765 }
0x14e4   :  { %v2770_v6 = vmul.f32 0.03125, %v2766_v3 }
0x14e5   :  { %v2769_v42 = vpop.xlane.xlu1 %2768 }
0x14e6   :  { %v2772_v8 = vsub.f32 %v2758_v60, %v2770_v6  ;;  %v2771_v9 = vmul.f32 0.03125, %v2769_v42 }
0x14e8   :  { %v2773_v10 = vsub.f32 %v2759_v63, %v2771_v9  ;;  %v2774_v11 = vmul.f32 %v2772_v8, %v2772_v8 }
0x14ea   :  { %v2776_v4 = vsel %vm77_vm0, %v2774_v11, 0.0  ;;  %v2775_v12 = vmul.f32 %v2773_v10, %v2773_v10 }
0x14eb   :  { %2777 = vadd.xlane.f32.xlu0 %v2776_v4 }
0x14ec   :  { %v2779_v13 = vsel %vm77_vm0, %v2775_v12, 0.0 }
0x14ed   :  { %2780 = vadd.xlane.f32.xlu1 %v2779_v13 }
0x1501   :  { %3005 = vrot.lane.b32.xlu0 %v2998_v21, %s6219_s24 }
0x1578   :  { %v2778_v23 = vpop.xlane.xlu0 %2777 }
0x1579   :  { %v2782_v19 = vmul.f32 0.03125, %v2778_v23 }
0x157a   :  { %v2781_v20 = vpop.xlane.xlu1 %2780 }
0x157b   :  { %v2784_v24 = vadd.f32 1e-12, %v2782_v19  ;;  %v2783_v25 = vmul.f32 0.03125, %v2781_v20 }
0x157c   :  { %v3006_v50 = vpop.permute.xlu0 %3005 }
0x157d   :  { %4958 = vrsqrt.f32 %v2784_v24  ;;  %v2785_v26 = vadd.f32 1e-12, %v2783_v25 }
0x157f   :  { %4960 = vrsqrt.f32 %v2785_v26 }
0x1587   :  { %v4959_v27 = vpop.eup %4958 }
0x1588   :  { %v2788_v29 = vmul.f32 %v4959_v27, %v2772_v8 }
0x1589   :  { %v4961_v30 = vpop.eup %4960 }
0x158a   :  { %v2796_v33 = vmul.f32 %v4277_v28, %v2788_v29  ;;  %v2789_v34 = vmul.f32 %v4961_v30, %v2773_v10 }
0x158c   :  { %v2797_v18 = vmul.f32 %v4277_v28, %v2789_v34  ;;  %v2804_v36 = vadd.f32 %v4278_v35, %v2796_v33 }
0x158e   :  { %v2805_v38 = vadd.f32 %v4278_v35, %v2797_v18 }
0x1590   :  { %v2810_v43 = vpack.c.bf16 %v2805_v38, %v2804_v36 }
0x1592   :  { %4718 = vmatmul.mubr.msk.bf16.vlgmr.msra.gmra.mrb[76].mxu1 %vm77_vm0, %v2810_v43 }
0x1593   :  { %4722 = vmatpush3.bf16.msra.mxu1 %v5920_v41  ;;  %4723 = vmatprep.mubr.msk.bf16.mxu1 %vm5115_vm1, %v5114_v15 }
0x1594   :  { %4733 = vmatprep.subr.bf16.mxu1 %v5114_v15 }
0x159a   :  { %4724 = vmatmul.mubr.bf16.vlgmr.msra.gmra.mrb[80].mxu1 %v5130_v5 }
0x159b   :  { %4734 = vmatpush3.bf16.msra.mxu1 %v5920_v41  ;;  %4735 = vmatprep.mubr.msk.bf16.mxu1 %vm5115_vm1, %v5114_v15 }
0x159c   :  { %4745 = vmatprep.subr.bf16.mxu1 %v5114_v15 }
0x1665   :  { %v2867_v45 = vpop.f32.mrb[76].mxu1 }
0x1666   :  { %v2868_v46 = vadd.f32 %v4279_v44, %v2867_v45  ;;  %v4719_v31 = vpop.f32.mrb[77].mxu1 }
0x1667   :  { %v2870_v32 = vpop.f32.mrb[78].mxu1 }
0x1668   :  { %2874 = vst [vmem:[#allocation3] sm:$0xff] %v2868_v46  ;;  %v2871_v47 = vadd.f32 %v4279_v44, %v2870_v32  ;;  %v4720_v37 = vpop.f32.mrb[79].mxu1 }
0x166a   :  { %2875 = vst [vmem:[#allocation3 + $0x8] sm:$0xff] %v2871_v47 }
0x166d   :  { %v2927_v48 = vpop.f32.mrb[80].mxu1 }
0x166e   :  { %v4725_v49 = vpop.f32.mrb[81].mxu1 }
0x166f   :  { %v2930_v40 = vpop.f32.mrb[82].mxu1 }
0x1670   :  { %v4726_v51 = vpop.f32.mrb[83].mxu1 }
0x1671   :  { %v5934_v52 = vld [vmem:[#allocation3 + $0x7] ss:$8 sm:$0x3]  ;;  %v5939_v61 = vld [vmem:[#allocation3] ss:$8 sm:$0x3] }
0x1672   :  { %v3008_v14 = vadd.f32 %v3006_v50, %v5934_v52  ;;  %v2933_v0 = vadd.f32 %v2927_v48, %v5939_v61  ;;  %v5965_v27 = vld [vmem:[#allocation3 + $0x6] ss:$8 sm:$0x3]  ;;  %v5973_v37 = vld [vmem:[#allocation3 + $0x1] ss:$8 sm:$0x3] }
0x1674   :  { %4962 = vtanh.f32 %v3008_v14  ;;  %v4286_v54 = vmul.f32 -1.442695, %v3008_v14  ;;  %v4284_v3 = vmul.f32 -1.442695, %v2933_v0 }
0x1676   :  { %4964 = vpow2.f32 %v4286_v54 }
0x167e   :  { %v4963_v53 = vpop.eup %4962 }
0x167f   :  { %3018 = vrot.lane.b32.xlu1 %v4963_v53, %s5118_s23 }
0x1680   :  { %v4965_v55 = vpop.eup %4964 }
0x1681   :  { %v3012_v56 = vadd.f32 1.0, %v4965_v55 }
0x1683   :  { %4966 = vrcp.f32 %v3012_v56 }
0x168d   :  { %v4967_v57 = vpop.eup %4966 }
0x168e   :  { %v3016_v60 = vmul.f32 0.0, %v4967_v57 }
0x16f1   :  { %v3019_v58 = vpop.permute.xlu1 %3018 }
0x16f2   :  { %v3021_v59 = vmul.f32 %v4967_v57, %v3019_v58 }
0x16f4   :  { %3023 = vrot.lane.b32.xlu1 %v3021_v59, %s6222_s2 }
0x1766   :  { %v3024_v62 = vpop.permute.xlu1 %3023 }
0x1767   :  { %v5941_v63 = vadd.f32 %v3024_v62, %v3016_v60 }
0x1769   :  { %4968 = vtanh.f32 %v5941_v63 }
0x176a   :  { %4970 = vtanh.f32 %v2933_v0 }
0x176b   :  { %4972 = vpow2.f32 %v4284_v3 }
0x1773   :  { %v4969_v1 = vpop.eup %4968 }
0x1774   :  { %3029 = vrot.lane.b32.xlu1 %v4969_v1, %s6222_s2  ;;  %v4971_v5 = vpop.eup %4970 }
0x1775   :  { %v4973_v6 = vpop.eup %4972 }
0x1776   :  { %v2937_v42 = vadd.f32 1.0, %v4973_v6 }
0x1778   :  { %2943 = vrot.lane.b32.xlu1 %v4971_v5, %s5118_s23  ;;  %4974 = vrcp.f32 %v2937_v42 }
0x1782   :  { %v4975_v11 = vpop.eup %4974 }
0x1783   :  { %v2941_v16 = vmul.f32 0.0, %v4975_v11 }
0x17e6   :  { %v3030_v8 = vpop.permute.xlu1 %3029 }
0x17e7   :  { %v3032_v9 = vmul.f32 %v4967_v57, %v3030_v8 }
0x17e9   :  { %v3109_v10 = vpack.c.bf16 %v3032_v9, %v3032_v9 }
0x17ea   :  { %v2944_v4 = vpop.permute.xlu1 %2943 }
0x17eb   :  { %v2946_v12 = vmul.f32 %v4975_v11, %v2944_v4  ;;  %3111 = vrot.lane.b32.xlu0 %v3109_v10, %s5131_s17 }
0x17ed   :  { %2948 = vrot.lane.b32.xlu1 %v2946_v12, %s6222_s2 }
0x185d   :  { %v3112_v13 = vpop.permute.xlu0 %3111 }
0x185e   :  { %4742 = vmatmul.mubr.msk.bf16.vlgmr.msra.gmra.mrb[88].mxu0 %vm2889_vm8, %v3112_v13 }
0x185f   :  { %v2949_v17 = vpop.permute.xlu1 %2948  ;;  %4752 = vmatpush3.bf16.msra.mxu0 %v5892_v2  ;;  %4753 = vmatprep.mubr.msk.bf16.mxu0 %vm5115_vm1, %v5114_v15 }
0x1860   :  { %v5953_v21 = vadd.f32 %v2949_v17, %v2941_v16  ;;  %4763 = vmatprep.subr.bf16.mxu0 %v5114_v15 }
0x1862   :  { %4976 = vtanh.f32 %v5953_v21 }
0x186c   :  { %v4977_v22 = vpop.eup %4976 }
0x186d   :  { %2954 = vrot.lane.b32.xlu1 %v4977_v22, %s6222_s2 }
0x18df   :  { %v2955_v39 = vpop.permute.xlu1 %2954 }
0x18e0   :  { %v2957_v7 = vmul.f32 %v4975_v11, %v2955_v39  ;;  %v5998_v11 = vld [vmem:[#allocation3 + $0x5] ss:$8 sm:$0x3] }
0x18e2   :  { %v3037_v23 = vpack.c.bf16 %v2957_v7, %v2957_v7 }
0x18e4   :  { %3039 = vrot.lane.b32.xlu1 %v3037_v23, %s5117_s0 }
0x1931   :  { %v3150_v19 = vpop.f32.mrb[88].mxu0 }
0x1932   :  { %3157 = vrot.lane.b32.xlu0 %v3150_v19, %s6219_s24  ;;  %v4743_v20 = vpop.f32.mrb[89].mxu0 }
0x1933   :  { %v3153_v24 = vpop.f32.mrb[90].mxu0 }
0x1934   :  { %v4744_v25 = vpop.f32.mrb[91].mxu0 }
0x1956   :  { %v3040_v26 = vpop.permute.xlu1 %3039 }
0x1957   :  { %4736 = vmatmul.mubr.msk.bf16.vlgmr.msra.gmra.mrb[84].mxu1 %vm2889_vm8, %v3040_v26 }
0x1958   :  { %4746 = vmatpush3.bf16.msra.mxu1 %v5920_v41  ;;  %4747 = vmatprep.mubr.msk.bf16.mxu1 %vm5115_vm1, %v5114_v15 }
0x1959   :  { %4757 = vmatprep.subr.bf16.mxu1 %v5114_v15 }
0x19a4   :  { %v3158_v28 = vpop.permute.xlu0 %3157 }
0x19a5   :  { %v3160_v29 = vadd.f32 %v3158_v28, %v5965_v27 }
0x19a7   :  { %4978 = vtanh.f32 %v3160_v29  ;;  %v4290_v33 = vmul.f32 -1.442695, %v3160_v29  ;;  %v6006_v29 = vld [vmem:[#allocation3 + $0x2] ss:$8 sm:$0x3] }
0x19a9   :  { %4980 = vpow2.f32 %v4290_v33 }
0x19b1   :  { %v4979_v30 = vpop.eup %4978 }
0x19b2   :  { %3170 = vrot.lane.b32.xlu0 %v4979_v30, %s5118_s23 }
0x19b3   :  { %v4981_v34 = vpop.eup %4980 }
0x19b4   :  { %v3164_v35 = vadd.f32 1.0, %v4981_v34 }
0x19b6   :  { %4982 = vrcp.f32 %v3164_v35 }
0x19c0   :  { %v4983_v18 = vpop.eup %4982 }
0x19c1   :  { %v3168_v31 = vmul.f32 %v4983_v18, %v5941_v63 }
0x1a24   :  { %v3171_v36 = vpop.permute.xlu0 %3170 }
0x1a25   :  { %v3173_v38 = vmul.f32 %v4983_v18, %v3171_v36 }
0x1a27   :  { %3175 = vrot.lane.b32.xlu0 %v3173_v38, %s6222_s2 }
0x1a2a   :  { %v3078_v43 = vpop.f32.mrb[84].mxu1 }
0x1a2b   :  { %v4737_v44 = vpop.f32.mrb[85].mxu1  ;;  %v3084_v48 = vadd.f32 %v3078_v43, %v5973_v37 }
0x1a2c   :  { %v3081_v45 = vpop.f32.mrb[86].mxu1 }
0x1a2d   :  { %v4738_v46 = vpop.f32.mrb[87].mxu1  ;;  %v4288_v40 = vmul.f32 -1.442695, %v3084_v48 }
0x1a99   :  { %v3176_v32 = vpop.permute.xlu0 %3175 }
0x1a9a   :  { %v5971_v47 = vadd.f32 %v3176_v32, %v3168_v31 }
0x1a9c   :  { %4984 = vtanh.f32 %v5971_v47 }
0x1a9d   :  { %4986 = vtanh.f32 %v3084_v48 }
0x1a9e   :  { %4988 = vpow2.f32 %v4288_v40 }
0x1aa6   :  { %v4985_v49 = vpop.eup %4984 }
0x1aa7   :  { %3181 = vrot.lane.b32.xlu0 %v4985_v49, %s6222_s2  ;;  %v4987_v50 = vpop.eup %4986 }
0x1aa8   :  { %v4989_v51 = vpop.eup %4988 }
0x1aa9   :  { %v3088_v14 = vadd.f32 1.0, %v4989_v51 }
0x1aab   :  { %3094 = vrot.lane.b32.xlu0 %v4987_v50, %s5118_s23  ;;  %4990 = vrcp.f32 %v3088_v14 }
0x1ab5   :  { %v4991_v57 = vpop.eup %4990 }
0x1ab6   :  { %v3092_v60 = vmul.f32 %v4991_v57, %v5953_v21 }
0x1b19   :  { %v3182_v53 = vpop.permute.xlu0 %3181 }
0x1b1a   :  { %v3184_v54 = vmul.f32 %v4983_v18, %v3182_v53 }
0x1b1c   :  { %v3261_v55 = vpack.c.bf16 %v3184_v54, %v3184_v54 }
0x1b1d   :  { %v3095_v56 = vpop.permute.xlu0 %3094 }
0x1b1e   :  { %3263 = vrot.lane.b32.xlu1 %v3261_v55, %s5131_s17  ;;  %v3097_v58 = vmul.f32 %v4991_v57, %v3095_v56 }
0x1b22   :  { %3099 = vrot.lane.b32.xlu1 %v3097_v58, %s6222_s2  ;;  %v6031_v58 = vld [vmem:[#allocation3 + $0x4] ss:$8 sm:$0x3] }
0x1b90   :  { %v3264_v59 = vpop.permute.xlu1 %3263 }
0x1b91   :  { %4754 = vmatmul.mubr.msk.bf16.vlgmr.msra.gmra.mrb[92].mxu0 %vm2889_vm8, %v3264_v59 }
0x1b92   :  { %4764 = vmatpush3.bf16.msra.mxu0 %v5892_v2  ;;  %4765 = vmatprep.mubr.msk.bf16.mxu0 %vm5115_vm1, %v5114_v15 }
0x1b93   :  { %4775 = vmatprep.subr.bf16.mxu0 %v5114_v15 }
0x1b94   :  { %v3100_v62 = vpop.permute.xlu1 %3099 }
0x1b95   :  { %v5987_v63 = vadd.f32 %v3100_v62, %v3092_v60 }
0x1b97   :  { %4992 = vtanh.f32 %v5987_v63 }
0x1ba1   :  { %v4993_v0 = vpop.eup %4992 }
0x1ba2   :  { %3105 = vrot.lane.b32.xlu1 %v4993_v0, %s6222_s2 }
0x1c14   :  { %v3106_v1 = vpop.permute.xlu1 %3105 }
0x1c15   :  { %v3108_v5 = vmul.f32 %v4991_v57, %v3106_v1 }
0x1c17   :  { %v3189_v3 = vpack.c.bf16 %v3108_v5, %v3108_v5 }
0x1c19   :  { %3191 = vrot.lane.b32.xlu1 %v3189_v3, %s5117_s0 }
0x1c64   :  { %v3302_v6 = vpop.f32.mrb[92].mxu0 }
0x1c65   :  { %3309 = vrot.lane.b32.xlu0 %v3302_v6, %s6219_s24  ;;  %v4755_v42 = vpop.f32.mrb[93].mxu0 }
0x1c66   :  { %v3305_v8 = vpop.f32.mrb[94].mxu0 }
0x1c67   :  { %v4756_v9 = vpop.f32.mrb[95].mxu0 }
0x1c8b   :  { %v3192_v10 = vpop.permute.xlu1 %3191 }
0x1c8c   :  { %4748 = vmatmul.mubr.msk.bf16.vlgmr.msra.gmra.mrb[88].mxu1 %vm2889_vm8, %v3192_v10 }
0x1c8d   :  { %4758 = vmatpush3.bf16.msra.mxu1 %v5920_v41  ;;  %4759 = vmatprep.mubr.msk.bf16.mxu1 %vm5115_vm1, %v5114_v15 }
0x1c8e   :  { %4769 = vmatprep.subr.bf16.mxu1 %v5114_v15 }
0x1cd7   :  { %v3310_v4 = vpop.permute.xlu0 %3309 }
0x1cd8   :  { %v3312_v12 = vadd.f32 %v3310_v4, %v5998_v11 }
0x1cda   :  { %4994 = vtanh.f32 %v3312_v12  ;;  %v4294_v16 = vmul.f32 -1.442695, %v3312_v12 }
0x1cdc   :  { %4996 = vpow2.f32 %v4294_v16  ;;  %v3338_v16 = vld [vmem:[#allocation3 + $0x3] ss:$8 sm:$0x3] }
0x1ce4   :  { %v4995_v13 = vpop.eup %4994 }
0x1ce5   :  { %3322 = vrot.lane.b32.xlu0 %v4995_v13, %s5118_s23 }
0x1ce6   :  { %v4997_v17 = vpop.eup %4996 }
0x1ce7   :  { %v3316_v21 = vadd.f32 1.0, %v4997_v17 }
0x1ce9   :  { %4998 = vrcp.f32 %v3316_v21 }
0x1cf3   :  { %v4999_v22 = vpop.eup %4998 }
0x1cf4   :  { %v3320_v25 = vmul.f32 %v4999_v22, %v5971_v47 }
0x1d57   :  { %v3323_v39 = vpop.permute.xlu0 %3322 }
0x1d58   :  { %v3325_v7 = vmul.f32 %v4999_v22, %v3323_v39 }
0x1d5a   :  { %3327 = vrot.lane.b32.xlu0 %v3325_v7, %s6222_s2 }
0x1d5f   :  { %v3230_v23 = vpop.f32.mrb[88].mxu1 }
0x1d60   :  { %v4749_v19 = vpop.f32.mrb[89].mxu1  ;;  %v3236_v30 = vadd.f32 %v3230_v23, %v6006_v29 }
0x1d61   :  { %v3233_v20 = vpop.f32.mrb[90].mxu1 }
0x1d62   :  { %v4750_v24 = vpop.f32.mrb[91].mxu1  ;;  %v4292_v35 = vmul.f32 -1.442695, %v3236_v30 }
0x1dcc   :  { %v3328_v26 = vpop.permute.xlu0 %3327 }
0x1dcd   :  { %v6004_v28 = vadd.f32 %v3328_v26, %v3320_v25 }
0x1dcf   :  { %5000 = vtanh.f32 %v6004_v28 }
0x1dd0   :  { %5002 = vtanh.f32 %v3236_v30 }
0x1dd1   :  { %5004 = vpow2.f32 %v4292_v35 }
0x1dd9   :  { %v5001_v33 = vpop.eup %5000 }
0x1dda   :  { %3333 = vrot.lane.b32.xlu1 %v5001_v33, %s6222_s2  ;;  %v5003_v34 = vpop.eup %5002 }
0x1ddb   :  { %v5005_v18 = vpop.eup %5004 }
0x1ddc   :  { %v3240_v36 = vadd.f32 1.0, %v5005_v18 }
0x1dde   :  { %3246 = vrot.lane.b32.xlu1 %v5003_v34, %s5118_s23  ;;  %5006 = vrcp.f32 %v3240_v36 }
0x1de8   :  { %v5007_v46 = vpop.eup %5006 }
0x1de9   :  { %v3244_v47 = vmul.f32 %v5007_v46, %v5987_v63 }
0x1e4c   :  { %v3334_v38 = vpop.permute.xlu1 %3333 }
0x1e4d   :  { %v3336_v43 = vmul.f32 %v4999_v22, %v3334_v38 }
0x1e4f   :  { %v3413_v44 = vpack.c.bf16 %v3336_v43, %v3336_v43 }
0x1e50   :  { %v3247_v45 = vpop.permute.xlu1 %3246 }
0x1e51   :  { %3415 = vrot.lane.b32.xlu0 %v3413_v44, %s5131_s17  ;;  %v3249_v31 = vmul.f32 %v5007_v46, %v3247_v45 }
0x1e55   :  { %3251 = vrot.lane.b32.xlu0 %v3249_v31, %s6222_s2 }
0x1ec3   :  { %v3416_v32 = vpop.permute.xlu0 %3415 }
0x1ec4   :  { %4766 = vmatmul.mubr.msk.bf16.vlgmr.msra.gmra.mrb[96].mxu0 %vm2889_vm8, %v3416_v32 }
0x1ec5   :  { %4776 = vmatpush3.bf16.msra.mxu0 %v5892_v2  ;;  %4777 = vmatprep.mubr.msk.bf16.mxu0 %vm5115_vm1, %v5114_v15 }
0x1ec6   :  { %4787 = vmatprep.subr.bf16.mxu0 %v5114_v15 }
0x1ec7   :  { %v3252_v48 = vpop.permute.xlu0 %3251 }
0x1ec8   :  { %v6020_v49 = vadd.f32 %v3252_v48, %v3244_v47 }
0x1eca   :  { %5008 = vtanh.f32 %v6020_v49 }
0x1ed4   :  { %v5009_v50 = vpop.eup %5008 }
0x1ed5   :  { %3257 = vrot.lane.b32.xlu1 %v5009_v50, %s6222_s2 }
0x1f47   :  { %v3258_v40 = vpop.permute.xlu1 %3257 }
0x1f48   :  { %v3260_v51 = vmul.f32 %v5007_v46, %v3258_v40 }
0x1f4a   :  { %v3341_v14 = vpack.c.bf16 %v3260_v51, %v3260_v51 }
0x1f4c   :  { %3343 = vrot.lane.b32.xlu1 %v3341_v14, %s5117_s0 }
0x1f97   :  { %v3454_v53 = vpop.f32.mrb[96].mxu0 }
0x1f98   :  { %3461 = vrot.lane.b32.xlu0 %v3454_v53, %s6219_s24  ;;  %v4767_v54 = vpop.f32.mrb[97].mxu0 }
0x1f99   :  { %v3457_v55 = vpop.f32.mrb[98].mxu0 }
0x1f9a   :  { %v4768_v56 = vpop.f32.mrb[99].mxu0 }
0x1fbe   :  { %v3344_v57 = vpop.permute.xlu1 %3343 }
0x1fbf   :  { %4760 = vmatmul.mubr.msk.bf16.vlgmr.msra.gmra.mrb[92].mxu1 %vm2889_vm8, %v3344_v57 }
0x1fc0   :  { %4770 = vmatpush3.bf16.msra.mxu1 %v5920_v41  ;;  %4771 = vmatprep.mubr.msk.bf16.mxu1 %vm5115_vm1, %v5114_v15 }
0x1fc1   :  { %4781 = vmatprep.subr.bf16.mxu1 %v5114_v15 }
0x200a   :  { %v3462_v59 = vpop.permute.xlu0 %3461 }
0x200b   :  { %v3464_v60 = vadd.f32 %v3462_v59, %v6031_v58 }
0x200d   :  { %5010 = vtanh.f32 %v3464_v60  ;;  %v4298_v63 = vmul.f32 -1.442695, %v3464_v60 }
0x200f   :  { %5012 = vpow2.f32 %v4298_v63 }
0x2017   :  { %v5011_v62 = vpop.eup %5010 }
0x2018   :  { %3474 = vrot.lane.b32.xlu0 %v5011_v62, %s5118_s23 }
0x2019   :  { %v5013_v0 = vpop.eup %5012 }
0x201a   :  { %v3468_v1 = vadd.f32 1.0, %v5013_v0 }
0x201c   :  { %5014 = vrcp.f32 %v3468_v1 }
0x2026   :  { %v5015_v5 = vpop.eup %5014 }
0x2027   :  { %v3472_v4 = vmul.f32 %v5015_v5, %v6004_v28 }
0x208a   :  { %v3475_v3 = vpop.permute.xlu0 %3474 }
0x208b   :  { %v3477_v6 = vmul.f32 %v5015_v5, %v3475_v3 }
0x208d   :  { %3479 = vrot.lane.b32.xlu1 %v3477_v6, %s6222_s2 }
0x2092   :  { %v3382_v42 = vpop.f32.mrb[92].mxu1 }
0x2093   :  { %v4761_v8 = vpop.f32.mrb[93].mxu1  ;;  %v3388_v17 = vadd.f32 %v3382_v42, %v3338_v16 }
0x2094   :  { %v3385_v9 = vpop.f32.mrb[94].mxu1 }
0x2095   :  { %v4762_v10 = vpop.f32.mrb[95].mxu1  ;;  %v4296_v39 = vmul.f32 -1.442695, %v3388_v17 }
0x20ff   :  { %v3480_v12 = vpop.permute.xlu1 %3479 }
0x2100   :  { %v6037_v13 = vadd.f32 %v3480_v12, %v3472_v4 }
0x2102   :  { %5016 = vtanh.f32 %v6037_v13 }
0x2103   :  { %5018 = vtanh.f32 %v3388_v17 }
0x2104   :  { %5020 = vpow2.f32 %v4296_v39 }
0x210c   :  { %v5017_v21 = vpop.eup %5016 }
0x210d   :  { %3485 = vrot.lane.b32.xlu0 %v5017_v21, %s6222_s2  ;;  %v5019_v22 = vpop.eup %5018 }
0x210e   :  { %v5021_v7 = vpop.eup %5020 }
0x210f   :  { %v3392_v23 = vadd.f32 1.0, %v5021_v7 }
0x2111   :  { %3398 = vrot.lane.b32.xlu0 %v5019_v22, %s5118_s23  ;;  %5022 = vrcp.f32 %v3392_v23 }
0x211b   :  { %v5023_v26 = vpop.eup %5022 }
0x211c   :  { %v3396_v33 = vmul.f32 %v5023_v26, %v6020_v49 }
0x217f   :  { %v3486_v19 = vpop.permute.xlu0 %3485 }
0x2180   :  { %v3488_v20 = vmul.f32 %v5015_v5, %v3486_v19 }
0x2182   :  { %v3561_v24 = vpack.c.bf16 %v3488_v20, %v3488_v20 }
0x2183   :  { %v3399_v25 = vpop.permute.xlu0 %3398 }
0x2184   :  { %3563 = vrot.lane.b32.xlu1 %v3561_v24, %s5131_s17  ;;  %v3401_v28 = vmul.f32 %v5023_v26, %v3399_v25 }
0x2188   :  { %3403 = vrot.lane.b32.xlu1 %v3401_v28, %s6222_s2 }
0x21f6   :  { %v3564_v30 = vpop.permute.xlu1 %3563 }
0x21f7   :  { %4778 = vmatmul.mubr.msk.bf16.vlgmr.msra.gmra.mrb[100].mxu0 %vm2889_vm8, %v3564_v30 }
0x21f8   :  { %4788 = vmatpush3.bf16.msra.mxu0 %v5892_v2  ;;  %4789 = vmatprep.mubr.msk.bf16.mxu0 %vm5115_vm1, %v5114_v15 }
0x21f9   :  { %4799 = vmatprep.subr.bf16.mxu0 %v5114_v15 }
0x21fa   :  { %v3404_v34 = vpop.permute.xlu1 %3403 }
0x21fb   :  { %v3406_v35 = vadd.f32 %v3404_v34, %v3396_v33 }
0x21fd   :  { %5024 = vtanh.f32 %v3406_v35 }
0x2207   :  { %v5025_v18 = vpop.eup %5024 }
0x2208   :  { %3409 = vrot.lane.b32.xlu0 %v5025_v18, %s6222_s2 }
0x227a   :  { %v3410_v36 = vpop.permute.xlu0 %3409 }
0x227b   :  { %v3412_v38 = vmul.f32 %v5023_v26, %v3410_v36 }
0x227d   :  { %v3489_v43 = vpack.c.bf16 %v3412_v38, %v3412_v38 }
0x227f   :  { %3491 = vrot.lane.b32.xlu1 %v3489_v43, %s5117_s0 }
0x22ca   :  { %v3602_v44 = vpop.f32.mrb[100].mxu0 }
0x22cb   :  { %3609 = vrot.lane.b32.xlu0 %v3602_v44, %s6219_s24  ;;  %v4779_v45 = vpop.f32.mrb[101].mxu0 }
0x22cc   :  { %v3605_v46 = vpop.f32.mrb[102].mxu0 }
0x22cd   :  { %v4780_v31 = vpop.f32.mrb[103].mxu0 }
0x22f1   :  { %v3492_v32 = vpop.permute.xlu1 %3491 }
0x22f2   :  { %4772 = vmatmul.mubr.msk.bf16.vlgmr.msra.gmra.mrb[96].mxu1 %vm2889_vm8, %v3492_v32 }
0x22f3   :  { %4782 = vmatpush3.bf16.msra.mxu1 %v5920_v41  ;;  %4783 = vmatprep.mubr.msk.bf16.mxu1 %vm5115_vm1, %v5114_v15 }
0x22f4   :  { %4793 = vmatprep.subr.bf16.mxu1 %v5114_v15 }
0x233d   :  { %v3610_v47 = vpop.permute.xlu0 %3609 }
0x233e   :  { %v3612_v48 = vadd.f32 %v3610_v47, %v3338_v16 }
0x2340   :  { %5026 = vtanh.f32 %v3612_v48  ;;  %v4302_v50 = vmul.f32 -1.442695, %v3612_v48 }
0x2342   :  { %5028 = vpow2.f32 %v4302_v50 }
0x234a   :  { %v5027_v49 = vpop.eup %5026 }
0x234b   :  { %3622 = vrot.lane.b32.xlu1 %v5027_v49, %s5118_s23 }
0x234c   :  { %v5029_v40 = vpop.eup %5028 }
0x234d   :  { %v3616_v51 = vadd.f32 1.0, %v5029_v40 }
0x234f   :  { %5030 = vrcp.f32 %v3616_v51 }
0x2359   :  { %v5031_v14 = vpop.eup %5030 }
0x235a   :  { %v3620_v0 = vmul.f32 %v5031_v14, %v6037_v13 }
0x23bd   :  { %v3623_v53 = vpop.permute.xlu1 %3622 }
0x23be   :  { %v3625_v54 = vmul.f32 %v5031_v14, %v3623_v53 }
0x23c0   :  { %3627 = vrot.lane.b32.xlu0 %v3625_v54, %s6222_s2 }
0x23c5   :  { %v3530_v55 = vpop.f32.mrb[96].mxu1 }
0x23c6   :  { %v3536_v56 = vadd.f32 %v3530_v55, %v6031_v58  ;;  %v4773_v57 = vpop.f32.mrb[97].mxu1 }
0x23c7   :  { %v3533_v59 = vpop.f32.mrb[98].mxu1 }
0x23c8   :  { %5032 = vtanh.f32 %v3536_v56  ;;  %v4774_v60 = vpop.f32.mrb[99].mxu1  ;;  %v4300_v63 = vmul.f32 -1.442695, %v3536_v56 }
0x23ca   :  { %5034 = vpow2.f32 %v4300_v63 }
0x23d2   :  { %v5033_v62 = vpop.eup %5032 }
0x23d3   :  { %3546 = vrot.lane.b32.xlu0 %v5033_v62, %s5118_s23 }
0x23d4   :  { %v5035_v3 = vpop.eup %5034 }
0x23d5   :  { %v3540_v6 = vadd.f32 1.0, %v5035_v3 }
0x2432   :  { %v3628_v1 = vpop.permute.xlu0 %3627 }
0x2433   :  { %v6063_v5 = vadd.f32 %v3628_v1, %v3620_v0 }
0x2435   :  { %5036 = vtanh.f32 %v6063_v5 }
0x2436   :  { %5038 = vrcp.f32 %v3540_v6 }
0x243f   :  { %v5037_v58 = vpop.eup %5036 }
0x2440   :  { %3633 = vrot.lane.b32.xlu1 %v5037_v58, %s6222_s2  ;;  %v5039_v42 = vpop.eup %5038 }
0x2441   :  { %v3544_v13 = vmul.f32 %v5039_v42, %v3406_v35 }
0x2445   :  { %v3547_v8 = vpop.permute.xlu0 %3546 }
0x2446   :  { %v3549_v9 = vmul.f32 %v5039_v42, %v3547_v8 }
0x2448   :  { %3551 = vrot.lane.b32.xlu0 %v3549_v9, %s6222_s2 }
0x24b2   :  { %v3634_v10 = vpop.permute.xlu1 %3633 }
0x24b3   :  { %v3636_v4 = vmul.f32 %v5031_v14, %v3634_v10 }
0x24b5   :  { %v3709_v12 = vpack.c.bf16 %v3636_v4, %v3636_v4 }
0x24b7   :  { %3711 = vrot.lane.b32.xlu1 %v3709_v12, %s5131_s17 }
0x24ba   :  { %v3552_v16 = vpop.permute.xlu0 %3551 }
0x24bb   :  { %v3554_v17 = vadd.f32 %v3552_v16, %v3544_v13 }
0x24bd   :  { %5040 = vtanh.f32 %v3554_v17 }
0x24c7   :  { %v5041_v21 = vpop.eup %5040 }
0x24c8   :  { %3557 = vrot.lane.b32.xlu1 %v5041_v21, %s6222_s2 }
0x2529   :  { %v3712_v22 = vpop.permute.xlu1 %3711 }
0x252a   :  { %4790 = vmatmul.mubr.msk.bf16.vlgmr.msra.gmra.mrb[104].mxu0 %vm2889_vm8, %v3712_v22 }
0x252b   :  { %4800 = vmatpush3.bf16.msra.mxu0 %v5892_v2  ;;  %4801 = vmatprep.mubr.msk.bf16.mxu0 %vm5115_vm1, %v5114_v15 }
0x252c   :  { %4811 = vmatprep.subr.bf16.mxu0 %v5114_v15 }
0x253a   :  { %v3558_v39 = vpop.permute.xlu1 %3557 }
0x253b   :  { %v3560_v7 = vmul.f32 %v5039_v42, %v3558_v39 }
0x253d   :  { %v3637_v23 = vpack.c.bf16 %v3560_v7, %v3560_v7 }
0x253f   :  { %3639 = vrot.lane.b32.xlu0 %v3637_v23, %s5117_s0 }
0x25b1   :  { %v3640_v19 = vpop.permute.xlu0 %3639 }
0x25b2   :  { %4784 = vmatmul.mubr.msk.bf16.vlgmr.msra.gmra.mrb[100].mxu1 %vm2889_vm8, %v3640_v19 }
0x25b3   :  { %4794 = vmatpush3.bf16.msra.mxu1 %v5920_v41  ;;  %4795 = vmatprep.mubr.msk.bf16.mxu1 %vm5115_vm1, %v5114_v15 }
0x25b4   :  { %4805 = vmatprep.subr.bf16.mxu1 %v5114_v15 }
0x25fd   :  { %v3750_v20 = vpop.f32.mrb[104].mxu0 }
0x25fe   :  { %3757 = vrot.lane.b32.xlu1 %v3750_v20, %s6219_s24  ;;  %v4791_v24 = vpop.f32.mrb[105].mxu0 }
0x25ff   :  { %v3753_v25 = vpop.f32.mrb[106].mxu0 }
0x2600   :  { %v4792_v26 = vpop.f32.mrb[107].mxu0 }
0x2670   :  { %v3758_v28 = vpop.permute.xlu1 %3757 }
0x2671   :  { %v3760_v30 = vadd.f32 %v3758_v28, %v6006_v29 }
0x2673   :  { %5042 = vtanh.f32 %v3760_v30  ;;  %v4306_v44 = vmul.f32 -1.442695, %v3760_v30 }
0x267d   :  { %v5043_v33 = vpop.eup %5042 }
0x267e   :  { %3770 = vrot.lane.b32.xlu0 %v5043_v33, %s5118_s23 }
0x2685   :  { %v3678_v34 = vpop.f32.mrb[100].mxu1 }
0x2686   :  { %v3684_v35 = vadd.f32 %v3678_v34, %v5998_v11  ;;  %v4785_v18 = vpop.f32.mrb[101].mxu1 }
0x2687   :  { %v3681_v36 = vpop.f32.mrb[102].mxu1 }
0x2688   :  { %5044 = vtanh.f32 %v3684_v35  ;;  %v4786_v38 = vpop.f32.mrb[103].mxu1  ;;  %v4304_v29 = vmul.f32 -1.442695, %v3684_v35 }
0x2689   :  { %5046 = vpow2.f32 %v4306_v44 }
0x2692   :  { %v5045_v43 = vpop.eup %5044 }
0x2693   :  { %3694 = vrot.lane.b32.xlu0 %v5045_v43, %s5118_s23  ;;  %v5047_v45 = vpop.eup %5046 }
0x2694   :  { %v3764_v46 = vadd.f32 1.0, %v5047_v45 }
0x2696   :  { %5048 = vrcp.f32 %v3764_v46 }
0x2697   :  { %5050 = vpow2.f32 %v4304_v29 }
0x26a0   :  { %v5049_v31 = vpop.eup %5048 }
0x26a1   :  { %v5051_v11 = vpop.eup %5050  ;;  %v3768_v51 = vmul.f32 %v5049_v31, %v6063_v5 }
0x26a2   :  { %v3688_v48 = vadd.f32 1.0, %v5051_v11 }
0x26a4   :  { %5052 = vrcp.f32 %v3688_v48 }
0x26ae   :  { %v5053_v49 = vpop.eup %5052 }
0x26af   :  { %v3692_v55 = vmul.f32 %v5053_v49, %v3554_v17 }
0x26f0   :  { %v3771_v32 = vpop.permute.xlu0 %3770 }
0x26f1   :  { %v3773_v47 = vmul.f32 %v5049_v31, %v3771_v32 }
0x26f3   :  { %3775 = vrot.lane.b32.xlu1 %v3773_v47, %s6222_s2 }
0x2705   :  { %v3695_v50 = vpop.permute.xlu0 %3694 }
0x2706   :  { %v3697_v40 = vmul.f32 %v5053_v49, %v3695_v50 }
0x2708   :  { %3699 = vrot.lane.b32.xlu0 %v3697_v40, %s6222_s2 }
0x2765   :  { %v3776_v14 = vpop.permute.xlu1 %3775 }
0x2766   :  { %v6089_v53 = vadd.f32 %v3776_v14, %v3768_v51 }
0x2768   :  { %5054 = vtanh.f32 %v6089_v53 }
0x2772   :  { %v5055_v54 = vpop.eup %5054 }
0x2773   :  { %3781 = vrot.lane.b32.xlu1 %v5055_v54, %s6222_s2 }
0x277a   :  { %v3700_v56 = vpop.permute.xlu0 %3699 }
0x277b   :  { %v3702_v57 = vadd.f32 %v3700_v56, %v3692_v55 }
0x277d   :  { %5056 = vtanh.f32 %v3702_v57 }
0x2787   :  { %v5057_v59 = vpop.eup %5056 }
0x2788   :  { %3705 = vrot.lane.b32.xlu0 %v5057_v59, %s6222_s2 }
0x27e5   :  { %v3782_v60 = vpop.permute.xlu1 %3781 }
0x27e6   :  { %v3784_v62 = vmul.f32 %v5049_v31, %v3782_v60 }
0x27e8   :  { %v3857_v63 = vpack.c.bf16 %v3784_v62, %v3784_v62 }
0x27ea   :  { %3859 = vrot.lane.b32.xlu1 %v3857_v63, %s5131_s17 }
0x27fa   :  { %v3706_v0 = vpop.permute.xlu0 %3705 }
0x27fb   :  { %v3708_v1 = vmul.f32 %v5053_v49, %v3706_v0 }
0x27fd   :  { %v3785_v5 = vpack.c.bf16 %v3708_v1, %v3708_v1 }
0x27ff   :  { %3787 = vrot.lane.b32.xlu1 %v3785_v5, %s5117_s0 }
0x285c   :  { %v3860_v3 = vpop.permute.xlu1 %3859 }
0x285d   :  { %4802 = vmatmul.mubr.msk.bf16.vlgmr.msra.gmra.mrb[108].mxu0 %vm2889_vm8, %v3860_v3 }
0x285e   :  { %4812 = vmatpush3.bf16.msra.mxu0 %v5892_v2  ;;  %4813 = vmatprep.mubr.msk.bf16.mxu0 %vm5115_vm1, %v5114_v15 }
0x2871   :  { %v3788_v6 = vpop.permute.xlu1 %3787 }
0x2872   :  { %4796 = vmatmul.mubr.msk.bf16.vlgmr.msra.gmra.mrb[104].mxu1 %vm2889_vm8, %v3788_v6 }
0x2873   :  { %4806 = vmatpush3.bf16.msra.mxu1 %v5920_v41  ;;  %4807 = vmatprep.mubr.msk.bf16.mxu1 %vm5115_vm1, %v5114_v15 }
0x2874   :  { %4817 = vmatprep.subr.bf16.mxu1 %v5114_v15 }
0x2930   :  { %v3898_v58 = vpop.f32.mrb[108].mxu0 }
0x2931   :  { %3905 = vrot.lane.b32.xlu0 %v3898_v58, %s6219_s24  ;;  %v4803_v42 = vpop.f32.mrb[109].mxu0 }
0x2932   :  { %v3901_v8 = vpop.f32.mrb[110].mxu0 }
0x2933   :  { %v4804_v9 = vpop.f32.mrb[111].mxu0 }
0x2945   :  { %v3826_v2 = vpop.f32.mrb[104].mxu1 }
0x2946   :  { %v3832_v10 = vadd.f32 %v3826_v2, %v5965_v27  ;;  %v4797_v4 = vpop.f32.mrb[105].mxu1 }
0x2947   :  { %v3829_v12 = vpop.f32.mrb[106].mxu1 }
0x2948   :  { %5058 = vtanh.f32 %v3832_v10  ;;  %v4798_v13 = vpop.f32.mrb[107].mxu1  ;;  %v4308_v21 = vmul.f32 -1.442695, %v3832_v10 }
0x2952   :  { %v5059_v16 = vpop.eup %5058 }
0x2953   :  { %3842 = vrot.lane.b32.xlu0 %v5059_v16, %s5118_s23 }
0x29a3   :  { %v3906_v41 = vpop.permute.xlu0 %3905 }
0x29a4   :  { %v3908_v17 = vadd.f32 %v3906_v41, %v5973_v37 }
0x29a6   :  { %5060 = vtanh.f32 %v3908_v17  ;;  %v4310_v20 = vmul.f32 -1.442695, %v3908_v17 }
0x29a7   :  { %5062 = vpow2.f32 %v4308_v21  ;;  %v4868_v21 = vld [vmem:[%s6176_s20] sm:$0xff]  }
0x29b0   :  { %v5061_v22 = vpop.eup %5060 }
0x29b1   :  { %3918 = vrot.lane.b32.xlu1 %v5061_v22, %s5118_s23  ;;  %v5063_v39 = vpop.eup %5062 }
0x29b2   :  { %v3836_v7 = vadd.f32 1.0, %v5063_v39  ;;  %v4869_v39 = vld [vmem:[%s6176_s20 + $0x8] sm:$0xff]  }
0x29b4   :  { %5064 = vrcp.f32 %v3836_v7 }
0x29b5   :  { %5066 = vpow2.f32 %v4310_v20 }
0x29be   :  { %v5065_v27 = vpop.eup %5064 }
0x29bf   :  { %v5067_v24 = vpop.eup %5066  ;;  %v3840_v30 = vmul.f32 %v5065_v27, %v3702_v57 }
0x29c0   :  { %v3912_v25 = vadd.f32 1.0, %v5067_v24 }
0x29c2   :  { %5068 = vrcp.f32 %v3912_v25 }
0x29c5   :  { %v3843_v23 = vpop.permute.xlu0 %3842 }
0x29c6   :  { %v3845_v19 = vmul.f32 %v5065_v27, %v3843_v23 }
0x29c8   :  { %3847 = vrot.lane.b32.xlu0 %v3845_v19, %s6222_s2 }
0x29cc   :  { %v5069_v37 = vpop.eup %5068 }
0x29cd   :  { %v3916_v18 = vmul.f32 %v5069_v37, %v6089_v53 }
0x2a23   :  { %v3919_v26 = vpop.permute.xlu1 %3918 }
0x2a24   :  { %v3921_v28 = vmul.f32 %v5069_v37, %v3919_v26 }
0x2a26   :  { %3923 = vrot.lane.b32.xlu1 %v3921_v28, %s6222_s2 }
0x2a3a   :  { %v3848_v33 = vpop.permute.xlu0 %3847 }
0x2a3b   :  { %v3850_v34 = vadd.f32 %v3848_v33, %v3840_v30 }
0x2a3d   :  { %5070 = vtanh.f32 %v3850_v34 }
0x2a47   :  { %v5071_v35 = vpop.eup %5070 }
0x2a48   :  { %3853 = vrot.lane.b32.xlu0 %v5071_v35, %s6222_s2 }
0x2a98   :  { %v3924_v36 = vpop.permute.xlu1 %3923 }
0x2a99   :  { %v3926_v38 = vadd.f32 %v3924_v36, %v3916_v18 }
0x2a9b   :  { %5072 = vtanh.f32 %v3926_v38 }
0x2aa5   :  { %v5073_v43 = vpop.eup %5072 }
0x2aa6   :  { %3929 = vrot.lane.b32.xlu1 %v5073_v43, %s6222_s2 }
0x2aba   :  { %v3854_v44 = vpop.permute.xlu0 %3853 }
0x2abb   :  { %v3856_v45 = vmul.f32 %v5065_v27, %v3854_v44 }
0x2abd   :  { %v3933_v46 = vpack.c.bf16 %v3856_v45, %v3856_v45 }
0x2abf   :  { %3935 = vrot.lane.b32.xlu0 %v3933_v46, %s5117_s0 }
0x2b18   :  { %v3930_v29 = vpop.permute.xlu1 %3929 }
0x2b19   :  { %v3932_v31 = vmul.f32 %v5069_v37, %v3930_v29 }
0x2b1b   :  { %v4005_v32 = vpack.c.bf16 %v3932_v31, %v3932_v31 }
0x2b1d   :  { %4007 = vrot.lane.b32.xlu1 %v4005_v32, %s5131_s17 }
0x2b31   :  { %v3936_v47 = vpop.permute.xlu0 %3935 }
0x2b32   :  { %4808 = vmatmul.mubr.msk.bf16.vlgmr.msra.gmra.mrb[108].mxu1 %vm2889_vm8, %v3936_v47 }
0x2b33   :  { %4821 = vmatprep.mubr.msk.bf16.mxu1 %vm5115_vm1, %v5114_v15  ;;  %4818 = vmatpush3.bf16.msra.mxu1 %v4868_v21 }
0x2b34   :  { %4819 = vmatprep.subr.bf16.mxu1 %v5114_v15  ;;  %v4315_v15 = vld [vmem:[%s6177_s21] ss:$0 sm:$0xff] }
0x2b37   :  { %4820 = vmatpush3.bf16.msra.mxu1 %v4869_v39 }
0x2b8f   :  { %v4008_v11 = vpop.permute.xlu1 %4007 }
0x2b90   :  { %4814 = vmatmul.mubr.msk.bf16.vlgmr.msra.gmra.mrb[112].mxu0 %vm2889_vm8, %v4008_v11 }
0x2c05   :  { %v3974_v48 = vpop.f32.mrb[108].mxu1 }
0x2c06   :  { %v3980_v49 = vadd.f32 %v3974_v48, %v5934_v52  ;;  %v4809_v50 = vpop.f32.mrb[109].mxu1 }
0x2c07   :  { %v3977_v40 = vpop.f32.mrb[110].mxu1 }
0x2c08   :  { %5074 = vtanh.f32 %v3980_v49  ;;  %v4810_v51 = vpop.f32.mrb[111].mxu1  ;;  %v4312_v56 = vmul.f32 -1.442695, %v3980_v49 }
0x2c0a   :  { %5076 = vpow2.f32 %v4312_v56 }
0x2c12   :  { %v5075_v14 = vpop.eup %5074 }
0x2c13   :  { %3990 = vrot.lane.b32.xlu0 %v5075_v14, %s5118_s23 }
0x2c14   :  { %v5077_v59 = vpop.eup %5076 }
0x2c15   :  { %v3984_v60 = vadd.f32 1.0, %v5077_v59 }
0x2c17   :  { %5078 = vrcp.f32 %v3984_v60 }
0x2c21   :  { %v5079_v62 = vpop.eup %5078 }
0x2c22   :  { %v3988_v3 = vmul.f32 %v5079_v62, %v3850_v34 }
0x2c63   :  { %v4046_v53 = vpop.f32.mrb[112].mxu0 }
0x2c64   :  { %4053 = vrot.lane.b32.xlu1 %v4046_v53, %s6219_s24  ;;  %v4815_v54 = vpop.f32.mrb[113].mxu0 }
0x2c65   :  { %v4049_v55 = vpop.f32.mrb[114].mxu0 }
0x2c66   :  { %v4816_v57 = vpop.f32.mrb[115].mxu0 }
0x2c85   :  { %v3991_v52 = vpop.permute.xlu0 %3990 }
0x2c86   :  { %v3993_v63 = vmul.f32 %v5079_v62, %v3991_v52 }
0x2c88   :  { %3995 = vrot.lane.b32.xlu0 %v3993_v63, %s6222_s2 }
0x2cd6   :  { %v4054_v0 = vpop.permute.xlu1 %4053 }
0x2cd7   :  { %v4056_v1 = vadd.f32 %v4054_v0, %v5939_v61 }
0x2cd9   :  { %5080 = vtanh.f32 %v4056_v1  ;;  %v4314_v8 = vmul.f32 -1.442695, %v4056_v1 }
0x2ce3   :  { %v5081_v5 = vpop.eup %5080 }
0x2ce4   :  { %4066 = vrot.lane.b32.xlu1 %v5081_v5, %s5118_s23 }
0x2cfa   :  { %v3996_v6 = vpop.permute.xlu0 %3995 }
0x2cfb   :  { %v3998_v58 = vadd.f32 %v3996_v6, %v3988_v3 }
0x2cfd   :  { %5082 = vtanh.f32 %v3998_v58 }
0x2cfe   :  { %5084 = vpow2.f32 %v4314_v8 }
0x2d07   :  { %v5083_v42 = vpop.eup %5082 }
0x2d08   :  { %4001 = vrot.lane.b32.xlu0 %v5083_v42, %s6222_s2  ;;  %v5085_v9 = vpop.eup %5084 }
0x2d09   :  { %v4060_v2 = vadd.f32 1.0, %v5085_v9 }
0x2d0b   :  { %5086 = vrcp.f32 %v4060_v2 }
0x2d15   :  { %v5087_v10 = vpop.eup %5086 }
0x2d16   :  { %v4064_v16 = vmul.f32 %v5087_v10, %v3926_v38 }
0x2d56   :  { %v4067_v4 = vpop.permute.xlu1 %4066 }
0x2d57   :  { %v4069_v12 = vmul.f32 %v5087_v10, %v4067_v4 }
0x2d59   :  { %4071 = vrot.lane.b32.xlu1 %v4069_v12, %s6222_s2 }
0x2d7a   :  { %v4002_v61 = vpop.permute.xlu0 %4001 }
0x2d7b   :  { %v4004_v13 = vmul.f32 %v5079_v62, %v4002_v61 }
0x2d7d   :  { %4082 = vrot.lane.b32.xlu0 %v4004_v13, %s5117_s0 }
0x2dcb   :  { %v4072_v41 = vpop.permute.xlu1 %4071 }
0x2dcc   :  { %v4074_v17 = vadd.f32 %v4072_v41, %v4064_v16 }
0x2dce   :  { %5088 = vtanh.f32 %v4074_v17 }
0x2dd8   :  { %v5089_v22 = vpop.eup %5088 }
0x2dd9   :  { %4077 = vrot.lane.b32.xlu1 %v5089_v22, %s6222_s2  ;;  %s5132_s2 = smov [#allocation4]  }
0x2dda   :  { %s4165_s4 = sshll.u32 %s5132_s2, 4  ;;  %s4166_s4 = int_to_ptr.vmem [resolvable:$true] %s4165_s4 }
0x2ddb   :  { %s5090_s20 = scalar_lea.vmem %s4166_s4, 32  ;;  %p5095_p1 = scmp.lt.s32.totalorder %s4166_s4, %s4166_s4 }
0x2ddc   :  { %p5091_p0 = scmp.ne.s32.totalorder %s4166_s4, %s5090_s20  ;;  %p5096_p2 = scmp.lt.s32.totalorder %s5090_s20, %s5090_s20 }
0x2dde   :  { %p5097_p3 = por %p5096_p2, %p5095_p1 }
0x2de0   :  { %p5098_p4 = pnand %p5097_p3, %p5091_p0 }
0x2def   :  { %v4083_v23 = vpop.permute.xlu0 %4082 }
0x2e4b   :  { %v4078_v7 = vpop.permute.xlu1 %4077 }
0x2e4c   :  { %v4080_v27 = vmul.f32 %v5087_v10, %v4078_v7 }
0x2e4e   :  { %4086 = vrot.lane.b32.xlu1 %v4080_v27, %s6218_s5 }
0x2ec0   :  { %v4087_v19 = vpop.permute.xlu1 %4086 }
0x2ec1   :  { %v4089_v20 = vsel %vm2889_vm8, %v4083_v23, %v4087_v19 }
0x2ec2   :  { %v4090_v24 = vpack.c.bf16 %v4089_v20, %v4089_v20 }
0x2ec4   :  { %4822 = vmatmul.mubr.msk.bf16.vlgmr.msra.gmra.mrb[112].mxu1 %vm77_vm0, %v4090_v24 }
0x2f97   :  { %v4151_v25 = vpop.f32.mrb[112].mxu1 }
0x2f98   :  { %v4152_v37 = vadd.f32 %v4315_v15, %v4151_v25  ;;  %v4823_v26 = vpop.f32.mrb[113].mxu1 }
0x2f99   :  { %v4154_v28 = vpop.f32.mrb[114].mxu1 }
0x2f9a   :  { %v4824_v30 = vpop.f32.mrb[115].mxu1  ;;  %4158 = vst.msk [vmem:[#allocation4] sm:$0x3] %vm4157_vm9, %v4152_v37 }
0x2f9b   :  { %5101 = shalt.err (!%p5098_p4)
}
0x2f9c   :  { %s5102_s21 = scalar_lea.hbm %s6178_s22, 32 }
0x2f9d   :  { %p5103_p5 = scmp.ne.s32.totalorder %s6178_s22, %s5102_s21  ;;  %p5106_p6 = scmp.lt.u32.totalorder %s5102_s21, %s6178_s22 }
0x2f9f   :  { %p5108_p7 = pnand %p5106_p6, %p5103_p5 }
0x2fa1   :  { %5111 = shalt.err (!%p5108_p7)
}
0x2fa2   :  { %4168 = dma.vmem_to_hbm [thread:$0]  %s4166_s4, 32, %s6178_s22, [#allocation5]  }
0x2fa3   :  { %5112 = dma.done.wait [#allocation5], 32  }
0x2fa4   :  { %5113 = vsyncadd [#allocation5], 4294967264 }
0x2fa5   :  { %4172 = vsyncpa [#allocation5], 1 }

</bundles_post_ra>
